<compile_context>
chip_gen: v6e
topology: v6e:2x2x1
jax: 0.10.0
libtpu: 0.0.40
codegen_flags: <defaults>
</compile_context>

<pallas_src>
import functools

import jax
import jax.numpy as jnp
import numpy as np
from jax.experimental import pallas as pl
from jax.experimental.pallas import tpu as pltpu

DIM = 4        # module in/out channels
MID = 128      # intermediate width hard-coded in the module
BN_EPS = 1e-5
_NEG = -1e30   # running-max fill; safe ONLY because the pooled input is post-ReLU (>= 0)


# ----------------------------------------------------------------------------
# Fused kernel: the whole `pool` module for one image, channels-first (C, HW).
# ----------------------------------------------------------------------------
def fused_pool_kernel(xpatch_ref, w12x_ref, s12_ref, b12_ref, sc1_ref, bc1_ref,
                      wp_ref, sp_ref, bp_ref, wc2_ref, sc2_ref, bc2_ref,
                      o_ref, *, H, W):
    HW = H * W
    taps = [(dh, dw) for dh in (-1, 0, 1) for dw in (-1, 0, 1)]  # t = (dh+1)*3 + (dw+1)

    # Flat spatial index / column index along the lane axis (built once).
    flat = jax.lax.broadcasted_iota(jnp.int32, (1, HW), 1)
    col = flat % W

    def shift_flat(v, dh, dw, fill):
        # y[..., h*W + w] = v[..., (h+dh)*W + (w+dw)] when in bounds, else fill.
        # XLU lane rotation (pltpu.roll) + VPU masks -- no vld/vst copy chains.
        k = dh * W + dw
        if k == 0:
            return v
        y = pltpu.roll(v, (-k) % HW, axis=1)          # y[..., i] = v[..., (i+k) % HW]
        if dh != 0:                                    # row (flat) bound
            if k > 0:
                y = jnp.where(flat < HW - k, y, fill)
            else:
                y = jnp.where(flat >= -k, y, fill)
        if dw != 0:                                    # column bound (no wrap within a row)
            y = jnp.where((col + dw >= 0) & (col + dw < W), y, fill)
        return y

    def suffix_max(v, dh, dw, n):
        # Reverse running max (corner pool) over rows (dh=1) / cols (dw=1),
        # log-step doubling.  _NEG fill is safe: v is post-ReLU, so v >= 0.
        s = 1
        while s < n:
            v = jnp.maximum(v, shift_flat(v, dh * s, dw * s, _NEG))
            s *= 2
        return v

    def tap_sum(z, cout):
        # 3x3 "same" conv in post-matmul form: row group t of z holds the tap-t
        # projection; the conv output is the sum of tap-shifted row groups.
        acc = None
        for t, (dh, dw) in enumerate(taps):
            g = shift_flat(z[t * cout:(t + 1) * cout, :], dh, dw, 0.0)
            acc = g if acc is None else acc + g
        return acc

    xpatch = xpatch_ref[...]                                   # (9*DIM, HW) bf16

    # ---- p1_conv1 + p2_conv1 + conv1(1x1) merged into ONE MXU matmul ----
    pm_all = jnp.dot(w12x_ref[...], xpatch,
                     preferred_element_type=jnp.float32)       # (2*MID+DIM, HW)
    pm = jnp.maximum(pm_all[:2 * MID] * s12_ref[...] + b12_ref[...], 0.0)
    bn1 = pm_all[2 * MID:] * sc1_ref[...] + bc1_ref[...]       # conv1 + bn1 (no ReLU)

    # ---- corner pooling: TopPool on the p1 half, LeftPool on the p2 half ----
    top = suffix_max(pm[:MID], 1, 0, H)                        # reverse cummax over H
    left = suffix_max(pm[MID:], 0, 1, W)                       # reverse cummax over W
    pooled = (top + left).astype(jnp.bfloat16)                 # cast once (not per tap)

    # ---- p_conv1 (3x3, MID -> DIM): ONE matmul + 9 shifted adds, then BN ----
    z = jnp.dot(wp_ref[...], pooled, preferred_element_type=jnp.float32)   # (36, HW)
    p_bn1 = tap_sum(z, DIM) * sp_ref[...] + bp_ref[...]

    relu1 = jnp.maximum(p_bn1 + bn1, 0.0).astype(jnp.bfloat16)             # (DIM, HW)

    # ---- conv2 (3x3, DIM -> DIM) + BN + ReLU, same post-matmul form ----
    z2 = jnp.dot(wc2_ref[...], relu1, preferred_element_type=jnp.float32)  # (36, HW)
    out = tap_sum(z2, DIM) * sc2_ref[...] + bc2_ref[...]
    o_ref[...] = jnp.maximum(out, 0.0).astype(o_ref.dtype)     # (DIM, HW) lane-dense


# ----------------------------------------------------------------------------
# Parameter prep (matmul-ready channels-first layouts, bf16 weights, folded BN)
# ----------------------------------------------------------------------------
def pack_params(p):
    # Merged p1/p2 weights: row = output channel, col = tap*DIM + input channel.
    w_cat = jnp.concatenate([p["p1_w"], p["p2_w"]], axis=-1)            # (3,3,DIM,2*MID)
    w12 = jnp.transpose(w_cat, (3, 0, 1, 2)).reshape(2 * MID, 9 * DIM)
    # conv1 (1x1) folded in as 4 extra output rows hitting only the center tap.
    wc1_ext = jnp.zeros((DIM, 9 * DIM), jnp.float32)
    wc1_ext = wc1_ext.at[:, 4 * DIM:5 * DIM].set(p["c1_w"].T)
    w12x = jnp.concatenate([w12, wc1_ext], axis=0).astype(jnp.bfloat16)  # (2*MID+DIM, 36)
    return {
        "w12x": w12x,
        "s12": jnp.concatenate([p["p1_scale"], p["p2_scale"]]).reshape(2 * MID, 1),
        "b12": jnp.concatenate([p["p1_shift"], p["p2_shift"]]).reshape(2 * MID, 1),
        "sc1": p["c1_scale"].reshape(DIM, 1),
        "bc1": p["c1_shift"].reshape(DIM, 1),
        # p_conv1 / conv2 weights: row = tap*DIM + out channel, col = in channel.
        "wp": jnp.transpose(p["p_w"], (0, 1, 3, 2)).reshape(9 * DIM, MID).astype(jnp.bfloat16),
        "sp": p["p_scale"].reshape(DIM, 1),
        "bp": p["p_shift"].reshape(DIM, 1),
        "wc2": jnp.transpose(p["c2_w"], (0, 1, 3, 2)).reshape(9 * DIM, DIM).astype(jnp.bfloat16),
        "sc2": p["c2_scale"].reshape(DIM, 1),
        "bc2": p["c2_shift"].reshape(DIM, 1),
    }


# ----------------------------------------------------------------------------
# Public forward (single fused pallas_call; grid = batch)
# ----------------------------------------------------------------------------
@jax.jit
def pool_forward(x_nchw, pk):
    N, C, H, W = x_nchw.shape
    HW = H * W

    # im2col patch in channels-first (tap*C, HW) layout, built once in XLA,
    # already bf16.  Row block t holds x shifted by tap t; the center block
    # (rows 4*C:5*C) IS x, so no separate x operand is needed.
    xb = x_nchw.astype(jnp.bfloat16)
    xp = jnp.pad(xb, ((0, 0), (0, 0), (1, 1), (1, 1)))
    xpatch = jnp.concatenate(
        [xp[:, :, kh:kh + H, kw:kw + W].reshape(N, C, HW)
         for kh in range(3) for kw in range(3)], axis=1)                 # (N, 9C, HW)

    def rep(a):  # full-array block, replicated across the batch grid
        nd = a.ndim
        return pl.BlockSpec(a.shape, lambda n, nd=nd: (0,) * nd)

    weight_bytes = sum(int(np.prod(a.shape)) * a.dtype.itemsize for a in pk.values())
    flops = 2 * N * HW * (9 * C * (2 * MID + DIM) + MID * 9 * DIM + DIM * 9 * DIM)
    bytes_accessed = int(np.prod(xpatch.shape)) * 2 + N * DIM * HW * 4 + weight_bytes

    out = pl.pallas_call(
        functools.partial(fused_pool_kernel, H=H, W=W),
        out_shape=jax.ShapeDtypeStruct((N, DIM, HW), jnp.float32),
        grid=(N,),
        in_specs=[
            pl.BlockSpec((None, 9 * C, HW), lambda n: (n, 0, 0)),
            rep(pk["w12x"]), rep(pk["s12"]), rep(pk["b12"]),
            rep(pk["sc1"]), rep(pk["bc1"]),
            rep(pk["wp"]), rep(pk["sp"]), rep(pk["bp"]),
            rep(pk["wc2"]), rep(pk["sc2"]), rep(pk["bc2"]),
        ],
        out_specs=pl.BlockSpec((None, DIM, HW), lambda n: (n, 0, 0)),
        compiler_params=pltpu.CompilerParams(
            dimension_semantics=("parallel",),
            vmem_limit_bytes=48 * 1024 * 1024),
        cost_estimate=pl.CostEstimate(flops=flops, transcendentals=0,
                                      bytes_accessed=bytes_accessed),
    )(xpatch, pk["w12x"], pk["s12"], pk["b12"], pk["sc1"], pk["bc1"],
      pk["wp"], pk["sp"], pk["bp"], pk["wc2"], pk["sc2"], pk["bc2"])

    return out.reshape(N, DIM, H, W)           # already NCHW -- no transpose


# ----------------------------------------------------------------------------
# Synthetic parameter init + BN folding (eval mode)
# ----------------------------------------------------------------------------
def make_bn(key, c):
    k1, k2, k3, k4 = jax.random.split(key, 4)
    gamma = 1.0 + 0.1 * jax.random.normal(k1, (c,), jnp.float32)
    beta = 0.1 * jax.random.normal(k2, (c,), jnp.float32)
    mean = 0.1 * jax.random.normal(k3, (c,), jnp.float32)
    var = 0.5 + jax.random.uniform(k4, (c,), jnp.float32)
    scale = gamma / jnp.sqrt(var + BN_EPS)
    shift = beta - mean * scale
    return scale, shift


def init_params(key, dim):
    ks = jax.random.split(key, 12)
    p = {}
    p["p1_w"] = 0.1 * jax.random.normal(ks[0], (3, 3, dim, MID), jnp.float32)
    p["p1_scale"], p["p1_shift"] = make_bn(ks[1], MID)
    p["p2_w"] = 0.1 * jax.random.normal(ks[2], (3, 3, dim, MID), jnp.float32)
    p["p2_scale"], p["p2_shift"] = make_bn(ks[3], MID)
    p["p_w"] = 0.1 * jax.random.normal(ks[4], (3, 3, MID, dim), jnp.float32)
    p["p_scale"], p["p_shift"] = make_bn(ks[5], dim)
    p["c1_w"] = 0.1 * jax.random.normal(ks[6], (dim, dim), jnp.float32)
    p["c1_scale"], p["c1_shift"] = make_bn(ks[7], dim)
    p["c2_w"] = 0.1 * jax.random.normal(ks[8], (3, 3, dim, dim), jnp.float32)
    p["c2_scale"], p["c2_shift"] = make_bn(ks[9], dim)
    return p


# ----------------------------------------------------------------------------
# Pure-JAX reference (same bf16 matmul operands, f32 accumulation)
# ----------------------------------------------------------------------------
def _conv_ref(x, w, pad):
    return jax.lax.conv_general_dilated(
        x.astype(jnp.bfloat16), w.astype(jnp.bfloat16), (1, 1),
        [(pad, pad), (pad, pad)],
        dimension_numbers=("NHWC", "HWIO", "NHWC"),
        preferred_element_type=jnp.float32)


def pool_forward_ref(x_nchw, params):
    x = jnp.transpose(x_nchw, (0, 2, 3, 1))
    p1 = jnp.maximum(_conv_ref(x, params["p1_w"], 1) * params["p1_scale"]
                     + params["p1_shift"], 0.0)
    p2 = jnp.maximum(_conv_ref(x, params["p2_w"], 1) * params["p2_scale"]
                     + params["p2_shift"], 0.0)
    top = jax.lax.cummax(p1, axis=1, reverse=True)      # TopPool
    left = jax.lax.cummax(p2, axis=2, reverse=True)     # LeftPool
    p_bn1 = (_conv_ref(top + left, params["p_w"], 1) * params["p_scale"]
             + params["p_shift"])
    bn1 = (jnp.dot(x.astype(jnp.bfloat16), params["c1_w"].astype(jnp.bfloat16),
                   preferred_element_type=jnp.float32)
           * params["c1_scale"] + params["c1_shift"])
    relu1 = jnp.maximum(p_bn1 + bn1, 0.0)
    out = jnp.maximum(_conv_ref(relu1, params["c2_w"], 1) * params["c2_scale"]
                      + params["c2_shift"], 0.0)
    return jnp.transpose(out, (0, 3, 1, 2))


if __name__ == "__main__":
    key = jax.random.PRNGKey(0)
    kx, kp = jax.random.split(key)
    N, dim, H, W = 2, DIM, 16, 16
    x = jax.random.normal(kx, (N, dim, H, W), jnp.float32)   # NCHW, like PyTorch
    params = init_params(kp, dim)
    packed = pack_params(params)

    out = jax.block_until_ready(pool_forward(x, packed))
    ref = jax.block_until_ready(pool_forward_ref(x, params))
    np.testing.assert_allclose(np.asarray(out), np.asarray(ref), rtol=2e-3, atol=2e-3)

    print("KERNEL_OK")
</pallas_src>

<mosaic_0001>
module attributes {stable_mosaic.version = 11 : i64} {
  func.func @fused_pool_kernel(%arg0: i32, %arg1: memref<1x36x256xbf16, #tpu.memory_space<vmem>>, %arg2: memref<260x36xbf16, #tpu.memory_space<vmem>>, %arg3: memref<256x1xf32, #tpu.memory_space<vmem>>, %arg4: memref<256x1xf32, #tpu.memory_space<vmem>>, %arg5: memref<4x1xf32, #tpu.memory_space<vmem>>, %arg6: memref<4x1xf32, #tpu.memory_space<vmem>>, %arg7: memref<36x128xbf16, #tpu.memory_space<vmem>>, %arg8: memref<4x1xf32, #tpu.memory_space<vmem>>, %arg9: memref<4x1xf32, #tpu.memory_space<vmem>>, %arg10: memref<36x4xbf16, #tpu.memory_space<vmem>>, %arg11: memref<4x1xf32, #tpu.memory_space<vmem>>, %arg12: memref<4x1xf32, #tpu.memory_space<vmem>>, %arg13: memref<1x4x256xf32, #tpu.memory_space<vmem>>) attributes {dimension_semantics = [#tpu.dimension_semantics<parallel>], iteration_bounds = array<i64: 2>, scalar_prefetch = 0 : i64, scratch_operands = 0 : i64, tpu.core_type = #tpu.core_type<tc>, window_params = [{transform_indices = @transform_0, window_bounds = array<i64: 1, 36, 256>}, {pipeline_mode = #tpu.pipeline_mode<synchronous>, transform_indices = @transform_1, window_bounds = array<i64: 260, 36>}, {pipeline_mode = #tpu.pipeline_mode<synchronous>, transform_indices = @transform_2, window_bounds = array<i64: 256, 1>}, {pipeline_mode = #tpu.pipeline_mode<synchronous>, transform_indices = @transform_3, window_bounds = array<i64: 256, 1>}, {pipeline_mode = #tpu.pipeline_mode<synchronous>, transform_indices = @transform_4, window_bounds = array<i64: 4, 1>}, {pipeline_mode = #tpu.pipeline_mode<synchronous>, transform_indices = @transform_5, window_bounds = array<i64: 4, 1>}, {pipeline_mode = #tpu.pipeline_mode<synchronous>, transform_indices = @transform_6, window_bounds = array<i64: 36, 128>}, {pipeline_mode = #tpu.pipeline_mode<synchronous>, transform_indices = @transform_7, window_bounds = array<i64: 4, 1>}, {pipeline_mode = #tpu.pipeline_mode<synchronous>, transform_indices = @transform_8, window_bounds = array<i64: 4, 1>}, {pipeline_mode = #tpu.pipeline_mode<synchronous>, transform_indices = @transform_9, window_bounds = array<i64: 36, 4>}, {pipeline_mode = #tpu.pipeline_mode<synchronous>, transform_indices = @transform_10, window_bounds = array<i64: 4, 1>}, {pipeline_mode = #tpu.pipeline_mode<synchronous>, transform_indices = @transform_11, window_bounds = array<i64: 4, 1>}, {transform_indices = @transform_12, window_bounds = array<i64: 1, 4, 256>}]} {
    %0 = tpu.iota {dimensions = array<i32: 1>} : vector<1x256xi32>
    %c16_i32 = arith.constant 16 : i32
    %c0_i32 = arith.constant 0 : i32
    %1 = arith.cmpi eq, %c16_i32, %c0_i32 : i32
    %c1_i32 = arith.constant 1 : i32
    %2 = arith.select %1, %c1_i32, %c16_i32 : i32
    %3 = vector.broadcast %2 : i32 to vector<1x256xi32>
    %4 = arith.remsi %0, %3 : vector<1x256xi32>
    %c0_i32_0 = arith.constant 0 : i32
    %5 = vector.broadcast %c0_i32_0 : i32 to vector<1x256xi32>
    %6 = arith.cmpi ne, %4, %5 : vector<1x256xi32>
    %c0_i32_1 = arith.constant 0 : i32
    %7 = vector.broadcast %c0_i32_1 : i32 to vector<1x256xi32>
    %8 = arith.cmpi slt, %4, %7 : vector<1x256xi32>
    %c0_i32_2 = arith.constant 0 : i32
    %9 = arith.cmpi slt, %2, %c0_i32_2 : i32
    %10 = vector.broadcast %9 : i1 to vector<1x256xi1>
    %11 = vector.broadcast %10 : vector<1x256xi1> to vector<1x256xi1>
    %12 = arith.xori %8, %11 : vector<1x256xi1>
    %13 = arith.andi %12, %6 : vector<1x256xi1>
    %14 = vector.broadcast %2 : i32 to vector<1x256xi32>
    %15 = arith.addi %4, %14 : vector<1x256xi32>
    %16 = arith.select %13, %15, %4 : vector<1x256xi1>, vector<1x256xi32>
    %c0 = arith.constant 0 : index
    %c0_3 = arith.constant 0 : index
    %c0_4 = arith.constant 0 : index
    %17 = vector.load %arg1[%c0, %c0_3, %c0_4] : memref<1x36x256xbf16, #tpu.memory_space<vmem>>, vector<1x36x256xbf16>
    %18 = vector.shape_cast %17 : vector<1x36x256xbf16> to vector<36x256xbf16>
    %c0_5 = arith.constant 0 : index
    %c0_6 = arith.constant 0 : index
    %19 = vector.load %arg2[%c0_5, %c0_6] : memref<260x36xbf16, #tpu.memory_space<vmem>>, vector<260x36xbf16>
    %cst = arith.constant dense<0.000000e+00> : vector<260x256xf32>
    %20 = tpu.matmul %19, %18, %cst {dimension_numbers = #tpu.dot_dimension_numbers<[1], [0], [0], [1], [0, 0, 1, 1], [], []>} : vector<260x36xbf16>, vector<36x256xbf16>, vector<260x256xf32> -> vector<260x256xf32>
    %21 = vector.extract_strided_slice %20 {offsets = [0, 0], sizes = [256, 256], strides = [1, 1]} : vector<260x256xf32> to vector<256x256xf32>
    %c0_7 = arith.constant 0 : index
    %c0_8 = arith.constant 0 : index
    %22 = vector.load %arg3[%c0_7, %c0_8] : memref<256x1xf32, #tpu.memory_space<vmem>>, vector<256x1xf32>
    %23 = vector.broadcast %22 : vector<256x1xf32> to vector<256x256xf32>
    %24 = arith.mulf %21, %23 : vector<256x256xf32>
    %c0_9 = arith.constant 0 : index
    %c0_10 = arith.constant 0 : index
    %25 = vector.load %arg4[%c0_9, %c0_10] : memref<256x1xf32, #tpu.memory_space<vmem>>, vector<256x1xf32>
    %26 = vector.broadcast %25 : vector<256x1xf32> to vector<256x256xf32>
    %27 = arith.addf %24, %26 : vector<256x256xf32>
    %cst_11 = arith.constant 0.000000e+00 : f32
    %28 = vector.broadcast %cst_11 : f32 to vector<256x256xf32>
    %29 = arith.maximumf %27, %28 : vector<256x256xf32>
    %30 = vector.extract_strided_slice %20 {offsets = [256, 0], sizes = [4, 256], strides = [1, 1]} : vector<260x256xf32> to vector<4x256xf32>
    %c0_12 = arith.constant 0 : index
    %c0_13 = arith.constant 0 : index
    %31 = vector.load %arg5[%c0_12, %c0_13] : memref<4x1xf32, #tpu.memory_space<vmem>>, vector<4x1xf32>
    %32 = vector.broadcast %31 : vector<4x1xf32> to vector<4x256xf32>
    %33 = arith.mulf %30, %32 : vector<4x256xf32>
    %c0_14 = arith.constant 0 : index
    %c0_15 = arith.constant 0 : index
    %34 = vector.load %arg6[%c0_14, %c0_15] : memref<4x1xf32, #tpu.memory_space<vmem>>, vector<4x1xf32>
    %35 = vector.broadcast %34 : vector<4x1xf32> to vector<4x256xf32>
    %36 = arith.addf %33, %35 : vector<4x256xf32>
    %37 = vector.extract_strided_slice %29 {offsets = [0, 0], sizes = [128, 256], strides = [1, 1]} : vector<256x256xf32> to vector<128x256xf32>
    %c240_i32 = arith.constant 240 : i32
    %38 = tpu.dynamic_rotate %37 by %c240_i32 dim 1 : vector<128x256xf32>, i32 -> vector<128x256xf32>
    %c240_i32_16 = arith.constant 240 : i32
    %39 = vector.broadcast %c240_i32_16 : i32 to vector<1x256xi32>
    %40 = arith.cmpi slt, %0, %39 : vector<1x256xi32>
    %cst_17 = arith.constant -1.000000e+30 : f32
    %41 = vector.shape_cast %40 : vector<1x256xi1> to vector<1x256xi1>
    %42 = vector.broadcast %41 : vector<1x256xi1> to vector<128x256xi1>
    %43 = vector.broadcast %cst_17 : f32 to vector<128x256xf32>
    %44 = arith.select %42, %38, %43 : vector<128x256xi1>, vector<128x256xf32>
    %45 = arith.maximumf %37, %44 : vector<128x256xf32>
    %c224_i32 = arith.constant 224 : i32
    %46 = tpu.dynamic_rotate %45 by %c224_i32 dim 1 : vector<128x256xf32>, i32 -> vector<128x256xf32>
    %c224_i32_18 = arith.constant 224 : i32
    %47 = vector.broadcast %c224_i32_18 : i32 to vector<1x256xi32>
    %48 = arith.cmpi slt, %0, %47 : vector<1x256xi32>
    %cst_19 = arith.constant -1.000000e+30 : f32
    %49 = vector.shape_cast %48 : vector<1x256xi1> to vector<1x256xi1>
    %50 = vector.broadcast %49 : vector<1x256xi1> to vector<128x256xi1>
    %51 = vector.broadcast %cst_19 : f32 to vector<128x256xf32>
    %52 = arith.select %50, %46, %51 : vector<128x256xi1>, vector<128x256xf32>
    %53 = arith.maximumf %45, %52 : vector<128x256xf32>
    %c192_i32 = arith.constant 192 : i32
    %54 = tpu.dynamic_rotate %53 by %c192_i32 dim 1 : vector<128x256xf32>, i32 -> vector<128x256xf32>
    %c192_i32_20 = arith.constant 192 : i32
    %55 = vector.broadcast %c192_i32_20 : i32 to vector<1x256xi32>
    %56 = arith.cmpi slt, %0, %55 : vector<1x256xi32>
    %cst_21 = arith.constant -1.000000e+30 : f32
    %57 = vector.shape_cast %56 : vector<1x256xi1> to vector<1x256xi1>
    %58 = vector.broadcast %57 : vector<1x256xi1> to vector<128x256xi1>
    %59 = vector.broadcast %cst_21 : f32 to vector<128x256xf32>
    %60 = arith.select %58, %54, %59 : vector<128x256xi1>, vector<128x256xf32>
    %61 = arith.maximumf %53, %60 : vector<128x256xf32>
    %c128_i32 = arith.constant 128 : i32
    %62 = tpu.dynamic_rotate %61 by %c128_i32 dim 1 : vector<128x256xf32>, i32 -> vector<128x256xf32>
    %c128_i32_22 = arith.constant 128 : i32
    %63 = vector.broadcast %c128_i32_22 : i32 to vector<1x256xi32>
    %64 = arith.cmpi slt, %0, %63 : vector<1x256xi32>
    %cst_23 = arith.constant -1.000000e+30 : f32
    %65 = vector.shape_cast %64 : vector<1x256xi1> to vector<1x256xi1>
    %66 = vector.broadcast %65 : vector<1x256xi1> to vector<128x256xi1>
    %67 = vector.broadcast %cst_23 : f32 to vector<128x256xf32>
    %68 = arith.select %66, %62, %67 : vector<128x256xi1>, vector<128x256xf32>
    %69 = arith.maximumf %61, %68 : vector<128x256xf32>
    %70 = vector.extract_strided_slice %29 {offsets = [128, 0], sizes = [128, 256], strides = [1, 1]} : vector<256x256xf32> to vector<128x256xf32>
    %c255_i32 = arith.constant 255 : i32
    %71 = tpu.dynamic_rotate %70 by %c255_i32 dim 1 : vector<128x256xf32>, i32 -> vector<128x256xf32>
    %c1_i32_24 = arith.constant 1 : i32
    %72 = vector.broadcast %c1_i32_24 : i32 to vector<1x256xi32>
    %73 = arith.addi %16, %72 : vector<1x256xi32>
    %c0_i32_25 = arith.constant 0 : i32
    %74 = vector.broadcast %c0_i32_25 : i32 to vector<1x256xi32>
    %75 = arith.cmpi sge, %73, %74 : vector<1x256xi32>
    %c1_i32_26 = arith.constant 1 : i32
    %76 = vector.broadcast %c1_i32_26 : i32 to vector<1x256xi32>
    %77 = arith.addi %16, %76 : vector<1x256xi32>
    %c16_i32_27 = arith.constant 16 : i32
    %78 = vector.broadcast %c16_i32_27 : i32 to vector<1x256xi32>
    %79 = arith.cmpi slt, %77, %78 : vector<1x256xi32>
    %80 = arith.andi %75, %79 : vector<1x256xi1>
    %cst_28 = arith.constant -1.000000e+30 : f32
    %81 = vector.shape_cast %80 : vector<1x256xi1> to vector<1x256xi1>
    %82 = vector.broadcast %81 : vector<1x256xi1> to vector<128x256xi1>
    %83 = vector.broadcast %cst_28 : f32 to vector<128x256xf32>
    %84 = arith.select %82, %71, %83 : vector<128x256xi1>, vector<128x256xf32>
    %85 = arith.maximumf %70, %84 : vector<128x256xf32>
    %c254_i32 = arith.constant 254 : i32
    %86 = tpu.dynamic_rotate %85 by %c254_i32 dim 1 : vector<128x256xf32>, i32 -> vector<128x256xf32>
    %c2_i32 = arith.constant 2 : i32
    %87 = vector.broadcast %c2_i32 : i32 to vector<1x256xi32>
    %88 = arith.addi %16, %87 : vector<1x256xi32>
    %c0_i32_29 = arith.constant 0 : i32
    %89 = vector.broadcast %c0_i32_29 : i32 to vector<1x256xi32>
    %90 = arith.cmpi sge, %88, %89 : vector<1x256xi32>
    %c2_i32_30 = arith.constant 2 : i32
    %91 = vector.broadcast %c2_i32_30 : i32 to vector<1x256xi32>
    %92 = arith.addi %16, %91 : vector<1x256xi32>
    %c16_i32_31 = arith.constant 16 : i32
    %93 = vector.broadcast %c16_i32_31 : i32 to vector<1x256xi32>
    %94 = arith.cmpi slt, %92, %93 : vector<1x256xi32>
    %95 = arith.andi %90, %94 : vector<1x256xi1>
    %cst_32 = arith.constant -1.000000e+30 : f32
    %96 = vector.shape_cast %95 : vector<1x256xi1> to vector<1x256xi1>
    %97 = vector.broadcast %96 : vector<1x256xi1> to vector<128x256xi1>
    %98 = vector.broadcast %cst_32 : f32 to vector<128x256xf32>
    %99 = arith.select %97, %86, %98 : vector<128x256xi1>, vector<128x256xf32>
    %100 = arith.maximumf %85, %99 : vector<128x256xf32>
    %c252_i32 = arith.constant 252 : i32
    %101 = tpu.dynamic_rotate %100 by %c252_i32 dim 1 : vector<128x256xf32>, i32 -> vector<128x256xf32>
    %c4_i32 = arith.constant 4 : i32
    %102 = vector.broadcast %c4_i32 : i32 to vector<1x256xi32>
    %103 = arith.addi %16, %102 : vector<1x256xi32>
    %c0_i32_33 = arith.constant 0 : i32
    %104 = vector.broadcast %c0_i32_33 : i32 to vector<1x256xi32>
    %105 = arith.cmpi sge, %103, %104 : vector<1x256xi32>
    %c4_i32_34 = arith.constant 4 : i32
    %106 = vector.broadcast %c4_i32_34 : i32 to vector<1x256xi32>
    %107 = arith.addi %16, %106 : vector<1x256xi32>
    %c16_i32_35 = arith.constant 16 : i32
    %108 = vector.broadcast %c16_i32_35 : i32 to vector<1x256xi32>
    %109 = arith.cmpi slt, %107, %108 : vector<1x256xi32>
    %110 = arith.andi %105, %109 : vector<1x256xi1>
    %cst_36 = arith.constant -1.000000e+30 : f32
    %111 = vector.shape_cast %110 : vector<1x256xi1> to vector<1x256xi1>
    %112 = vector.broadcast %111 : vector<1x256xi1> to vector<128x256xi1>
    %113 = vector.broadcast %cst_36 : f32 to vector<128x256xf32>
    %114 = arith.select %112, %101, %113 : vector<128x256xi1>, vector<128x256xf32>
    %115 = arith.maximumf %100, %114 : vector<128x256xf32>
    %c248_i32 = arith.constant 248 : i32
    %116 = tpu.dynamic_rotate %115 by %c248_i32 dim 1 : vector<128x256xf32>, i32 -> vector<128x256xf32>
    %c8_i32 = arith.constant 8 : i32
    %117 = vector.broadcast %c8_i32 : i32 to vector<1x256xi32>
    %118 = arith.addi %16, %117 : vector<1x256xi32>
    %c0_i32_37 = arith.constant 0 : i32
    %119 = vector.broadcast %c0_i32_37 : i32 to vector<1x256xi32>
    %120 = arith.cmpi sge, %118, %119 : vector<1x256xi32>
    %c8_i32_38 = arith.constant 8 : i32
    %121 = vector.broadcast %c8_i32_38 : i32 to vector<1x256xi32>
    %122 = arith.addi %16, %121 : vector<1x256xi32>
    %c16_i32_39 = arith.constant 16 : i32
    %123 = vector.broadcast %c16_i32_39 : i32 to vector<1x256xi32>
    %124 = arith.cmpi slt, %122, %123 : vector<1x256xi32>
    %125 = arith.andi %120, %124 : vector<1x256xi1>
    %cst_40 = arith.constant -1.000000e+30 : f32
    %126 = vector.shape_cast %125 : vector<1x256xi1> to vector<1x256xi1>
    %127 = vector.broadcast %126 : vector<1x256xi1> to vector<128x256xi1>
    %128 = vector.broadcast %cst_40 : f32 to vector<128x256xf32>
    %129 = arith.select %127, %116, %128 : vector<128x256xi1>, vector<128x256xf32>
    %130 = arith.maximumf %115, %129 : vector<128x256xf32>
    %131 = arith.addf %69, %130 : vector<128x256xf32>
    %132 = arith.truncf %131 : vector<128x256xf32> to vector<128x256xbf16>
    %c0_41 = arith.constant 0 : index
    %c0_42 = arith.constant 0 : index
    %133 = vector.load %arg7[%c0_41, %c0_42] : memref<36x128xbf16, #tpu.memory_space<vmem>>, vector<36x128xbf16>
    %cst_43 = arith.constant dense<0.000000e+00> : vector<36x256xf32>
    %134 = tpu.matmul %133, %132, %cst_43 {dimension_numbers = #tpu.dot_dimension_numbers<[1], [0], [0], [1], [0, 0, 1, 1], [], []>} : vector<36x128xbf16>, vector<128x256xbf16>, vector<36x256xf32> -> vector<36x256xf32>
    %135 = vector.extract_strided_slice %134 {offsets = [0, 0], sizes = [4, 256], strides = [1, 1]} : vector<36x256xf32> to vector<4x256xf32>
    %c17_i32 = arith.constant 17 : i32
    %136 = tpu.dynamic_rotate %135 by %c17_i32 dim 1 : vector<4x256xf32>, i32 -> vector<4x256xf32>
    %c17_i32_44 = arith.constant 17 : i32
    %137 = vector.broadcast %c17_i32_44 : i32 to vector<1x256xi32>
    %138 = arith.cmpi sge, %0, %137 : vector<1x256xi32>
    %cst_45 = arith.constant 0.000000e+00 : f32
    %139 = vector.shape_cast %138 : vector<1x256xi1> to vector<1x256xi1>
    %140 = vector.broadcast %139 : vector<1x256xi1> to vector<4x256xi1>
    %141 = vector.broadcast %cst_45 : f32 to vector<4x256xf32>
    %142 = arith.select %140, %136, %141 : vector<4x256xi1>, vector<4x256xf32>
    %c-1_i32 = arith.constant -1 : i32
    %143 = vector.broadcast %c-1_i32 : i32 to vector<1x256xi32>
    %144 = arith.addi %16, %143 : vector<1x256xi32>
    %c0_i32_46 = arith.constant 0 : i32
    %145 = vector.broadcast %c0_i32_46 : i32 to vector<1x256xi32>
    %146 = arith.cmpi sge, %144, %145 : vector<1x256xi32>
    %c-1_i32_47 = arith.constant -1 : i32
    %147 = vector.broadcast %c-1_i32_47 : i32 to vector<1x256xi32>
    %148 = arith.addi %16, %147 : vector<1x256xi32>
    %c16_i32_48 = arith.constant 16 : i32
    %149 = vector.broadcast %c16_i32_48 : i32 to vector<1x256xi32>
    %150 = arith.cmpi slt, %148, %149 : vector<1x256xi32>
    %151 = arith.andi %146, %150 : vector<1x256xi1>
    %cst_49 = arith.constant 0.000000e+00 : f32
    %152 = vector.shape_cast %151 : vector<1x256xi1> to vector<1x256xi1>
    %153 = vector.broadcast %152 : vector<1x256xi1> to vector<4x256xi1>
    %154 = vector.broadcast %cst_49 : f32 to vector<4x256xf32>
    %155 = arith.select %153, %142, %154 : vector<4x256xi1>, vector<4x256xf32>
    %156 = vector.extract_strided_slice %134 {offsets = [4, 0], sizes = [4, 256], strides = [1, 1]} : vector<36x256xf32> to vector<4x256xf32>
    %c16_i32_50 = arith.constant 16 : i32
    %157 = tpu.dynamic_rotate %156 by %c16_i32_50 dim 1 : vector<4x256xf32>, i32 -> vector<4x256xf32>
    %c16_i32_51 = arith.constant 16 : i32
    %158 = vector.broadcast %c16_i32_51 : i32 to vector<1x256xi32>
    %159 = arith.cmpi sge, %0, %158 : vector<1x256xi32>
    %cst_52 = arith.constant 0.000000e+00 : f32
    %160 = vector.shape_cast %159 : vector<1x256xi1> to vector<1x256xi1>
    %161 = vector.broadcast %160 : vector<1x256xi1> to vector<4x256xi1>
    %162 = vector.broadcast %cst_52 : f32 to vector<4x256xf32>
    %163 = arith.select %161, %157, %162 : vector<4x256xi1>, vector<4x256xf32>
    %164 = arith.addf %155, %163 : vector<4x256xf32>
    %165 = vector.extract_strided_slice %134 {offsets = [8, 0], sizes = [4, 256], strides = [1, 1]} : vector<36x256xf32> to vector<4x256xf32>
    %c15_i32 = arith.constant 15 : i32
    %166 = tpu.dynamic_rotate %165 by %c15_i32 dim 1 : vector<4x256xf32>, i32 -> vector<4x256xf32>
    %c15_i32_53 = arith.constant 15 : i32
    %167 = vector.broadcast %c15_i32_53 : i32 to vector<1x256xi32>
    %168 = arith.cmpi sge, %0, %167 : vector<1x256xi32>
    %cst_54 = arith.constant 0.000000e+00 : f32
    %169 = vector.shape_cast %168 : vector<1x256xi1> to vector<1x256xi1>
    %170 = vector.broadcast %169 : vector<1x256xi1> to vector<4x256xi1>
    %171 = vector.broadcast %cst_54 : f32 to vector<4x256xf32>
    %172 = arith.select %170, %166, %171 : vector<4x256xi1>, vector<4x256xf32>
    %c1_i32_55 = arith.constant 1 : i32
    %173 = vector.broadcast %c1_i32_55 : i32 to vector<1x256xi32>
    %174 = arith.addi %16, %173 : vector<1x256xi32>
    %c0_i32_56 = arith.constant 0 : i32
    %175 = vector.broadcast %c0_i32_56 : i32 to vector<1x256xi32>
    %176 = arith.cmpi sge, %174, %175 : vector<1x256xi32>
    %c1_i32_57 = arith.constant 1 : i32
    %177 = vector.broadcast %c1_i32_57 : i32 to vector<1x256xi32>
    %178 = arith.addi %16, %177 : vector<1x256xi32>
    %c16_i32_58 = arith.constant 16 : i32
    %179 = vector.broadcast %c16_i32_58 : i32 to vector<1x256xi32>
    %180 = arith.cmpi slt, %178, %179 : vector<1x256xi32>
    %181 = arith.andi %176, %180 : vector<1x256xi1>
    %cst_59 = arith.constant 0.000000e+00 : f32
    %182 = vector.shape_cast %181 : vector<1x256xi1> to vector<1x256xi1>
    %183 = vector.broadcast %182 : vector<1x256xi1> to vector<4x256xi1>
    %184 = vector.broadcast %cst_59 : f32 to vector<4x256xf32>
    %185 = arith.select %183, %172, %184 : vector<4x256xi1>, vector<4x256xf32>
    %186 = arith.addf %164, %185 : vector<4x256xf32>
    %187 = vector.extract_strided_slice %134 {offsets = [12, 0], sizes = [4, 256], strides = [1, 1]} : vector<36x256xf32> to vector<4x256xf32>
    %c1_i32_60 = arith.constant 1 : i32
    %188 = tpu.dynamic_rotate %187 by %c1_i32_60 dim 1 : vector<4x256xf32>, i32 -> vector<4x256xf32>
    %c-1_i32_61 = arith.constant -1 : i32
    %189 = vector.broadcast %c-1_i32_61 : i32 to vector<1x256xi32>
    %190 = arith.addi %16, %189 : vector<1x256xi32>
    %c0_i32_62 = arith.constant 0 : i32
    %191 = vector.broadcast %c0_i32_62 : i32 to vector<1x256xi32>
    %192 = arith.cmpi sge, %190, %191 : vector<1x256xi32>
    %c-1_i32_63 = arith.constant -1 : i32
    %193 = vector.broadcast %c-1_i32_63 : i32 to vector<1x256xi32>
    %194 = arith.addi %16, %193 : vector<1x256xi32>
    %c16_i32_64 = arith.constant 16 : i32
    %195 = vector.broadcast %c16_i32_64 : i32 to vector<1x256xi32>
    %196 = arith.cmpi slt, %194, %195 : vector<1x256xi32>
    %197 = arith.andi %192, %196 : vector<1x256xi1>
    %cst_65 = arith.constant 0.000000e+00 : f32
    %198 = vector.shape_cast %197 : vector<1x256xi1> to vector<1x256xi1>
    %199 = vector.broadcast %198 : vector<1x256xi1> to vector<4x256xi1>
    %200 = vector.broadcast %cst_65 : f32 to vector<4x256xf32>
    %201 = arith.select %199, %188, %200 : vector<4x256xi1>, vector<4x256xf32>
    %202 = arith.addf %186, %201 : vector<4x256xf32>
    %203 = vector.extract_strided_slice %134 {offsets = [16, 0], sizes = [4, 256], strides = [1, 1]} : vector<36x256xf32> to vector<4x256xf32>
    %204 = arith.addf %202, %203 : vector<4x256xf32>
    %205 = vector.extract_strided_slice %134 {offsets = [20, 0], sizes = [4, 256], strides = [1, 1]} : vector<36x256xf32> to vector<4x256xf32>
    %c255_i32_66 = arith.constant 255 : i32
    %206 = tpu.dynamic_rotate %205 by %c255_i32_66 dim 1 : vector<4x256xf32>, i32 -> vector<4x256xf32>
    %c1_i32_67 = arith.constant 1 : i32
    %207 = vector.broadcast %c1_i32_67 : i32 to vector<1x256xi32>
    %208 = arith.addi %16, %207 : vector<1x256xi32>
    %c0_i32_68 = arith.constant 0 : i32
    %209 = vector.broadcast %c0_i32_68 : i32 to vector<1x256xi32>
    %210 = arith.cmpi sge, %208, %209 : vector<1x256xi32>
    %c1_i32_69 = arith.constant 1 : i32
    %211 = vector.broadcast %c1_i32_69 : i32 to vector<1x256xi32>
    %212 = arith.addi %16, %211 : vector<1x256xi32>
    %c16_i32_70 = arith.constant 16 : i32
    %213 = vector.broadcast %c16_i32_70 : i32 to vector<1x256xi32>
    %214 = arith.cmpi slt, %212, %213 : vector<1x256xi32>
    %215 = arith.andi %210, %214 : vector<1x256xi1>
    %cst_71 = arith.constant 0.000000e+00 : f32
    %216 = vector.shape_cast %215 : vector<1x256xi1> to vector<1x256xi1>
    %217 = vector.broadcast %216 : vector<1x256xi1> to vector<4x256xi1>
    %218 = vector.broadcast %cst_71 : f32 to vector<4x256xf32>
    %219 = arith.select %217, %206, %218 : vector<4x256xi1>, vector<4x256xf32>
    %220 = arith.addf %204, %219 : vector<4x256xf32>
    %221 = vector.extract_strided_slice %134 {offsets = [24, 0], sizes = [4, 256], strides = [1, 1]} : vector<36x256xf32> to vector<4x256xf32>
    %c241_i32 = arith.constant 241 : i32
    %222 = tpu.dynamic_rotate %221 by %c241_i32 dim 1 : vector<4x256xf32>, i32 -> vector<4x256xf32>
    %c241_i32_72 = arith.constant 241 : i32
    %223 = vector.broadcast %c241_i32_72 : i32 to vector<1x256xi32>
    %224 = arith.cmpi slt, %0, %223 : vector<1x256xi32>
    %cst_73 = arith.constant 0.000000e+00 : f32
    %225 = vector.shape_cast %224 : vector<1x256xi1> to vector<1x256xi1>
    %226 = vector.broadcast %225 : vector<1x256xi1> to vector<4x256xi1>
    %227 = vector.broadcast %cst_73 : f32 to vector<4x256xf32>
    %228 = arith.select %226, %222, %227 : vector<4x256xi1>, vector<4x256xf32>
    %c-1_i32_74 = arith.constant -1 : i32
    %229 = vector.broadcast %c-1_i32_74 : i32 to vector<1x256xi32>
    %230 = arith.addi %16, %229 : vector<1x256xi32>
    %c0_i32_75 = arith.constant 0 : i32
    %231 = vector.broadcast %c0_i32_75 : i32 to vector<1x256xi32>
    %232 = arith.cmpi sge, %230, %231 : vector<1x256xi32>
    %c-1_i32_76 = arith.constant -1 : i32
    %233 = vector.broadcast %c-1_i32_76 : i32 to vector<1x256xi32>
    %234 = arith.addi %16, %233 : vector<1x256xi32>
    %c16_i32_77 = arith.constant 16 : i32
    %235 = vector.broadcast %c16_i32_77 : i32 to vector<1x256xi32>
    %236 = arith.cmpi slt, %234, %235 : vector<1x256xi32>
    %237 = arith.andi %232, %236 : vector<1x256xi1>
    %cst_78 = arith.constant 0.000000e+00 : f32
    %238 = vector.shape_cast %237 : vector<1x256xi1> to vector<1x256xi1>
    %239 = vector.broadcast %238 : vector<1x256xi1> to vector<4x256xi1>
    %240 = vector.broadcast %cst_78 : f32 to vector<4x256xf32>
    %241 = arith.select %239, %228, %240 : vector<4x256xi1>, vector<4x256xf32>
    %242 = arith.addf %220, %241 : vector<4x256xf32>
    %243 = vector.extract_strided_slice %134 {offsets = [28, 0], sizes = [4, 256], strides = [1, 1]} : vector<36x256xf32> to vector<4x256xf32>
    %c240_i32_79 = arith.constant 240 : i32
    %244 = tpu.dynamic_rotate %243 by %c240_i32_79 dim 1 : vector<4x256xf32>, i32 -> vector<4x256xf32>
    %c240_i32_80 = arith.constant 240 : i32
    %245 = vector.broadcast %c240_i32_80 : i32 to vector<1x256xi32>
    %246 = arith.cmpi slt, %0, %245 : vector<1x256xi32>
    %cst_81 = arith.constant 0.000000e+00 : f32
    %247 = vector.shape_cast %246 : vector<1x256xi1> to vector<1x256xi1>
    %248 = vector.broadcast %247 : vector<1x256xi1> to vector<4x256xi1>
    %249 = vector.broadcast %cst_81 : f32 to vector<4x256xf32>
    %250 = arith.select %248, %244, %249 : vector<4x256xi1>, vector<4x256xf32>
    %251 = arith.addf %242, %250 : vector<4x256xf32>
    %252 = vector.extract_strided_slice %134 {offsets = [32, 0], sizes = [4, 256], strides = [1, 1]} : vector<36x256xf32> to vector<4x256xf32>
    %c239_i32 = arith.constant 239 : i32
    %253 = tpu.dynamic_rotate %252 by %c239_i32 dim 1 : vector<4x256xf32>, i32 -> vector<4x256xf32>
    %c239_i32_82 = arith.constant 239 : i32
    %254 = vector.broadcast %c239_i32_82 : i32 to vector<1x256xi32>
    %255 = arith.cmpi slt, %0, %254 : vector<1x256xi32>
    %cst_83 = arith.constant 0.000000e+00 : f32
    %256 = vector.shape_cast %255 : vector<1x256xi1> to vector<1x256xi1>
    %257 = vector.broadcast %256 : vector<1x256xi1> to vector<4x256xi1>
    %258 = vector.broadcast %cst_83 : f32 to vector<4x256xf32>
    %259 = arith.select %257, %253, %258 : vector<4x256xi1>, vector<4x256xf32>
    %c1_i32_84 = arith.constant 1 : i32
    %260 = vector.broadcast %c1_i32_84 : i32 to vector<1x256xi32>
    %261 = arith.addi %16, %260 : vector<1x256xi32>
    %c0_i32_85 = arith.constant 0 : i32
    %262 = vector.broadcast %c0_i32_85 : i32 to vector<1x256xi32>
    %263 = arith.cmpi sge, %261, %262 : vector<1x256xi32>
    %c1_i32_86 = arith.constant 1 : i32
    %264 = vector.broadcast %c1_i32_86 : i32 to vector<1x256xi32>
    %265 = arith.addi %16, %264 : vector<1x256xi32>
    %c16_i32_87 = arith.constant 16 : i32
    %266 = vector.broadcast %c16_i32_87 : i32 to vector<1x256xi32>
    %267 = arith.cmpi slt, %265, %266 : vector<1x256xi32>
    %268 = arith.andi %263, %267 : vector<1x256xi1>
    %cst_88 = arith.constant 0.000000e+00 : f32
    %269 = vector.shape_cast %268 : vector<1x256xi1> to vector<1x256xi1>
    %270 = vector.broadcast %269 : vector<1x256xi1> to vector<4x256xi1>
    %271 = vector.broadcast %cst_88 : f32 to vector<4x256xf32>
    %272 = arith.select %270, %259, %271 : vector<4x256xi1>, vector<4x256xf32>
    %273 = arith.addf %251, %272 : vector<4x256xf32>
    %c0_89 = arith.constant 0 : index
    %c0_90 = arith.constant 0 : index
    %274 = vector.load %arg8[%c0_89, %c0_90] : memref<4x1xf32, #tpu.memory_space<vmem>>, vector<4x1xf32>
    %275 = vector.broadcast %274 : vector<4x1xf32> to vector<4x256xf32>
    %276 = arith.mulf %273, %275 : vector<4x256xf32>
    %c0_91 = arith.constant 0 : index
    %c0_92 = arith.constant 0 : index
    %277 = vector.load %arg9[%c0_91, %c0_92] : memref<4x1xf32, #tpu.memory_space<vmem>>, vector<4x1xf32>
    %278 = vector.broadcast %277 : vector<4x1xf32> to vector<4x256xf32>
    %279 = arith.addf %276, %278 : vector<4x256xf32>
    %280 = arith.addf %279, %36 : vector<4x256xf32>
    %cst_93 = arith.constant 0.000000e+00 : f32
    %281 = vector.broadcast %cst_93 : f32 to vector<4x256xf32>
    %282 = arith.maximumf %280, %281 : vector<4x256xf32>
    %283 = arith.truncf %282 : vector<4x256xf32> to vector<4x256xbf16>
    %c0_94 = arith.constant 0 : index
    %c0_95 = arith.constant 0 : index
    %284 = vector.load %arg10[%c0_94, %c0_95] : memref<36x4xbf16, #tpu.memory_space<vmem>>, vector<36x4xbf16>
    %cst_96 = arith.constant dense<0.000000e+00> : vector<36x256xf32>
    %285 = tpu.matmul %284, %283, %cst_96 {dimension_numbers = #tpu.dot_dimension_numbers<[1], [0], [0], [1], [0, 0, 1, 1], [], []>} : vector<36x4xbf16>, vector<4x256xbf16>, vector<36x256xf32> -> vector<36x256xf32>
    %286 = vector.extract_strided_slice %285 {offsets = [0, 0], sizes = [4, 256], strides = [1, 1]} : vector<36x256xf32> to vector<4x256xf32>
    %c17_i32_97 = arith.constant 17 : i32
    %287 = tpu.dynamic_rotate %286 by %c17_i32_97 dim 1 : vector<4x256xf32>, i32 -> vector<4x256xf32>
    %c17_i32_98 = arith.constant 17 : i32
    %288 = vector.broadcast %c17_i32_98 : i32 to vector<1x256xi32>
    %289 = arith.cmpi sge, %0, %288 : vector<1x256xi32>
    %cst_99 = arith.constant 0.000000e+00 : f32
    %290 = vector.shape_cast %289 : vector<1x256xi1> to vector<1x256xi1>
    %291 = vector.broadcast %290 : vector<1x256xi1> to vector<4x256xi1>
    %292 = vector.broadcast %cst_99 : f32 to vector<4x256xf32>
    %293 = arith.select %291, %287, %292 : vector<4x256xi1>, vector<4x256xf32>
    %c-1_i32_100 = arith.constant -1 : i32
    %294 = vector.broadcast %c-1_i32_100 : i32 to vector<1x256xi32>
    %295 = arith.addi %16, %294 : vector<1x256xi32>
    %c0_i32_101 = arith.constant 0 : i32
    %296 = vector.broadcast %c0_i32_101 : i32 to vector<1x256xi32>
    %297 = arith.cmpi sge, %295, %296 : vector<1x256xi32>
    %c-1_i32_102 = arith.constant -1 : i32
    %298 = vector.broadcast %c-1_i32_102 : i32 to vector<1x256xi32>
    %299 = arith.addi %16, %298 : vector<1x256xi32>
    %c16_i32_103 = arith.constant 16 : i32
    %300 = vector.broadcast %c16_i32_103 : i32 to vector<1x256xi32>
    %301 = arith.cmpi slt, %299, %300 : vector<1x256xi32>
    %302 = arith.andi %297, %301 : vector<1x256xi1>
    %cst_104 = arith.constant 0.000000e+00 : f32
    %303 = vector.shape_cast %302 : vector<1x256xi1> to vector<1x256xi1>
    %304 = vector.broadcast %303 : vector<1x256xi1> to vector<4x256xi1>
    %305 = vector.broadcast %cst_104 : f32 to vector<4x256xf32>
    %306 = arith.select %304, %293, %305 : vector<4x256xi1>, vector<4x256xf32>
    %307 = vector.extract_strided_slice %285 {offsets = [4, 0], sizes = [4, 256], strides = [1, 1]} : vector<36x256xf32> to vector<4x256xf32>
    %c16_i32_105 = arith.constant 16 : i32
    %308 = tpu.dynamic_rotate %307 by %c16_i32_105 dim 1 : vector<4x256xf32>, i32 -> vector<4x256xf32>
    %c16_i32_106 = arith.constant 16 : i32
    %309 = vector.broadcast %c16_i32_106 : i32 to vector<1x256xi32>
    %310 = arith.cmpi sge, %0, %309 : vector<1x256xi32>
    %cst_107 = arith.constant 0.000000e+00 : f32
    %311 = vector.shape_cast %310 : vector<1x256xi1> to vector<1x256xi1>
    %312 = vector.broadcast %311 : vector<1x256xi1> to vector<4x256xi1>
    %313 = vector.broadcast %cst_107 : f32 to vector<4x256xf32>
    %314 = arith.select %312, %308, %313 : vector<4x256xi1>, vector<4x256xf32>
    %315 = arith.addf %306, %314 : vector<4x256xf32>
    %316 = vector.extract_strided_slice %285 {offsets = [8, 0], sizes = [4, 256], strides = [1, 1]} : vector<36x256xf32> to vector<4x256xf32>
    %c15_i32_108 = arith.constant 15 : i32
    %317 = tpu.dynamic_rotate %316 by %c15_i32_108 dim 1 : vector<4x256xf32>, i32 -> vector<4x256xf32>
    %c15_i32_109 = arith.constant 15 : i32
    %318 = vector.broadcast %c15_i32_109 : i32 to vector<1x256xi32>
    %319 = arith.cmpi sge, %0, %318 : vector<1x256xi32>
    %cst_110 = arith.constant 0.000000e+00 : f32
    %320 = vector.shape_cast %319 : vector<1x256xi1> to vector<1x256xi1>
    %321 = vector.broadcast %320 : vector<1x256xi1> to vector<4x256xi1>
    %322 = vector.broadcast %cst_110 : f32 to vector<4x256xf32>
    %323 = arith.select %321, %317, %322 : vector<4x256xi1>, vector<4x256xf32>
    %c1_i32_111 = arith.constant 1 : i32
    %324 = vector.broadcast %c1_i32_111 : i32 to vector<1x256xi32>
    %325 = arith.addi %16, %324 : vector<1x256xi32>
    %c0_i32_112 = arith.constant 0 : i32
    %326 = vector.broadcast %c0_i32_112 : i32 to vector<1x256xi32>
    %327 = arith.cmpi sge, %325, %326 : vector<1x256xi32>
    %c1_i32_113 = arith.constant 1 : i32
    %328 = vector.broadcast %c1_i32_113 : i32 to vector<1x256xi32>
    %329 = arith.addi %16, %328 : vector<1x256xi32>
    %c16_i32_114 = arith.constant 16 : i32
    %330 = vector.broadcast %c16_i32_114 : i32 to vector<1x256xi32>
    %331 = arith.cmpi slt, %329, %330 : vector<1x256xi32>
    %332 = arith.andi %327, %331 : vector<1x256xi1>
    %cst_115 = arith.constant 0.000000e+00 : f32
    %333 = vector.shape_cast %332 : vector<1x256xi1> to vector<1x256xi1>
    %334 = vector.broadcast %333 : vector<1x256xi1> to vector<4x256xi1>
    %335 = vector.broadcast %cst_115 : f32 to vector<4x256xf32>
    %336 = arith.select %334, %323, %335 : vector<4x256xi1>, vector<4x256xf32>
    %337 = arith.addf %315, %336 : vector<4x256xf32>
    %338 = vector.extract_strided_slice %285 {offsets = [12, 0], sizes = [4, 256], strides = [1, 1]} : vector<36x256xf32> to vector<4x256xf32>
    %c1_i32_116 = arith.constant 1 : i32
    %339 = tpu.dynamic_rotate %338 by %c1_i32_116 dim 1 : vector<4x256xf32>, i32 -> vector<4x256xf32>
    %c-1_i32_117 = arith.constant -1 : i32
    %340 = vector.broadcast %c-1_i32_117 : i32 to vector<1x256xi32>
    %341 = arith.addi %16, %340 : vector<1x256xi32>
    %c0_i32_118 = arith.constant 0 : i32
    %342 = vector.broadcast %c0_i32_118 : i32 to vector<1x256xi32>
    %343 = arith.cmpi sge, %341, %342 : vector<1x256xi32>
    %c-1_i32_119 = arith.constant -1 : i32
    %344 = vector.broadcast %c-1_i32_119 : i32 to vector<1x256xi32>
    %345 = arith.addi %16, %344 : vector<1x256xi32>
    %c16_i32_120 = arith.constant 16 : i32
    %346 = vector.broadcast %c16_i32_120 : i32 to vector<1x256xi32>
    %347 = arith.cmpi slt, %345, %346 : vector<1x256xi32>
    %348 = arith.andi %343, %347 : vector<1x256xi1>
    %cst_121 = arith.constant 0.000000e+00 : f32
    %349 = vector.shape_cast %348 : vector<1x256xi1> to vector<1x256xi1>
    %350 = vector.broadcast %349 : vector<1x256xi1> to vector<4x256xi1>
    %351 = vector.broadcast %cst_121 : f32 to vector<4x256xf32>
    %352 = arith.select %350, %339, %351 : vector<4x256xi1>, vector<4x256xf32>
    %353 = arith.addf %337, %352 : vector<4x256xf32>
    %354 = vector.extract_strided_slice %285 {offsets = [16, 0], sizes = [4, 256], strides = [1, 1]} : vector<36x256xf32> to vector<4x256xf32>
    %355 = arith.addf %353, %354 : vector<4x256xf32>
    %356 = vector.extract_strided_slice %285 {offsets = [20, 0], sizes = [4, 256], strides = [1, 1]} : vector<36x256xf32> to vector<4x256xf32>
    %c255_i32_122 = arith.constant 255 : i32
    %357 = tpu.dynamic_rotate %356 by %c255_i32_122 dim 1 : vector<4x256xf32>, i32 -> vector<4x256xf32>
    %c1_i32_123 = arith.constant 1 : i32
    %358 = vector.broadcast %c1_i32_123 : i32 to vector<1x256xi32>
    %359 = arith.addi %16, %358 : vector<1x256xi32>
    %c0_i32_124 = arith.constant 0 : i32
    %360 = vector.broadcast %c0_i32_124 : i32 to vector<1x256xi32>
    %361 = arith.cmpi sge, %359, %360 : vector<1x256xi32>
    %c1_i32_125 = arith.constant 1 : i32
    %362 = vector.broadcast %c1_i32_125 : i32 to vector<1x256xi32>
    %363 = arith.addi %16, %362 : vector<1x256xi32>
    %c16_i32_126 = arith.constant 16 : i32
    %364 = vector.broadcast %c16_i32_126 : i32 to vector<1x256xi32>
    %365 = arith.cmpi slt, %363, %364 : vector<1x256xi32>
    %366 = arith.andi %361, %365 : vector<1x256xi1>
    %cst_127 = arith.constant 0.000000e+00 : f32
    %367 = vector.shape_cast %366 : vector<1x256xi1> to vector<1x256xi1>
    %368 = vector.broadcast %367 : vector<1x256xi1> to vector<4x256xi1>
    %369 = vector.broadcast %cst_127 : f32 to vector<4x256xf32>
    %370 = arith.select %368, %357, %369 : vector<4x256xi1>, vector<4x256xf32>
    %371 = arith.addf %355, %370 : vector<4x256xf32>
    %372 = vector.extract_strided_slice %285 {offsets = [24, 0], sizes = [4, 256], strides = [1, 1]} : vector<36x256xf32> to vector<4x256xf32>
    %c241_i32_128 = arith.constant 241 : i32
    %373 = tpu.dynamic_rotate %372 by %c241_i32_128 dim 1 : vector<4x256xf32>, i32 -> vector<4x256xf32>
    %c241_i32_129 = arith.constant 241 : i32
    %374 = vector.broadcast %c241_i32_129 : i32 to vector<1x256xi32>
    %375 = arith.cmpi slt, %0, %374 : vector<1x256xi32>
    %cst_130 = arith.constant 0.000000e+00 : f32
    %376 = vector.shape_cast %375 : vector<1x256xi1> to vector<1x256xi1>
    %377 = vector.broadcast %376 : vector<1x256xi1> to vector<4x256xi1>
    %378 = vector.broadcast %cst_130 : f32 to vector<4x256xf32>
    %379 = arith.select %377, %373, %378 : vector<4x256xi1>, vector<4x256xf32>
    %c-1_i32_131 = arith.constant -1 : i32
    %380 = vector.broadcast %c-1_i32_131 : i32 to vector<1x256xi32>
    %381 = arith.addi %16, %380 : vector<1x256xi32>
    %c0_i32_132 = arith.constant 0 : i32
    %382 = vector.broadcast %c0_i32_132 : i32 to vector<1x256xi32>
    %383 = arith.cmpi sge, %381, %382 : vector<1x256xi32>
    %c-1_i32_133 = arith.constant -1 : i32
    %384 = vector.broadcast %c-1_i32_133 : i32 to vector<1x256xi32>
    %385 = arith.addi %16, %384 : vector<1x256xi32>
    %c16_i32_134 = arith.constant 16 : i32
    %386 = vector.broadcast %c16_i32_134 : i32 to vector<1x256xi32>
    %387 = arith.cmpi slt, %385, %386 : vector<1x256xi32>
    %388 = arith.andi %383, %387 : vector<1x256xi1>
    %cst_135 = arith.constant 0.000000e+00 : f32
    %389 = vector.shape_cast %388 : vector<1x256xi1> to vector<1x256xi1>
    %390 = vector.broadcast %389 : vector<1x256xi1> to vector<4x256xi1>
    %391 = vector.broadcast %cst_135 : f32 to vector<4x256xf32>
    %392 = arith.select %390, %379, %391 : vector<4x256xi1>, vector<4x256xf32>
    %393 = arith.addf %371, %392 : vector<4x256xf32>
    %394 = vector.extract_strided_slice %285 {offsets = [28, 0], sizes = [4, 256], strides = [1, 1]} : vector<36x256xf32> to vector<4x256xf32>
    %c240_i32_136 = arith.constant 240 : i32
    %395 = tpu.dynamic_rotate %394 by %c240_i32_136 dim 1 : vector<4x256xf32>, i32 -> vector<4x256xf32>
    %c240_i32_137 = arith.constant 240 : i32
    %396 = vector.broadcast %c240_i32_137 : i32 to vector<1x256xi32>
    %397 = arith.cmpi slt, %0, %396 : vector<1x256xi32>
    %cst_138 = arith.constant 0.000000e+00 : f32
    %398 = vector.shape_cast %397 : vector<1x256xi1> to vector<1x256xi1>
    %399 = vector.broadcast %398 : vector<1x256xi1> to vector<4x256xi1>
    %400 = vector.broadcast %cst_138 : f32 to vector<4x256xf32>
    %401 = arith.select %399, %395, %400 : vector<4x256xi1>, vector<4x256xf32>
    %402 = arith.addf %393, %401 : vector<4x256xf32>
    %403 = vector.extract_strided_slice %285 {offsets = [32, 0], sizes = [4, 256], strides = [1, 1]} : vector<36x256xf32> to vector<4x256xf32>
    %c239_i32_139 = arith.constant 239 : i32
    %404 = tpu.dynamic_rotate %403 by %c239_i32_139 dim 1 : vector<4x256xf32>, i32 -> vector<4x256xf32>
    %c239_i32_140 = arith.constant 239 : i32
    %405 = vector.broadcast %c239_i32_140 : i32 to vector<1x256xi32>
    %406 = arith.cmpi slt, %0, %405 : vector<1x256xi32>
    %cst_141 = arith.constant 0.000000e+00 : f32
    %407 = vector.shape_cast %406 : vector<1x256xi1> to vector<1x256xi1>
    %408 = vector.broadcast %407 : vector<1x256xi1> to vector<4x256xi1>
    %409 = vector.broadcast %cst_141 : f32 to vector<4x256xf32>
    %410 = arith.select %408, %404, %409 : vector<4x256xi1>, vector<4x256xf32>
    %c1_i32_142 = arith.constant 1 : i32
    %411 = vector.broadcast %c1_i32_142 : i32 to vector<1x256xi32>
    %412 = arith.addi %16, %411 : vector<1x256xi32>
    %c0_i32_143 = arith.constant 0 : i32
    %413 = vector.broadcast %c0_i32_143 : i32 to vector<1x256xi32>
    %414 = arith.cmpi sge, %412, %413 : vector<1x256xi32>
    %c1_i32_144 = arith.constant 1 : i32
    %415 = vector.broadcast %c1_i32_144 : i32 to vector<1x256xi32>
    %416 = arith.addi %16, %415 : vector<1x256xi32>
    %c16_i32_145 = arith.constant 16 : i32
    %417 = vector.broadcast %c16_i32_145 : i32 to vector<1x256xi32>
    %418 = arith.cmpi slt, %416, %417 : vector<1x256xi32>
    %419 = arith.andi %414, %418 : vector<1x256xi1>
    %cst_146 = arith.constant 0.000000e+00 : f32
    %420 = vector.shape_cast %419 : vector<1x256xi1> to vector<1x256xi1>
    %421 = vector.broadcast %420 : vector<1x256xi1> to vector<4x256xi1>
    %422 = vector.broadcast %cst_146 : f32 to vector<4x256xf32>
    %423 = arith.select %421, %410, %422 : vector<4x256xi1>, vector<4x256xf32>
    %424 = arith.addf %402, %423 : vector<4x256xf32>
    %c0_147 = arith.constant 0 : index
    %c0_148 = arith.constant 0 : index
    %425 = vector.load %arg11[%c0_147, %c0_148] : memref<4x1xf32, #tpu.memory_space<vmem>>, vector<4x1xf32>
    %426 = vector.broadcast %425 : vector<4x1xf32> to vector<4x256xf32>
    %427 = arith.mulf %424, %426 : vector<4x256xf32>
    %c0_149 = arith.constant 0 : index
    %c0_150 = arith.constant 0 : index
    %428 = vector.load %arg12[%c0_149, %c0_150] : memref<4x1xf32, #tpu.memory_space<vmem>>, vector<4x1xf32>
    %429 = vector.broadcast %428 : vector<4x1xf32> to vector<4x256xf32>
    %430 = arith.addf %427, %429 : vector<4x256xf32>
    %cst_151 = arith.constant 0.000000e+00 : f32
    %431 = vector.broadcast %cst_151 : f32 to vector<4x256xf32>
    %432 = arith.maximumf %430, %431 : vector<4x256xf32>
    %c0_152 = arith.constant 0 : index
    %c0_153 = arith.constant 0 : index
    %c0_154 = arith.constant 0 : index
    %433 = vector.load %arg13[%c0_152, %c0_153, %c0_154] : memref<1x4x256xf32, #tpu.memory_space<vmem>>, vector<1x4x256xf32>
    %434 = vector.shape_cast %433 : vector<1x4x256xf32> to vector<4x256xf32>
    %435 = vector.shape_cast %432 : vector<4x256xf32> to vector<1x4x256xf32>
    tpu.vector_store %arg13[%c0_152, %c0_153, %c0_154], %435 {strides = array<i32>} : memref<1x4x256xf32, #tpu.memory_space<vmem>>, vector<1x4x256xf32>,
    return
  }
  func.func @transform_0(%arg0: i32) -> (i32, i32, i32) {
    %c0_i32 = arith.constant 0 : i32
    %c0_i32_0 = arith.constant 0 : i32
    %c0_i32_1 = arith.constant 0 : i32
    return %arg0, %c0_i32, %c0_i32_0 : i32, i32, i32
  }
  func.func @transform_1(%arg0: i32) -> (i32, i32) {
    %c0_i32 = arith.constant 0 : i32
    %c0_i32_0 = arith.constant 0 : i32
    %c0_i32_1 = arith.constant 0 : i32
    return %c0_i32, %c0_i32_0 : i32, i32
  }
  func.func @transform_2(%arg0: i32) -> (i32, i32) {
    %c0_i32 = arith.constant 0 : i32
    %c0_i32_0 = arith.constant 0 : i32
    %c0_i32_1 = arith.constant 0 : i32
    return %c0_i32, %c0_i32_0 : i32, i32
  }
  func.func @transform_3(%arg0: i32) -> (i32, i32) {
    %c0_i32 = arith.constant 0 : i32
    %c0_i32_0 = arith.constant 0 : i32
    %c0_i32_1 = arith.constant 0 : i32
    return %c0_i32, %c0_i32_0 : i32, i32
  }
  func.func @transform_4(%arg0: i32) -> (i32, i32) {
    %c0_i32 = arith.constant 0 : i32
    %c0_i32_0 = arith.constant 0 : i32
    %c0_i32_1 = arith.constant 0 : i32
    return %c0_i32, %c0_i32_0 : i32, i32
  }
  func.func @transform_5(%arg0: i32) -> (i32, i32) {
    %c0_i32 = arith.constant 0 : i32
    %c0_i32_0 = arith.constant 0 : i32
    %c0_i32_1 = arith.constant 0 : i32
    return %c0_i32, %c0_i32_0 : i32, i32
  }
  func.func @transform_6(%arg0: i32) -> (i32, i32) {
    %c0_i32 = arith.constant 0 : i32
    %c0_i32_0 = arith.constant 0 : i32
    %c0_i32_1 = arith.constant 0 : i32
    return %c0_i32, %c0_i32_0 : i32, i32
  }
  func.func @transform_7(%arg0: i32) -> (i32, i32) {
    %c0_i32 = arith.constant 0 : i32
    %c0_i32_0 = arith.constant 0 : i32
    %c0_i32_1 = arith.constant 0 : i32
    return %c0_i32, %c0_i32_0 : i32, i32
  }
  func.func @transform_8(%arg0: i32) -> (i32, i32) {
    %c0_i32 = arith.constant 0 : i32
    %c0_i32_0 = arith.constant 0 : i32
    %c0_i32_1 = arith.constant 0 : i32
    return %c0_i32, %c0_i32_0 : i32, i32
  }
  func.func @transform_9(%arg0: i32) -> (i32, i32) {
    %c0_i32 = arith.constant 0 : i32
    %c0_i32_0 = arith.constant 0 : i32
    %c0_i32_1 = arith.constant 0 : i32
    return %c0_i32, %c0_i32_0 : i32, i32
  }
  func.func @transform_10(%arg0: i32) -> (i32, i32) {
    %c0_i32 = arith.constant 0 : i32
    %c0_i32_0 = arith.constant 0 : i32
    %c0_i32_1 = arith.constant 0 : i32
    return %c0_i32, %c0_i32_0 : i32, i32
  }
  func.func @transform_11(%arg0: i32) -> (i32, i32) {
    %c0_i32 = arith.constant 0 : i32
    %c0_i32_0 = arith.constant 0 : i32
    %c0_i32_1 = arith.constant 0 : i32
    return %c0_i32, %c0_i32_0 : i32, i32
  }
  func.func @transform_12(%arg0: i32) -> (i32, i32, i32) {
    %c0_i32 = arith.constant 0 : i32
    %c0_i32_0 = arith.constant 0 : i32
    %c0_i32_1 = arith.constant 0 : i32
    return %arg0, %c0_i32, %c0_i32_0 : i32, i32, i32
  }
}

</mosaic_0001>

<bundles_post_ra>
// kernel: pool_forward.1
= control target key start
LH: loop header
LB: loop body
LE: loop exit
PB: predicated region body
PF: predicated region fallthrough
CT: control target
= control target key end

     0   :  { %s3511_s21 = smov 0   ;;  %s6815_s0 = inlined_call_operand.vmem [shape: bf16[2,36,256], index: 0, kind: input, shape index: {}]   ;;  %s6816_s1 = inlined_call_operand.vmem [shape: bf16[260,36], index: 1, kind: input, shape index: {}]   ;;  %s6817_s2 = inlined_call_operand.vmem [shape: f32[256,1], index: 2, kind: input, shape index: {}]   ;;  %s6818_s3 = inlined_call_operand.vmem [shape: f32[256,1], index: 3, kind: input, shape index: {}]   ;;  %s6819_s4 = inlined_call_operand.vmem [shape: f32[4,1], index: 4, kind: input, shape index: {}]   ;;  %s6820_s5 = inlined_call_operand.vmem [shape: f32[4,1], index: 5, kind: input, shape index: {}]   ;;  %s6821_s6 = inlined_call_operand.vmem [shape: bf16[36,128], index: 6, kind: input, shape index: {}]   ;;  %s6822_s7 = inlined_call_operand.vmem [shape: f32[4,1], index: 7, kind: input, shape index: {}]   ;;  %s6823_s8 = inlined_call_operand.vmem [shape: f32[4,1], index: 8, kind: input, shape index: {}]   ;;  %s6824_s9 = inlined_call_operand.vmem [shape: bf16[36,4], index: 9, kind: input, shape index: {}]   ;;  %s6825_s10 = inlined_call_operand.vmem [shape: f32[4,1], index: 10, kind: input, shape index: {}]   ;;  %s6826_s11 = inlined_call_operand.vmem [shape: f32[4,1], index: 11, kind: input, shape index: {}]   ;;  %s6827_s12 = inlined_call_operand.vmem [shape: f32[2,4,256], index: 12, kind: output, shape index: {}]  }
   0x1 LB: > { %s3300_s22 = sadd.s32 4294967295, %s3430_s21   ;;  %p3304_p0 = scmp.ge.s32.totalorder %s3430_s21, 1  ;;  %s3430_s21 = sphi %s3511_s21, %s22_s21  }
   0x2   : > { %p362_p1 = scmp.lt.s32.totalorder %s3430_s21, 3 }
   0x4   : > { %p363_p2 = pnand %p3304_p0, %p362_p1 }
   0x6   : > { %366 = sbr.rel (%p363_p2) target bundleno = 1630 (0x65e), region = 68 }
   0xb   : > { %v1134_v0 = vld [vmem:[%s6818_s3 + $0xf0] sm:$0xff]  ;;  %p404_p3 = scmp.lt.s32.totalorder %s3300_s22, 1  ;;  %v6828_v2 = vmov 0   ;;  %v1135_v3 = vld [vmem:[%s6818_s3 + $0xf8] sm:$0xff]  ;;  %v877_v5 = vld [vmem:[%s6817_s2 + $0xe8] sm:$0xff]  ;;  %vm640_vm0 = vcmask 1041408  }
   0xc   : > { %v878_v1 = vld [vmem:[%s6817_s2 + $0xf0] sm:$0xff]  ;;  %3392 = vset.pattern.permute.xlu1 %v6828_v2  ;;  %3391 = vset.pattern.permute.xlu0 %v6828_v2  ;;  %v879_v4 = vld [vmem:[%s6817_s2 + $0xf8] sm:$0xff]  ;;  %v876_v6 = vld [vmem:[%s6817_s2 + $0xe0] sm:$0xff]  ;;  %vm588_vm1 = vcmask 293888   ;;  %s3433_s27 = smov 127   ;;  %s3434_s28 = smov 112  }
   0xd   : > { %1288 = vperm.xlu1 %3392, %v1134_v0   ;;  %1032 = vperm.xlu0 %3391, %v878_v1   ;;  %s7400_s22 = smov (!%p404_p3, %s3300_s22), 1  ;;  %v1133_v12 = vld [vmem:[%s6818_s3 + $0xe8] sm:$0xff]  ;;  %v1132_v13 = vld [vmem:[%s6818_s3 + $0xe0] sm:$0xff]  ;;  %v875_v16 = vld [vmem:[%s6817_s2 + $0xd8] sm:$0xff]  ;;  %s3435_s29 = smov 96  }
   0xe   : > { %679 = vmatprep.mubr.bf16.mxu0 %v6828_v2  ;;  %799 = vmatprep.mubr.bf16.mxu1 %v6828_v2  ;;  %s3368_s13 = smul.u32 40, %s7400_s22  ;;  %v874_v17 = vld [vmem:[%s6817_s2 + $0xd0] sm:$0xff]  ;;  %v1131_v19 = vld [vmem:[%s6818_s3 + $0xd8] sm:$0xff]  ;;  %v3401_v21 = vld [vmem:[%s6816_s1] sm:$0xff]   ;;  %s3436_s30 = smov 126  }
   0xf   : > { %v1130_v20 = vld [vmem:[%s6818_s3 + $0xd0] sm:$0xff]  ;;  %v3402_v22 = vld [vmem:[%s6816_s1 + $0x60] sm:$0xff]   ;;  %v873_v23 = vld [vmem:[%s6817_s2 + $0xc8] sm:$0xff]  ;;  %s3438_s14 = smov 64   ;;  %s3439_s17 = smov 120  }
  0x10   : > { %s408_s20 = scalar_lea.vmem %s6815_s0, %s3368_s13  ;;  %v872_v24 = vld [vmem:[%s6817_s2 + $0xc0] sm:$0xff]  ;;  %v1129_v25 = vld [vmem:[%s6818_s3 + $0xc8] sm:$0xff]  ;;  %v871_v29 = vld [vmem:[%s6817_s2 + $0xb8] sm:$0xff]  ;;  %s3437_s13 = smov 124  }
  0x11   : > { %1293 = vperm.xlu1 %3392, %v1135_v3   ;;  %1037 = vperm.xlu0 %3391, %v879_v4   ;;  %v446_v7 = vld [vmem:[%s408_s20 + $0x20] sm:$0x33]  ;;  %v3395_v10 = vld [vmem:[%s408_s20 + $0x14] ss:$8 sps:$4 sm:$0xff]   ;;  %v3397_v14 = vld [vmem:[%s408_s20 + $0x10] ss:$8 sps:$4 sm:$0xff]  }
  0x12   : > { %v3330_v8 = vcombine.high %v446_v7, %v446_v7  ;;  %v3329_v9 = vcombine.low %v446_v7, %v446_v7  ;;  %v3398_v15 = vld [vmem:[%s408_s20 + $0x4] ss:$8 sps:$4 sm:$0xff]   ;;  %v3400_v18 = vld [vmem:[%s408_s20] ss:$8 sps:$4 sm:$0xff]   ;;  %v870_v30 = vld [vmem:[%s6817_s2 + $0xb0] sm:$0xff]  ;;  %s3441_s15 = smov 16  }
  0x13   : > { %v1128_v26 = vld [vmem:[%s6818_s3 + $0xc0] sm:$0xff]  ;;  %v3403_v27 = vld [vmem:[%s6816_s1 + $0x8] sm:$0xff]   ;;  %v1127_v31 = vld [vmem:[%s6818_s3 + $0xb8] sm:$0xff]  ;;  %s3442_s16 = smov 15   ;;  %s3444_s18 = smov 113  }
  0x14   : > { %v642_v11 = vsel %vm640_vm0, %v3329_v9, 0  ;;  %3331 = vmatprep.subr.msk.bf16.mxu0 %vm640_vm0, %v3330_v8  ;;  %3362 = vmatprep.subr.msk.bf16.mxu1 %vm640_vm0, %v3330_v8  ;;  %v3404_v28 = vld [vmem:[%s6816_s1 + $0x68] sm:$0xff]   ;;  %v1126_v32 = vld [vmem:[%s6818_s3 + $0xb0] sm:$0xff]  ;;  %v868_v36 = vld [vmem:[%s6817_s2 + $0xa0] sm:$0xff]  ;;  %s3445_s19 = smov 111  }
  0x15   : > { %1027 = vperm.xlu1 %3392, %v877_v5   ;;  %1022 = vperm.xlu0 %3391, %v876_v6   ;;  %v3405_v33 = vld [vmem:[%s6816_s1 + $0x10] sm:$0xff]   ;;  %v869_v35 = vld [vmem:[%s6817_s2 + $0xa8] sm:$0xff]  ;;  %v1124_v38 = vld [vmem:[%s6818_s3 + $0xa0] sm:$0xff] }
  0x16   : > { %658 = vmatpush1.bf16.msra.mxu0 %v642_v11  ;;  %3365 = vmatpush1.bf16.msra.mxu1 %v642_v11  ;;  %v3406_v34 = vld [vmem:[%s6816_s1 + $0x70] sm:$0xff]   ;;  %v1125_v37 = vld [vmem:[%s6818_s3 + $0xa8] sm:$0xff]  ;;  %v3407_v39 = vld [vmem:[%s6816_s1 + $0x18] sm:$0xff]  }
  0x17   : > { %659 = vmatprep.subr.bf16.mxu0 %v3395_v10  ;;  %3363 = vmatprep.subr.bf16.mxu1 %v3395_v10  ;;  %v3408_v40 = vld [vmem:[%s6816_s1 + $0x78] sm:$0xff]   ;;  %v866_v42 = vld [vmem:[%s6817_s2 + $0x90] sm:$0xff]  ;;  %v3409_v45 = vld [vmem:[%s6816_s1 + $0x20] sm:$0xff]  }
  0x18   : > { %v867_v41 = vld [vmem:[%s6817_s2 + $0x98] sm:$0xff]  ;;  %v1122_v44 = vld [vmem:[%s6818_s3 + $0x90] sm:$0xff]  ;;  %v865_v46 = vld [vmem:[%s6817_s2 + $0x88] sm:$0xff] }
  0x19   : > { %1283 = vperm.xlu1 %3392, %v1133_v12   ;;  %1278 = vperm.xlu0 %3391, %v1132_v13   ;;  %v1123_v43 = vld [vmem:[%s6818_s3 + $0x98] sm:$0xff]  ;;  %v864_v47 = vld [vmem:[%s6817_s2 + $0x80] sm:$0xff]  ;;  %v1121_v48 = vld [vmem:[%s6818_s3 + $0x88] sm:$0xff] }
  0x1a   : > { %660 = vmatpush1.bf16.msra.mxu0 %v3397_v14  ;;  %3366 = vmatpush1.bf16.msra.mxu1 %v3397_v14  ;;  %v1120_v49 = vld [vmem:[%s6818_s3 + $0x80] sm:$0xff]  ;;  %v3410_v50 = vld [vmem:[%s6816_s1 + $0x28] sm:$0xff]   ;;  %v863_v51 = vld [vmem:[%s6817_s2 + $0x78] sm:$0xff] }
  0x1b   : > { %661 = vmatprep.subr.bf16.mxu0 %v3398_v15  ;;  %3364 = vmatprep.subr.bf16.mxu1 %v3398_v15  ;;  %v862_v52 = vld [vmem:[%s6817_s2 + $0x70] sm:$0xff]  ;;  %v1119_v53 = vld [vmem:[%s6818_s3 + $0x78] sm:$0xff]  ;;  %v861_v56 = vld [vmem:[%s6817_s2 + $0x68] sm:$0xff] }
  0x1c   : > { %v1118_v54 = vld [vmem:[%s6818_s3 + $0x70] sm:$0xff]  ;;  %v860_v57 = vld [vmem:[%s6817_s2 + $0x60] sm:$0xff]  ;;  %v1117_v58 = vld [vmem:[%s6818_s3 + $0x68] sm:$0xff] }
  0x1d   : > { %1017 = vperm.xlu1 %3392, %v875_v16   ;;  %1012 = vperm.xlu0 %3391, %v874_v17   ;;  %v3411_v55 = vld [vmem:[%s6816_s1 + $0x30] sm:$0xff]   ;;  %v1116_v59 = vld [vmem:[%s6818_s3 + $0x60] sm:$0xff]  ;;  %v3412_v60 = vld [vmem:[%s6816_s1 + $0x38] sm:$0xff]  }
  0x1e   : > { %662 = vmatpush1.bf16.msra.mxu0 %v3400_v18  ;;  %3367 = vmatpush1.bf16.msra.mxu1 %v3400_v18  ;;  %v859_v61 = vld [vmem:[%s6817_s2 + $0x58] sm:$0xff]  ;;  %v858_v62 = vld [vmem:[%s6817_s2 + $0x50] sm:$0xff]  ;;  %v3413_v1 = vld [vmem:[%s6816_s1 + $0x40] sm:$0xff]  }
  0x1f   : > { %v1115_v63 = vld [vmem:[%s6818_s3 + $0x58] sm:$0xff]  ;;  %v1114_v0 = vld [vmem:[%s6818_s3 + $0x50] sm:$0xff]  ;;  %v857_v3 = vld [vmem:[%s6817_s2 + $0x48] sm:$0xff] }
  0x20   : > { %v856_v4 = vld [vmem:[%s6817_s2 + $0x40] sm:$0xff]  ;;  %v1113_v5 = vld [vmem:[%s6818_s3 + $0x48] sm:$0xff]  ;;  %v855_v8 = vld [vmem:[%s6817_s2 + $0x38] sm:$0xff] }
  0x21   : > { %1273 = vperm.xlu1 %3392, %v1131_v19   ;;  %1268 = vperm.xlu0 %3391, %v1130_v20   ;;  %v1112_v6 = vld [vmem:[%s6818_s3 + $0x40] sm:$0xff]  ;;  %v3414_v7 = vld [vmem:[%s6816_s1 + $0x48] sm:$0xff]   ;;  %v854_v9 = vld [vmem:[%s6817_s2 + $0x30] sm:$0xff] }
  0x22   : > { %3332 = vmatmul.mubr.msk.bf16.vlgmr.msra.gmra.mxu0 %vm588_vm1, %v3401_v21  ;;  %3344 = vmatmul.mubr.msk.bf16.vlgmr.msra.gmra.mxu1 %vm588_vm1, %v3402_v22  ;;  %v1111_v10 = vld [vmem:[%s6818_s3 + $0x38] sm:$0xff]  ;;  %v1110_v11 = vld [vmem:[%s6818_s3 + $0x30] sm:$0xff]  ;;  %v853_v13 = vld [vmem:[%s6817_s2 + $0x28] sm:$0xff] }
  0x23   : > { %689 = vmatprep.mubr.bf16.mxu0 %v6828_v2  ;;  %809 = vmatprep.mubr.bf16.mxu1 %v6828_v2  ;;  %v3415_v12 = vld [vmem:[%s6816_s1 + $0x50] sm:$0xff]   ;;  %v852_v14 = vld [vmem:[%s6817_s2 + $0x20] sm:$0xff]  ;;  %v1109_v15 = vld [vmem:[%s6818_s3 + $0x28] sm:$0xff] }
  0x24   : > { %v1108_v16 = vld [vmem:[%s6818_s3 + $0x20] sm:$0xff]  ;;  %v3416_v17 = vld [vmem:[%s6816_s1 + $0x58] sm:$0xff]   ;;  %v850_v19 = vld [vmem:[%s6817_s2 + $0x10] sm:$0xff] }
  0x25   : > { %1007 = vperm.xlu1 %3392, %v873_v23   ;;  %1002 = vperm.xlu0 %3391, %v872_v24   ;;  %v851_v18 = vld [vmem:[%s6817_s2 + $0x18] sm:$0xff]  ;;  %v1106_v21 = vld [vmem:[%s6818_s3 + $0x10] sm:$0xff]  ;;  %v849_v22 = vld [vmem:[%s6817_s2 + $0x8] sm:$0xff] }
  0x26   : > { %v1107_v20 = vld [vmem:[%s6818_s3 + $0x18] sm:$0xff]  ;;  %v848_v23 = vld [vmem:[%s6817_s2] sm:$0xff]  ;;  %v1105_v24 = vld [vmem:[%s6818_s3 + $0x8] sm:$0xff] }
  0x29   : > { %1263 = vperm.xlu1 %3392, %v1129_v25   ;;  %1258 = vperm.xlu0 %3391, %v1128_v26   ;;  %v1104_v25 = vld [vmem:[%s6818_s3] sm:$0xff] }
  0x2a   : > { %3333 = vmatmul.mubr.msk.bf16.gmra.mxu0 %vm588_vm1, %v3403_v27  ;;  %3345 = vmatmul.mubr.msk.bf16.gmra.mxu1 %vm588_vm1, %v3404_v28 }
  0x2b   : > { %699 = vmatprep.mubr.bf16.mxu0 %v6828_v2  ;;  %819 = vmatprep.mubr.bf16.mxu1 %v6828_v2 }
  0x2d   : > { %997 = vperm.xlu1 %3392, %v871_v29   ;;  %992 = vperm.xlu0 %3391, %v870_v30  }
  0x31   : > { %1253 = vperm.xlu1 %3392, %v1127_v31   ;;  %1248 = vperm.xlu0 %3391, %v1126_v32  }
  0x32   : > { %3334 = vmatmul.mubr.msk.bf16.gmra.mxu0 %vm588_vm1, %v3405_v33  ;;  %3346 = vmatmul.mubr.msk.bf16.gmra.mxu1 %vm588_vm1, %v3406_v34 }
  0x33   : > { %709 = vmatprep.mubr.bf16.mxu0 %v6828_v2  ;;  %829 = vmatprep.mubr.bf16.mxu1 %v6828_v2 }
  0x35   : > { %987 = vperm.xlu1 %3392, %v869_v35   ;;  %982 = vperm.xlu0 %3391, %v868_v36  }
  0x39   : > { %1243 = vperm.xlu1 %3392, %v1125_v37   ;;  %1238 = vperm.xlu0 %3391, %v1124_v38  }
  0x3a   : > { %3335 = vmatmul.mubr.msk.bf16.gmra.mxu0 %vm588_vm1, %v3407_v39  ;;  %3347 = vmatmul.mubr.msk.bf16.gmra.mxu1 %vm588_vm1, %v3408_v40 }
  0x3b   : > { %719 = vmatprep.mubr.bf16.mxu0 %v6828_v2  ;;  %839 = vmatprep.mubr.bf16.mxu1 %v6828_v2 }
  0x3d   : > { %977 = vperm.xlu1 %3392, %v867_v41   ;;  %972 = vperm.xlu0 %3391, %v866_v42  }
  0x41   : > { %1233 = vperm.xlu1 %3392, %v1123_v43   ;;  %1228 = vperm.xlu0 %3391, %v1122_v44  }
  0x42   : > { %3336 = vmatmul.mubr.msk.bf16.gmra.mxu0 %vm588_vm1, %v3409_v45 }
  0x43   : > { %729 = vmatprep.mubr.bf16.mxu0 %v6828_v2 }
  0x45   : > { %967 = vperm.xlu1 %3392, %v865_v46   ;;  %962 = vperm.xlu0 %3391, %v864_v47  }
  0x49   : > { %1223 = vperm.xlu1 %3392, %v1121_v48   ;;  %1218 = vperm.xlu0 %3391, %v1120_v49  }
  0x4a   : > { %3337 = vmatmul.mubr.msk.bf16.gmra.mxu0 %vm588_vm1, %v3410_v50 }
  0x4b   : > { %739 = vmatprep.mubr.bf16.mxu0 %v6828_v2 }
  0x4d   : > { %957 = vperm.xlu1 %3392, %v863_v51   ;;  %952 = vperm.xlu0 %3391, %v862_v52  }
  0x51   : > { %1213 = vperm.xlu1 %3392, %v1119_v53   ;;  %1208 = vperm.xlu0 %3391, %v1118_v54  }
  0x52   : > { %3338 = vmatmul.mubr.msk.bf16.gmra.mxu0 %vm588_vm1, %v3411_v55 }
  0x53   : > { %749 = vmatprep.mubr.bf16.mxu0 %v6828_v2 }
  0x55   : > { %947 = vperm.xlu1 %3392, %v861_v56   ;;  %942 = vperm.xlu0 %3391, %v860_v57  }
  0x59   : > { %1203 = vperm.xlu1 %3392, %v1117_v58   ;;  %1198 = vperm.xlu0 %3391, %v1116_v59  }
  0x5a   : > { %3339 = vmatmul.mubr.msk.bf16.gmra.mxu0 %vm588_vm1, %v3412_v60 }
  0x5b   : > { %759 = vmatprep.mubr.bf16.mxu0 %v6828_v2 }
  0x5d   : > { %937 = vperm.xlu1 %3392, %v859_v61   ;;  %932 = vperm.xlu0 %3391, %v858_v62  }
  0x61   : > { %1193 = vperm.xlu1 %3392, %v1115_v63   ;;  %1188 = vperm.xlu0 %3391, %v1114_v0  }
  0x62   : > { %3340 = vmatmul.mubr.msk.bf16.gmra.mxu0 %vm588_vm1, %v3413_v1 }
  0x63   : > { %769 = vmatprep.mubr.bf16.mxu0 %v6828_v2 }
  0x65   : > { %927 = vperm.xlu1 %3392, %v857_v3   ;;  %922 = vperm.xlu0 %3391, %v856_v4  }
  0x69   : > { %1183 = vperm.xlu1 %3392, %v1113_v5   ;;  %1178 = vperm.xlu0 %3391, %v1112_v6  }
  0x6a   : > { %3341 = vmatmul.mubr.msk.bf16.gmra.mxu0 %vm588_vm1, %v3414_v7 }
  0x6b   : > { %779 = vmatprep.mubr.bf16.mxu0 %v6828_v2 }
  0x6d   : > { %917 = vperm.xlu1 %3392, %v855_v8   ;;  %912 = vperm.xlu0 %3391, %v854_v9  }
  0x71   : > { %1173 = vperm.xlu1 %3392, %v1111_v10   ;;  %1168 = vperm.xlu0 %3391, %v1110_v11  }
  0x72   : > { %3342 = vmatmul.mubr.msk.bf16.gmra.mxu0 %vm588_vm1, %v3415_v12 }
  0x73   : > { %789 = vmatprep.mubr.bf16.mxu0 %v6828_v2 }
  0x75   : > { %907 = vperm.xlu1 %3392, %v853_v13   ;;  %902 = vperm.xlu0 %3391, %v852_v14  }
  0x79   : > { %1163 = vperm.xlu1 %3392, %v1109_v15   ;;  %1158 = vperm.xlu0 %3391, %v1108_v16  }
  0x7a   : > { %3343 = vmatmul.mubr.msk.bf16.gmra.mxu0 %vm588_vm1, %v3416_v17 }
  0x7d   : > { %897 = vperm.xlu1 %3392, %v851_v18   ;;  %892 = vperm.xlu0 %3391, %v850_v19  }
  0x81   : > { %1153 = vperm.xlu1 %3392, %v1107_v20   ;;  %1148 = vperm.xlu0 %3391, %v1106_v21  }
  0x85   : > { %887 = vperm.xlu1 %3392, %v849_v22   ;;  %882 = vperm.xlu0 %3391, %v848_v23  }
  0x88   : > { %v3803_v26 = vpop.permute.xlu1 %1288  ;;  %v3805_v27 = vpop.permute.xlu0 %1032 }
  0x89   : > { %1143 = vperm.xlu1 %3392, %v1105_v24   ;;  %1138 = vperm.xlu0 %3391, %v1104_v25  }
  0x8c   : > { %v3807_v28 = vpop.permute.xlu1 %1293  ;;  %v3809_v29 = vpop.permute.xlu0 %1037 }
  0x90   : > { %v3811_v30 = vpop.permute.xlu1 %1027  ;;  %v3813_v31 = vpop.permute.xlu0 %1022 }
  0x94   : > { %v3815_v32 = vpop.permute.xlu1 %1283  ;;  %v3817_v33 = vpop.permute.xlu0 %1278 }
  0x98   : > { %v3819_v34 = vpop.permute.xlu1 %1017  ;;  %v3821_v35 = vpop.permute.xlu0 %1012 }
  0x9c   : > { %v3823_v36 = vpop.permute.xlu1 %1273  ;;  %v3825_v37 = vpop.permute.xlu0 %1268 }
  0xa0   : > { %v3827_v38 = vpop.permute.xlu1 %1007  ;;  %v3829_v39 = vpop.permute.xlu0 %1002 }
  0xa4   : > { %v3831_v40 = vpop.permute.xlu1 %1263  ;;  %v3833_v41 = vpop.permute.xlu0 %1258 }
  0xa8   : > { %v3835_v42 = vpop.permute.xlu1 %997  ;;  %v3837_v43 = vpop.permute.xlu0 %992 }
  0xa9   : > { %7040 = vst [vmem:[#allocation2_spill] sm:$0xff] %v3835_v42  ;;  %7041 = vst [vmem:[#allocation3_spill] sm:$0xff] %v3837_v43 }
  0xac   : > { %v3839_v44 = vpop.permute.xlu1 %1253  ;;  %v3841_v45 = vpop.permute.xlu0 %1248 }
  0xad   : > { %7042 = vst [vmem:[#allocation4_spill] sm:$0xff] %v3839_v44  ;;  %7043 = vst [vmem:[#allocation5_spill] sm:$0xff] %v3841_v45 }
  0xb0   : > { %v3843_v46 = vpop.permute.xlu1 %987  ;;  %v3845_v47 = vpop.permute.xlu0 %982 }
  0xb1   : > { %7044 = vst [vmem:[#allocation6_spill] sm:$0xff] %v3843_v46  ;;  %7045 = vst [vmem:[#allocation7_spill] sm:$0xff] %v3845_v47 }
  0xb4   : > { %v3847_v48 = vpop.permute.xlu1 %1243  ;;  %v3849_v49 = vpop.permute.xlu0 %1238 }
  0xb5   : > { %7046 = vst [vmem:[#allocation8_spill] sm:$0xff] %v3847_v48  ;;  %7047 = vst [vmem:[#allocation9_spill] sm:$0xff] %v3849_v49 }
  0xb8   : > { %v3851_v50 = vpop.permute.xlu1 %977  ;;  %v3853_v51 = vpop.permute.xlu0 %972 }
  0xb9   : > { %7048 = vst [vmem:[#allocation10_spill] sm:$0xff] %v3851_v50  ;;  %7049 = vst [vmem:[#allocation11_spill] sm:$0xff] %v3853_v51 }
  0xbc   : > { %v3855_v52 = vpop.permute.xlu1 %1233  ;;  %v3857_v53 = vpop.permute.xlu0 %1228 }
  0xbd   : > { %7050 = vst [vmem:[#allocation12_spill] sm:$0xff] %v3855_v52  ;;  %7051 = vst [vmem:[#allocation13_spill] sm:$0xff] %v3857_v53 }
  0xc0   : > { %v3859_v54 = vpop.permute.xlu1 %967  ;;  %v3861_v55 = vpop.permute.xlu0 %962 }
  0xc1   : > { %7052 = vst [vmem:[#allocation14_spill] sm:$0xff] %v3859_v54  ;;  %7053 = vst [vmem:[#allocation15_spill] sm:$0xff] %v3861_v55 }
  0xc4   : > { %v3863_v56 = vpop.permute.xlu1 %1223  ;;  %v3865_v57 = vpop.permute.xlu0 %1218 }
  0xc5   : > { %7054 = vst [vmem:[#allocation16_spill] sm:$0xff] %v3863_v56  ;;  %7055 = vst [vmem:[#allocation17_spill] sm:$0xff] %v3865_v57 }
  0xc8   : > { %v3867_v58 = vpop.permute.xlu1 %957  ;;  %v3869_v59 = vpop.permute.xlu0 %952 }
  0xc9   : > { %7056 = vst [vmem:[#allocation18_spill] sm:$0xff] %v3867_v58  ;;  %7057 = vst [vmem:[#allocation19_spill] sm:$0xff] %v3869_v59 }
  0xcc   : > { %v3871_v60 = vpop.permute.xlu1 %1213  ;;  %v3873_v61 = vpop.permute.xlu0 %1208 }
  0xcd   : > { %7058 = vst [vmem:[#allocation20_spill] sm:$0xff] %v3871_v60  ;;  %7059 = vst [vmem:[#allocation21_spill] sm:$0xff] %v3873_v61 }
  0xd0   : > { %v3875_v62 = vpop.permute.xlu1 %947  ;;  %v3877_v63 = vpop.permute.xlu0 %942 }
  0xd1   : > { %7060 = vst [vmem:[#allocation22_spill] sm:$0xff] %v3875_v62  ;;  %7061 = vst [vmem:[#allocation23_spill] sm:$0xff] %v3877_v63 }
  0xd4   : > { %v3879_v0 = vpop.permute.xlu1 %1203  ;;  %v3881_v1 = vpop.permute.xlu0 %1198 }
  0xd5   : > { %7062 = vst [vmem:[#allocation24_spill] sm:$0xff] %v3879_v0  ;;  %7063 = vst [vmem:[#allocation25_spill] sm:$0xff] %v3881_v1 }
  0xd8   : > { %v3883_v3 = vpop.permute.xlu1 %937  ;;  %v3885_v4 = vpop.permute.xlu0 %932 }
  0xd9   : > { %7064 = vst [vmem:[#allocation26_spill] sm:$0xff] %v3883_v3  ;;  %7065 = vst [vmem:[#allocation27_spill] sm:$0xff] %v3885_v4 }
  0xdc   : > { %v3887_v5 = vpop.permute.xlu1 %1193  ;;  %v3889_v6 = vpop.permute.xlu0 %1188 }
  0xdd   : > { %7066 = vst [vmem:[#allocation28_spill] sm:$0xff] %v3887_v5  ;;  %7067 = vst [vmem:[#allocation29_spill] sm:$0xff] %v3889_v6 }
  0xe0   : > { %v3891_v7 = vpop.permute.xlu1 %927  ;;  %v3893_v8 = vpop.permute.xlu0 %922 }
  0xe2   : > { %v681_v9 = vpop.f32.mrf.mxu0  ;;  %v801_v10 = vpop.f32.mrf.mxu1 }
  0xe3   : > { %v1088_v11 = vmul.f32 %v3829_v39, %v801_v10 }
  0xe4   : > { %v683_v12 = vpop.f32.mrf.mxu0  ;;  %v803_v13 = vpop.f32.mrf.mxu1 }
  0xe5   : > { %v3897_v14 = vadd.f32 %v3833_v41, %v1088_v11  ;;  %v3899_v15 = vpop.permute.xlu1 %1183  ;;  %v3901_v16 = vpop.permute.xlu0 %1178  ;;  %v1089_v58 = vmul.f32 %v3829_v39, %v803_v13 }
  0xe6   : > { %7069 = vst [vmem:[#allocation31_spill] sm:$0xff] %v3899_v15  ;;  %7070 = vst [vmem:[#allocation32_spill] sm:$0xff] %v3901_v16  ;;  %v685_v17 = vpop.f32.mrf.mxu0  ;;  %v805_v18 = vpop.f32.mrf.mxu1 }
  0xe7   : > { %7068 = vst [vmem:[#allocation30_spill] sm:$0xff] %v3897_v14  ;;  %v6832_v19 = vmax.f32 %v3897_v14, 0.0  ;;  %v1090_v20 = vmul.f32 %v3827_v38, %v805_v18  ;;  %v3974_v16 = vadd.f32 %v3833_v41, %v1089_v58 }
  0xe8   : > { %v687_v21 = vpop.f32.mrf.mxu0  ;;  %v807_v52 = vpop.f32.mrf.mxu1 }
  0xe9   : > { %v3906_v22 = vadd.f32 %v3831_v40, %v1090_v20  ;;  %v3908_v23 = vpop.permute.xlu1 %917  ;;  %v3910_v24 = vpop.permute.xlu0 %912  ;;  %2027 = vrot.lane.b32.xlu0 %v6832_v19, %s3433_s27  ;;  %v1091_v59 = vmul.f32 %v3827_v38, %v807_v52  ;;  %v6865_v41 = vmax.f32 %v3974_v16, 0.0 }
  0xea   : > { %v3915_v25 = vpop.f32.mrf.mxu0  ;;  %v811_v57 = vpop.f32.mrf.mxu1 }
  0xeb   : > { %7071 = vst [vmem:[#allocation33_spill] sm:$0xff] %v3906_v22  ;;  %v6839_v10 = vmax.f32 %v3906_v22, 0.0  ;;  %v3977_v39 = vadd.f32 %v3831_v40, %v1091_v59  ;;  %v1092_v58 = vmul.f32 %v3821_v35, %v811_v57 }
  0xec   : > { %v3918_v11 = vpop.f32.mrf.mxu0  ;;  %v813_v0 = vpop.f32.mrf.mxu1 }
  0xed   : > { %v3920_v18 = vpop.permute.xlu1 %1173  ;;  %v3922_v2 = vpop.permute.xlu0 %1168  ;;  %2029 = vrot.lane.b32.xlu1 %v6839_v10, %s3433_s27  ;;  %v6866_v59 = vmax.f32 %v3977_v39, 0.0  ;;  %v4008_v57 = vadd.f32 %v3825_v37, %v1092_v58 }
  0xee   : > { %v695_v20 = vpop.f32.mrf.mxu0  ;;  %v815_v13 = vpop.f32.mrf.mxu1 }
  0xef   : > { %v6870_v58 = vmax.f32 %v4008_v57, 0.0 }
  0xf0   : > { %v3927_v44 = vpop.f32.mrf.mxu0 }
  0xf1   : > { %v3929_v45 = vpop.permute.xlu1 %907  ;;  %v3931_v19 = vpop.permute.xlu0 %902 }
  0xf2   : > { %v3933_v14 = vpop.f32.mrf.mxu0 }
  0xf4   : > { %v3935_v42 = vpop.f32.mrf.mxu0 }
  0xf5   : > { %v3937_v43 = vpop.permute.xlu1 %1163  ;;  %v3939_v48 = vpop.permute.xlu0 %1158 }
  0xf6   : > { %v3941_v49 = vpop.f32.mrf.mxu0 }
  0xf8   : > { %v3943_v46 = vpop.f32.mrf.mxu0 }
  0xf9   : > { %v3945_v10 = vpop.permute.xlu1 %897  ;;  %v3947_v22 = vpop.permute.xlu0 %892 }
  0xfa   : > { %v3949_v47 = vpop.f32.mrf.mxu0 }
  0xfc   : > { %v3951_v53 = vpop.f32.mrf.mxu0 }
  0xfd   : > { %v3953_v50 = vpop.permute.xlu1 %1153  ;;  %v3955_v51 = vpop.permute.xlu0 %1148 }
  0xfe   : > { %v3957_v56 = vpop.f32.mrf.mxu0 }
 0x100   : > { %v3959_v54 = vpop.f32.mrf.mxu0 }
 0x101   : > { %v888_v55 = vpop.permute.xlu1 %887  ;;  %v883_v60 = vpop.permute.xlu0 %882 }
 0x102   : > { %v3961_v61 = vpop.f32.mrf.mxu0  ;;  %v1042_v1 = vmul.f32 %v888_v55, %v685_v17  ;;  %v1040_v62 = vmul.f32 %v883_v60, %v681_v9  ;;  %v1043_v17 = vmul.f32 %v888_v55, %v687_v21  ;;  %v1094_v55 = vmul.f32 %v3819_v34, %v815_v13 }
 0x104   : > { %v3965_v63 = vpop.f32.mrf.mxu0  ;;  %v4011_v13 = vadd.f32 %v3823_v36, %v1094_v55  ;;  %v1093_v55 = vmul.f32 %v3821_v35, %v813_v0 }
 0x105   : > { %v1144_v5 = vpop.permute.xlu1 %1143  ;;  %v1139_v6 = vpop.permute.xlu0 %1138 }
 0x106   : > { %v3967_v3 = vadd.f32 %v1144_v5, %v1042_v1  ;;  %v3969_v4 = vadd.f32 %v1139_v6, %v1040_v62  ;;  %v3971_v15 = vpop.f32.mrf.mxu0  ;;  %v1041_v1 = vmul.f32 %v883_v60, %v683_v12  ;;  %v3995_v60 = vadd.f32 %v1144_v5, %v1043_v17  ;;  %v817_v12 = vpop.f32.mrf.mxu1 }
 0x107   : > { %v4045_v35 = vadd.f32 %v3825_v37, %v1093_v55 }
 0x108   : > { %v3979_v38 = vpop.f32.mrf.mxu0  ;;  %v6867_v52 = vmax.f32 %v3969_v4, 0.0  ;;  %v6864_v9 = vmax.f32 %v3967_v3, 0.0  ;;  %v3997_v62 = vadd.f32 %v1139_v6, %v1041_v1  ;;  %v6871_v6 = vmax.f32 %v3995_v60, 0.0  ;;  %v821_v17 = vpop.f32.mrf.mxu1 }
 0x109   : > { %v1096_v37 = vmul.f32 %v3813_v31, %v821_v17  ;;  %v1048_v17 = vmul.f32 %v3931_v19, %v3933_v14 }
 0x10a   : > { %1440 = vrot.lane.b32.xlu0 %v6867_v52, %s3434_s28  ;;  %1442 = vrot.lane.b32.xlu1 %v6864_v9, %s3434_s28  ;;  %v3989_v40 = vpop.f32.mrf.mxu0  ;;  %7072 = vst [vmem:[#allocation34_spill] sm:$0xff] %v3997_v62  ;;  %v6869_v5 = vmax.f32 %v3997_v62, 0.0  ;;  %v1046_v9 = vmul.f32 %v3945_v10, %v695_v20  ;;  %v1095_v52 = vmul.f32 %v3819_v34, %v817_v12  ;;  %v823_v62 = vpop.f32.mrf.mxu1 }
 0x10b   : > { %v4104_v14 = vadd.f32 %v3939_v48, %v1048_v17 }
 0x10c   : > { %v3999_v21 = vpop.f32.mrf.mxu0  ;;  %v4031_v20 = vadd.f32 %v3953_v50, %v1046_v9  ;;  %v4048_v34 = vadd.f32 %v3823_v36, %v1095_v52  ;;  %v6872_v36 = vmax.f32 %v4045_v35, 0.0 }
 0x10e   : > { %2059 = vrot.lane.b32.xlu0 %v6865_v41, %s3433_s27  ;;  %2061 = vrot.lane.b32.xlu1 %v6866_v59, %s3433_s27  ;;  %v4015_v1 = vpop.f32.mrf.mxu0  ;;  %v1044_v41 = vmul.f32 %v3947_v22, %v3915_v25  ;;  %v6873_v59 = vmax.f32 %v4011_v13, 0.0  ;;  %v6875_v9 = vmax.f32 %v4031_v20, 0.0  ;;  %v6874_v52 = vmax.f32 %v4048_v34, 0.0 }
 0x110   : > { %v4034_v25 = vadd.f32 %v3955_v51, %v1044_v41  ;;  %v825_v41 = vpop.f32.mrf.mxu1 }
 0x111   : > { %v1098_v55 = vmul.f32 %v3811_v30, %v825_v41 }
 0x112   : > { %1472 = vrot.lane.b32.xlu0 %v6869_v5, %s3434_s28  ;;  %1474 = vrot.lane.b32.xlu1 %v6871_v6, %s3434_s28  ;;  %v4036_v5 = vpop.f32.mrf.mxu0  ;;  %v6876_v0 = vmax.f32 %v4034_v25, 0.0  ;;  %v1045_v6 = vmul.f32 %v3947_v22, %v3918_v11 }
 0x114   : > { %v4052_v12 = vpop.f32.mrf.mxu0  ;;  %v4072_v22 = vadd.f32 %v3955_v51, %v1045_v6  ;;  %v1050_v51 = vmul.f32 %v3929_v45, %v3941_v49  ;;  %v4090_v6 = vadd.f32 %v3815_v32, %v1098_v55  ;;  %v1097_v49 = vmul.f32 %v3813_v31, %v823_v62 }
 0x115   : > { %v1049_v31 = vmul.f32 %v3931_v19, %v3935_v42 }
 0x116   : > { %2031 = vrot.lane.b32.xlu0 %v6870_v58, %s3433_s27  ;;  %2033 = vrot.lane.b32.xlu1 %v6873_v59, %s3433_s27  ;;  %v1047_v58 = vmul.f32 %v3945_v10, %v3927_v44  ;;  %v827_v10 = vpop.f32.mrf.mxu1  ;;  %v4074_v11 = vpop.f32.mrf.mxu0  ;;  %v4108_v55 = vadd.f32 %v3937_v43, %v1050_v51  ;;  %v4123_v62 = vadd.f32 %v3817_v33, %v1097_v49  ;;  %v6901_v51 = vmax.f32 %v4104_v14, 0.0 }
 0x117   : > { %v4142_v42 = vadd.f32 %v3939_v48, %v1049_v31 }
 0x118   : > { %v4069_v44 = vadd.f32 %v3953_v50, %v1047_v58  ;;  %v4085_v50 = vadd.f32 %v3817_v33, %v1096_v37  ;;  %v6877_v58 = vmax.f32 %v4072_v22, 0.0  ;;  %v4094_v59 = vpop.f32.mrf.mxu0  ;;  %v6883_v17 = vmax.f32 %v4108_v55, 0.0 }
 0x119   : > { %v6880_v33 = vmax.f32 %v4123_v62, 0.0  ;;  %v6898_v48 = vmax.f32 %v4142_v42, 0.0 }
 0x11a   : > { %1444 = vrot.lane.b32.xlu0 %v6876_v0, %s3434_s28  ;;  %1446 = vrot.lane.b32.xlu1 %v6875_v9, %s3434_s28  ;;  %v6879_v41 = vmax.f32 %v4069_v44, 0.0  ;;  %v6878_v37 = vmax.f32 %v4085_v50, 0.0  ;;  %v1099_v9 = vmul.f32 %v3811_v30, %v827_v10  ;;  %v1051_v30 = vmul.f32 %v3929_v45, %v3943_v46 }
 0x11c   : > { %v4129_v10 = vadd.f32 %v3815_v32, %v1099_v9  ;;  %v4145_v32 = vadd.f32 %v3937_v43, %v1051_v30  ;;  %v1052_v43 = vmul.f32 %v3910_v24, %v3949_v47 }
 0x11e   : > { %2063 = vrot.lane.b32.xlu0 %v6872_v36, %s3433_s27  ;;  %2065 = vrot.lane.b32.xlu1 %v6874_v52, %s3433_s27  ;;  %v831_v36 = vpop.f32.mrf.mxu1  ;;  %v6882_v52 = vmax.f32 %v4090_v6, 0.0  ;;  %v6881_v45 = vmax.f32 %v4129_v10, 0.0  ;;  %v6895_v49 = vmax.f32 %v4145_v32, 0.0  ;;  %v4179_v47 = vadd.f32 %v3922_v2, %v1052_v43 }
 0x11f   : > { %v1100_v46 = vmul.f32 %v3805_v27, %v831_v36 }
 0x120   : > { %v833_v0 = vpop.f32.mrf.mxu1  ;;  %v6892_v43 = vmax.f32 %v4179_v47, 0.0 }
 0x121   : > { %v4163_v36 = vadd.f32 %v3803_v26, %v1100_v46  ;;  %v1101_v46 = vmul.f32 %v3805_v27, %v833_v0  ;;  %v1053_v27 = vmul.f32 %v3910_v24, %v3951_v53  ;;  %v1058_v24 = vmul.f32 %v3891_v7, %v3971_v15  ;;  %v7074_v15 = vld [vmem:[#allocation31_spill] sm:$0xff] }
 0x122   : > { %1476 = vrot.lane.b32.xlu0 %v6877_v58, %s3434_s28  ;;  %1478 = vrot.lane.b32.xlu1 %v6879_v41, %s3434_s28  ;;  %v4112_v58 = vpop.f32.mrf.mxu0 }
 0x123   : > { %v4199_v0 = vadd.f32 %v3803_v26, %v1101_v46  ;;  %v4217_v26 = vadd.f32 %v3922_v2, %v1053_v27  ;;  %v7073_v46 = vld [vmem:[#allocation32_spill] sm:$0xff] }
 0x124   : > { %v4132_v41 = vpop.f32.mrf.mxu0 }
 0x125   : > { %v6885_v53 = vmax.f32 %v4199_v0, 0.0  ;;  %v6888_v2 = vmax.f32 %v4217_v26, 0.0 }
 0x126   : > { %2035 = vrot.lane.b32.xlu0 %v6878_v37, %s3433_s27  ;;  %2037 = vrot.lane.b32.xlu1 %v6882_v52, %s3433_s27  ;;  %v835_v37 = vpop.f32.mrf.mxu1  ;;  %v4150_v9 = vpop.f32.mrf.mxu0 }
 0x127   : > { %v1102_v19 = vmul.f32 %v3809_v29, %v835_v37  ;;  %v1054_v37 = vmul.f32 %v3908_v23, %v3957_v56  ;;  %v6884_v56 = vmax.f32 %v4163_v36, 0.0 }
 0x128   : > { %v837_v30 = vpop.f32.mrf.mxu1 }
 0x129   : > { %v4168_v31 = vadd.f32 %v3807_v28, %v1102_v19  ;;  %v4184_v19 = vadd.f32 %v3920_v18, %v1054_v37  ;;  %v1103_v52 = vmul.f32 %v3809_v29, %v837_v30  ;;  %v1055_v37 = vmul.f32 %v3908_v23, %v3959_v54 }
 0x12a   : > { %1448 = vrot.lane.b32.xlu0 %v6901_v51, %s3434_s28  ;;  %1450 = vrot.lane.b32.xlu1 %v6883_v17, %s3434_s28  ;;  %v1056_v23 = vmul.f32 %v3893_v8, %v3961_v61 }
 0x12b   : > { %v6889_v29 = vmax.f32 %v4184_v19, 0.0  ;;  %v4206_v30 = vadd.f32 %v3807_v28, %v1103_v52  ;;  %v4221_v54 = vadd.f32 %v3920_v18, %v1055_v37  ;;  %v1057_v18 = vmul.f32 %v3893_v8, %v3965_v63  ;;  %v7075_v8 = vld [vmem:[#allocation27_spill] sm:$0xff] }
 0x12c   : > { %v4241_v27 = vadd.f32 %v7073_v46, %v1056_v23  ;;  %v4244_v37 = vadd.f32 %v7074_v15, %v1058_v24  ;;  %v1060_v23 = vmul.f32 %v7075_v8, %v3989_v40 }
 0x12d   : > { %v6887_v28 = vmax.f32 %v4206_v30, 0.0  ;;  %v6890_v61 = vmax.f32 %v4221_v54, 0.0  ;;  %v4255_v63 = vadd.f32 %v7073_v46, %v1057_v18  ;;  %v7077_v18 = vld [vmem:[#allocation29_spill] sm:$0xff] }
 0x12e   : > { %2067 = vrot.lane.b32.xlu0 %v6880_v33, %s3433_s27  ;;  %2069 = vrot.lane.b32.xlu1 %v6881_v45, %s3433_s27  ;;  %v4170_v33 = vpop.f32.mrf.mxu0  ;;  %v6886_v45 = vmax.f32 %v4168_v31, 0.0  ;;  %v6891_v24 = vmax.f32 %v4241_v27, 0.0  ;;  %v4274_v46 = vadd.f32 %v7077_v18, %v1060_v23 }
 0x12f   : > { %v6894_v40 = vmax.f32 %v4255_v63, 0.0 }
 0x130   : > { %v4188_v17 = vpop.f32.mrf.mxu0  ;;  %v6897_v23 = vmax.f32 %v4274_v46, 0.0 }
 0x132   : > { %1480 = vrot.lane.b32.xlu0 %v6898_v48, %s3434_s28  ;;  %1482 = vrot.lane.b32.xlu1 %v6895_v49, %s3434_s28 }
 0x136   : > { %2039 = vrot.lane.b32.xlu0 %v6884_v56, %s3433_s27  ;;  %2041 = vrot.lane.b32.xlu1 %v6886_v45, %s3433_s27  ;;  %v4208_v56 = vpop.f32.mrf.mxu0 }
 0x138   : > { %v4228_v52 = vpop.f32.mrf.mxu0 }
 0x13a   : > { %1452 = vrot.lane.b32.xlu0 %v6892_v43, %s3434_s28  ;;  %1454 = vrot.lane.b32.xlu1 %v6889_v29, %s3434_s28  ;;  %v765_v45 = vpop.f32.mrf.mxu0 }
 0x13c   : > { %v767_v29 = vpop.f32.mrf.mxu0 }
 0x13e   : > { %2071 = vrot.lane.b32.xlu0 %v6885_v53, %s3433_s27  ;;  %2073 = vrot.lane.b32.xlu1 %v6887_v28, %s3433_s27  ;;  %v1059_v53 = vmul.f32 %v3891_v7, %v3979_v38  ;;  %v6893_v28 = vmax.f32 %v4244_v37, 0.0  ;;  %v7076_v38 = vld [vmem:[#allocation26_spill] sm:$0xff]  ;;  %v771_v43 = vpop.f32.mrf.mxu0 }
 0x140   : > { %v4262_v7 = vadd.f32 %v7074_v15, %v1059_v53  ;;  %v1061_v15 = vmul.f32 %v7075_v8, %v3999_v21  ;;  %v773_v49 = vpop.f32.mrf.mxu0 }
 0x142   : > { %1484 = vrot.lane.b32.xlu0 %v6888_v2, %s3434_s28  ;;  %1486 = vrot.lane.b32.xlu1 %v6890_v61, %s3434_s28  ;;  %v1062_v2 = vmul.f32 %v7076_v38, %v4015_v1  ;;  %v6896_v53 = vmax.f32 %v4262_v7, 0.0  ;;  %v7078_v1 = vld [vmem:[#allocation28_spill] sm:$0xff]  ;;  %v775_v48 = vpop.f32.mrf.mxu0 }
 0x144   : > { %v4280_v61 = vadd.f32 %v7078_v1, %v1062_v2  ;;  %v4294_v2 = vadd.f32 %v7077_v18, %v1061_v15  ;;  %v777_v51 = vpop.f32.mrf.mxu0 }
 0x146   : > { %1456 = vrot.lane.b32.xlu0 %v6891_v24, %s3434_s28  ;;  %1458 = vrot.lane.b32.xlu1 %v6893_v28, %s3434_s28  ;;  %v1063_v24 = vmul.f32 %v7076_v38, %v4036_v5  ;;  %v7079_v28 = vld [vmem:[#allocation23_spill] sm:$0xff]  ;;  %v6899_v8 = vmax.f32 %v4280_v61, 0.0  ;;  %v7080_v38 = vld [vmem:[#allocation22_spill] sm:$0xff] }
 0x147   : > { %v1064_v21 = vmul.f32 %v7079_v28, %v4052_v12  ;;  %v7081_v12 = vld [vmem:[#allocation25_spill] sm:$0xff]  ;;  %v1065_v15 = vmul.f32 %v7079_v28, %v4074_v11 }
 0x148   : > { %v4298_v5 = vadd.f32 %v7078_v1, %v1063_v24  ;;  %v6900_v24 = vmax.f32 %v4294_v2, 0.0 }
 0x149   : > { %v4309_v18 = vadd.f32 %v7081_v12, %v1064_v21  ;;  %v4328_v28 = vadd.f32 %v7081_v12, %v1065_v15 }
 0x14a   : > { %1488 = vrot.lane.b32.xlu0 %v6894_v40, %s3434_s28  ;;  %1490 = vrot.lane.b32.xlu1 %v6896_v53, %s3434_s28  ;;  %v1066_v40 = vmul.f32 %v7080_v38, %v4094_v59  ;;  %v6902_v1 = vmax.f32 %v4298_v5, 0.0  ;;  %v7083_v59 = vld [vmem:[#allocation24_spill] sm:$0xff] }
 0x14b   : > { %7082 = vst [vmem:[#allocation32_spill] sm:$0xff] %v4309_v18  ;;  %v6903_v11 = vmax.f32 %v4309_v18, 0.0  ;;  %7084 = vst [vmem:[#allocation31_spill] sm:$0xff] %v4328_v28  ;;  %v6907_v12 = vmax.f32 %v4328_v28, 0.0  ;;  %v781_v18 = vpop.f32.mrf.mxu0 }
 0x14c   : > { %v4316_v53 = vadd.f32 %v7083_v59, %v1066_v40 }
 0x14e   : > { %1460 = vrot.lane.b32.xlu0 %v6897_v23, %s3434_s28  ;;  %1462 = vrot.lane.b32.xlu1 %v6899_v8, %s3434_s28  ;;  %v1067_v23 = vmul.f32 %v7080_v38, %v4112_v58  ;;  %v6905_v40 = vmax.f32 %v4316_v53, 0.0  ;;  %v7085_v58 = vld [vmem:[#allocation19_spill] sm:$0xff]  ;;  %v7086_v8 = vld [vmem:[#allocation18_spill] sm:$0xff] }
 0x14f   : > { %v1068_v38 = vmul.f32 %v7085_v58, %v4132_v41  ;;  %v7087_v41 = vld [vmem:[#allocation21_spill] sm:$0xff] }
 0x150   : > { %v4332_v21 = vadd.f32 %v7083_v59, %v1067_v23  ;;  %v1069_v23 = vmul.f32 %v7085_v58, %v4150_v9  ;;  %v7092_v58 = vld [vmem:[#allocation15_spill] sm:$0xff] }
 0x151   : > { %v4349_v59 = vadd.f32 %v7087_v41, %v1068_v38  ;;  %v1072_v38 = vmul.f32 %v7092_v58, %v4208_v56 }
 0x152   : > { %1492 = vrot.lane.b32.xlu0 %v6900_v24, %s3434_s28  ;;  %1494 = vrot.lane.b32.xlu1 %v6902_v1, %s3434_s28  ;;  %v1070_v24 = vmul.f32 %v7086_v8, %v4170_v33  ;;  %v6908_v15 = vmax.f32 %v4332_v21, 0.0  ;;  %v7089_v33 = vld [vmem:[#allocation20_spill] sm:$0xff]  ;;  %v4363_v9 = vadd.f32 %v7087_v41, %v1069_v23  ;;  %v7094_v23 = vld [vmem:[#allocation17_spill] sm:$0xff] }
 0x153   : > { %7088 = vst [vmem:[#allocation27_spill] sm:$0xff] %v4349_v59  ;;  %v4381_v41 = vadd.f32 %v7094_v23, %v1072_v38 }
 0x154   : > { %v4352_v1 = vadd.f32 %v7089_v33, %v1070_v24  ;;  %7091 = vst [vmem:[#allocation29_spill] sm:$0xff] %v4363_v9  ;;  %v6910_v24 = vmax.f32 %v4349_v59, 0.0  ;;  %v6915_v56 = vmax.f32 %v4363_v9, 0.0 }
 0x155   : > { %7095 = vst [vmem:[#allocation28_spill] sm:$0xff] %v4381_v41  ;;  %v6918_v38 = vmax.f32 %v4381_v41, 0.0 }
 0x156   : > { %1464 = vrot.lane.b32.xlu0 %v6903_v11, %s3434_s28  ;;  %1466 = vrot.lane.b32.xlu1 %v6905_v40, %s3434_s28  ;;  %7090 = vst [vmem:[#allocation26_spill] sm:$0xff] %v4352_v1  ;;  %v1071_v11 = vmul.f32 %v7086_v8, %v4188_v17  ;;  %v6911_v40 = vmax.f32 %v4352_v1, 0.0  ;;  %v7093_v8 = vld [vmem:[#allocation14_spill] sm:$0xff] }
 0x157   : > { %v1074_v28 = vmul.f32 %v7093_v8, %v765_v45  ;;  %v7096_v45 = vld [vmem:[#allocation16_spill] sm:$0xff]  ;;  %v1075_v59 = vmul.f32 %v7093_v8, %v767_v29 }
 0x158   : > { %v4370_v17 = vadd.f32 %v7089_v33, %v1071_v11  ;;  %v1073_v11 = vmul.f32 %v7092_v58, %v4228_v52  ;;  %v7101_v58 = vld [vmem:[#allocation10_spill] sm:$0xff] }
 0x159   : > { %v4387_v33 = vadd.f32 %v7096_v45, %v1074_v28  ;;  %v4403_v29 = vadd.f32 %v7096_v45, %v1075_v59  ;;  %v1078_v8 = vmul.f32 %v7101_v58, %v775_v48  ;;  %v7104_v45 = vld [vmem:[#allocation12_spill] sm:$0xff] }
 0x15a   : > { %1496 = vrot.lane.b32.xlu0 %v6907_v12, %s3434_s28  ;;  %1498 = vrot.lane.b32.xlu1 %v6908_v15, %s3434_s28  ;;  %v783_v12 = vpop.f32.mrf.mxu0  ;;  %v6914_v15 = vmax.f32 %v4370_v17, 0.0  ;;  %v4399_v52 = vadd.f32 %v7094_v23, %v1073_v11 }
 0x15b   : > { %7097 = vst [vmem:[#allocation23_spill] sm:$0xff] %v4387_v33  ;;  %v6917_v28 = vmax.f32 %v4387_v33, 0.0  ;;  %7100 = vst [vmem:[#allocation25_spill] sm:$0xff] %v4403_v29  ;;  %v6920_v59 = vmax.f32 %v4403_v29, 0.0  ;;  %v4419_v48 = vadd.f32 %v7104_v45, %v1078_v8 }
 0x15c   : > { %7099 = vst [vmem:[#allocation22_spill] sm:$0xff] %v4399_v52  ;;  %v6921_v11 = vmax.f32 %v4399_v52, 0.0 }
 0x15d   : > { %7105 = vst [vmem:[#allocation19_spill] sm:$0xff] %v4419_v48 }
 0x15e   : > { %1468 = vrot.lane.b32.xlu0 %v6910_v24, %s3434_s28  ;;  %1470 = vrot.lane.b32.xlu1 %v6911_v40, %s3434_s28  ;;  %v785_v24 = vpop.f32.mrf.mxu0  ;;  %v7098_v40 = vld [vmem:[#allocation11_spill] sm:$0xff] }
 0x15f   : > { %v1076_v1 = vmul.f32 %v7098_v40, %v771_v43  ;;  %v7102_v43 = vld [vmem:[#allocation13_spill] sm:$0xff]  ;;  %v1077_v23 = vmul.f32 %v7098_v40, %v773_v49  ;;  %v6923_v40 = vmax.f32 %v4419_v48, 0.0  ;;  %v2030_v48 = vpop.permute.xlu1 %2029 }
 0x160   : > { %v787_v9 = vpop.f32.mrf.mxu0 }
 0x162   : > { %1500 = vrot.lane.b32.xlu0 %v6915_v56, %s3434_s28  ;;  %1502 = vrot.lane.b32.xlu1 %v6914_v15, %s3434_s28  ;;  %v4413_v15 = vadd.f32 %v7102_v43, %v1076_v1  ;;  %v1079_v56 = vmul.f32 %v7101_v58, %v777_v51  ;;  %v791_v41 = vpop.f32.mrf.mxu0  ;;  %v4430_v1 = vadd.f32 %v7102_v43, %v1077_v23  ;;  %v7108_v51 = vld [vmem:[#allocation7_spill] sm:$0xff] }
 0x163   : > { %v1080_v58 = vmul.f32 %v7108_v51, %v781_v18  ;;  %v1081_v43 = vmul.f32 %v7108_v51, %v783_v12  ;;  %v7110_v18 = vld [vmem:[#allocation9_spill] sm:$0xff] }
 0x164   : > { %7103 = vst [vmem:[#allocation24_spill] sm:$0xff] %v4413_v15  ;;  %v6924_v49 = vmax.f32 %v4413_v15, 0.0  ;;  %7106 = vst [vmem:[#allocation18_spill] sm:$0xff] %v4430_v1  ;;  %v4434_v8 = vadd.f32 %v7104_v45, %v1079_v56  ;;  %v793_v52 = vpop.f32.mrf.mxu0  ;;  %v6926_v56 = vmax.f32 %v4430_v1, 0.0 }
 0x165   : > { %v4461_v12 = vadd.f32 %v7110_v18, %v1081_v43 }
 0x166   : > { %2011 = vrot.lane.b32.xlu0 %v6918_v38, %s3433_s27  ;;  %2013 = vrot.lane.b32.xlu1 %v6917_v28, %s3433_s27  ;;  %7107 = vst [vmem:[#allocation21_spill] sm:$0xff] %v4434_v8  ;;  %v7109_v28 = vld [vmem:[#allocation6_spill] sm:$0xff]  ;;  %v6927_v45 = vmax.f32 %v4434_v8, 0.0  ;;  %v795_v15 = vpop.f32.mrf.mxu0 }
 0x167   : > { %v1082_v38 = vmul.f32 %v7109_v28, %v785_v24  ;;  %v1083_v23 = vmul.f32 %v7109_v28, %v787_v9  ;;  %v7112_v24 = vld [vmem:[#allocation8_spill] sm:$0xff]  ;;  %7114 = vst [vmem:[#allocation14_spill] sm:$0xff] %v4461_v12  ;;  %v415_v28 = vlaneseq  ;;  %v6932_v43 = vmax.f32 %v4461_v12, 0.0 }
 0x169   : > { %v4464_v9 = vadd.f32 %v7112_v24, %v1083_v23 }
 0x16a   : > { %2043 = vrot.lane.b32.xlu0 %v6921_v11, %s3433_s27  ;;  %2045 = vrot.lane.b32.xlu1 %v6920_v59, %s3433_s27  ;;  %v4449_v59 = vadd.f32 %v7110_v18, %v1080_v58  ;;  %v4452_v11 = vadd.f32 %v7112_v24, %v1082_v38  ;;  %v7116_v58 = vld [vmem:[#allocation3_spill] sm:$0xff]  ;;  %v4478_v18 = vand.u32 127, %v415_v28  ;;  %v7118_v24 = vld [vmem:[#allocation5_spill] sm:$0xff] }
 0x16b   : > { %7115 = vst [vmem:[#allocation17_spill] sm:$0xff] %v4464_v9  ;;  %v6933_v23 = vmax.f32 %v4464_v9, 0.0 }
 0x16c   : > { %7111 = vst [vmem:[#allocation20_spill] sm:$0xff] %v4449_v59  ;;  %7113 = vst [vmem:[#allocation15_spill] sm:$0xff] %v4452_v11  ;;  %v6929_v51 = vmax.f32 %v4449_v59, 0.0  ;;  %v6934_v38 = vmax.f32 %v4452_v11, 0.0  ;;  %v2028_v59 = vpop.permute.xlu0 %2027  ;;  %vm7037_vm2 = vcmp.lt.s32.totalorder %v4478_v18, 127  ;;  %vm1504_vm3 = vcmp.lt.s32.totalorder %v4478_v18, 112 }
 0x16d   : > { %vm2248_vm7 = vcmp.lt.s32.totalorder %v4478_v18, 126  ;;  %vm1671_vm10 = vcmp.lt.s32.totalorder %v4478_v18, 96  ;;  %vm2421_vm12 = vcmp.lt.s32.totalorder %v4478_v18, 124  ;;  %vm1838_vm15 = vcmp.lt.s32.totalorder %v4478_v18, 64 }
 0x16e   : > { %2015 = vrot.lane.b32.xlu0 %v6924_v49, %s3433_s27  ;;  %2017 = vrot.lane.b32.xlu1 %v6923_v40, %s3433_s27  ;;  %v1084_v40 = vmul.f32 %v7116_v58, %v791_v41  ;;  %v7117_v49 = vld [vmem:[#allocation2_spill] sm:$0xff]  ;;  %v7120_v41 = vld [vmem:[#allocation4_spill] sm:$0xff] }
 0x16f   : > { %v1086_v1 = vmul.f32 %v7117_v49, %v795_v15  ;;  %v1085_v15 = vmul.f32 %v7116_v58, %v793_v52  ;;  %v4498_v52 = vand.u32 15, %v4478_v18 }
 0x171   : > { %v4485_v8 = vadd.f32 %v7120_v41, %v1086_v1  ;;  %7122 = vst [vmem:[#allocation10_spill] sm:$0xff] %v4498_v52 }
 0x172   : > { %2047 = vrot.lane.b32.xlu0 %v6926_v56, %s3433_s27  ;;  %2049 = vrot.lane.b32.xlu1 %v6927_v45, %s3433_s27  ;;  %v797_v56 = vpop.f32.mrf.mxu0  ;;  %v4481_v45 = vadd.f32 %v7118_v24, %v1084_v40  ;;  %v4495_v40 = vadd.s32 128, %v4478_v18 }
 0x173   : > { %7121 = vst [vmem:[#allocation11_spill] sm:$0xff] %v4485_v8 }
 0x174   : > { %7119 = vst [vmem:[#allocation16_spill] sm:$0xff] %v4481_v45  ;;  %v6936_v1 = vmax.f32 %v4481_v45, 0.0  ;;  %vm7039_vm6 = vcmp.lt.s32.totalorder %v4495_v40, 240  ;;  %vm1705_vm11 = vcmp.lt.s32.totalorder %v4495_v40, 224 }
 0x176   : > { %2019 = vrot.lane.b32.xlu0 %v6929_v51, %s3433_s27  ;;  %2021 = vrot.lane.b32.xlu1 %v6934_v38, %s3433_s27  ;;  %v1087_v51 = vmul.f32 %v7117_v49, %v797_v56  ;;  %v4502_v49 = vadd.f32 %v7118_v24, %v1085_v15  ;;  %v6935_v56 = vmax.f32 %v4485_v8, 0.0  ;;  %v4517_v15 = vand.u32 15, %v4495_v40 }
 0x178   : > { %7123 = vst [vmem:[#allocation13_spill] sm:$0xff] %v4502_v49  ;;  %v4506_v28 = vadd.f32 %v7120_v41, %v1087_v51  ;;  %7125 = vst [vmem:[#allocation7_spill] sm:$0xff] %v4517_v15  ;;  %v4520_v51 = vadd.s32 1, %v4498_v52  ;;  %v7130_v52 = vmax.f32 %v3967_v3, 0.0  ;;  %v7132_v3 = vld [vmem:[#allocation30_spill] sm:$0xff] }
 0x17a   : > { %2051 = vrot.lane.b32.xlu0 %v6932_v43, %s3433_s27  ;;  %2053 = vrot.lane.b32.xlu1 %v6933_v23, %s3433_s27  ;;  %7124 = vst [vmem:[#allocation12_spill] sm:$0xff] %v4506_v28  ;;  %v6940_v23 = vmax.f32 %v4502_v49, 0.0  ;;  %v6941_v24 = vmax.f32 %v4506_v28, 0.0  ;;  %7126 = vst [vmem:[#allocation6_spill] sm:$0xff] %v4520_v51  ;;  %vm2112_vm4 = vcmp.lt.s32.totalorder %v4520_v51, 16  ;;  %v7128_v28 = vmax.f32 %v3969_v4, 0.0 }
 0x17c   : > { %v1441_v58 = vpop.permute.xlu0 %1440  ;;  %v1443_v43 = vpop.permute.xlu1 %1442 }
 0x17e   : > { %2023 = vrot.lane.b32.xlu0 %v6936_v1, %s3433_s27  ;;  %2025 = vrot.lane.b32.xlu1 %v6935_v56, %s3433_s27  ;;  %v4531_v56 = vadd.s32 1, %v4517_v15 }
 0x180   : > { %v2060_v41 = vpop.permute.xlu0 %2059  ;;  %v2062_v38 = vpop.permute.xlu1 %2061  ;;  %7127 = vst [vmem:[#allocation9_spill] sm:$0xff] %v4531_v56  ;;  %vm2113_vm5 = vcmp.lt.s32.totalorder %v4531_v56, 16 }
 0x181   : > { %v2084_v1 = vsel %vm7037_vm2, %v2028_v59, %v2060_v41  ;;  %v2085_v8 = vsel %vm7037_vm2, %v2030_v48, %v2062_v38  ;;  %v2100_v29 = vsel %vm7037_vm2, %v2060_v41, %v2028_v59  ;;  %v2101_v4 = vsel %vm7037_vm2, %v2062_v38, %v2030_v48 }
 0x182   : > { %2055 = vrot.lane.b32.xlu0 %v6940_v23, %s3433_s27  ;;  %2057 = vrot.lane.b32.xlu1 %v6941_v24, %s3433_s27  ;;  %v2136_v12 = vsel %vm2112_vm4, %v2084_v1, -1e+30  ;;  %v2138_v11 = vsel %vm2112_vm4, %v2085_v8, -1e+30  ;;  %v7134_v1 = vld [vmem:[#allocation33_spill] sm:$0xff] }
 0x183   : > { %v2137_v59 = vsel %vm2113_vm5, %v2100_v29, -1e+30  ;;  %v2139_v48 = vsel %vm2113_vm5, %v2101_v4, -1e+30  ;;  %v7136_v29 = vmax.f32 %v3974_v16, 0.0  ;;  %v7137_v4 = vmax.f32 %v3977_v39, 0.0 }
 0x184   : > { %v1473_v45 = vpop.permute.xlu0 %1472  ;;  %v1475_v49 = vpop.permute.xlu1 %1474  ;;  %v7138_v16 = vld [vmem:[#allocation34_spill] sm:$0xff]  ;;  %v7141_v39 = vmax.f32 %v3995_v60, 0.0 }
 0x185   : > { %v1505_v23 = vsel %vm1504_vm3, %v1441_v58, %v1473_v45  ;;  %v1506_v24 = vsel %vm1504_vm3, %v1443_v43, %v1475_v49  ;;  %v1521_v38 = vsel %vm1504_vm3, %v1473_v45, %v1441_v58  ;;  %v1522_v41 = vsel %vm1504_vm3, %v1475_v49, %v1443_v43 }
 0x186   : > { %v4544_v15 = vmax.f32 %v7128_v28, %v1505_v23  ;;  %v4548_v9 = vmax.f32 %v7130_v52, %v1506_v24  ;;  %v7133_v52 = vmax.f32 %v7132_v3, 0.0  ;;  %v7135_v24 = vmax.f32 %v7134_v1, 0.0 }
 0x187   : > { %v1544_v45 = vsel %vm7039_vm6, %v1521_v38, -1e+30  ;;  %v1546_v43 = vsel %vm7039_vm6, %v1522_v41, -1e+30  ;;  %v7139_v1 = vmax.f32 %v7138_v16, 0.0  ;;  %v7144_v16 = vmax.f32 %v4031_v20, 0.0 }
 0x188   : > { %7129 = vst [vmem:[#allocation8_spill] sm:$0xff] %v4544_v15  ;;  %7131 = vst [vmem:[#allocation3_spill] sm:$0xff] %v4548_v9  ;;  %v2032_v23 = vpop.permute.xlu0 %2031  ;;  %v2034_v28 = vpop.permute.xlu1 %2033  ;;  %1607 = vrot.lane.b32.xlu0 %v4544_v15, %s3435_s29  ;;  %1609 = vrot.lane.b32.xlu1 %v4548_v9, %s3435_s29  ;;  %v4565_v8 = vmax.f32 %v7133_v52, %v2136_v12  ;;  %v4569_v33 = vmax.f32 %v7135_v24, %v2138_v11  ;;  %v7145_v20 = vmax.f32 %v4008_v57, 0.0 }
 0x189   : > { %v4586_v11 = vmax.f32 %v7136_v29, %v2137_v59  ;;  %v4590_v52 = vmax.f32 %v7137_v4, %v2139_v48  ;;  %v4602_v24 = vmax.f32 %v7139_v1, %v1544_v45  ;;  %v4606_v59 = vmax.f32 %v7141_v39, %v1546_v43 }
 0x18a   : > { %v7143_v45 = vmax.f32 %v4034_v25, 0.0 }
 0x18b   : > { %7140 = vst [vmem:[#allocation2_spill] sm:$0xff] %v4602_v24  ;;  %7142 = vst [vmem:[#allocation5_spill] sm:$0xff] %v4606_v59 }
 0x18c   : > { %v1445_v12 = vpop.permute.xlu0 %1444  ;;  %v1447_v3 = vpop.permute.xlu1 %1446  ;;  %2200 = vrot.lane.b32.xlu0 %v4565_v8, %s3436_s30  ;;  %2202 = vrot.lane.b32.xlu1 %v4569_v33, %s3436_s30 }
 0x190   : > { %v2064_v49 = vpop.permute.xlu0 %2063  ;;  %v2066_v58 = vpop.permute.xlu1 %2065  ;;  %2232 = vrot.lane.b32.xlu0 %v4586_v11, %s3436_s30  ;;  %2234 = vrot.lane.b32.xlu1 %v4590_v52, %s3436_s30 }
 0x191   : > { %v2086_v48 = vsel %vm7037_vm2, %v2032_v23, %v2064_v49  ;;  %v2087_v38 = vsel %vm7037_vm2, %v2034_v28, %v2066_v58  ;;  %v2103_v9 = vsel %vm7037_vm2, %v2066_v58, %v2034_v28 }
 0x192   : > { %v2140_v39 = vsel %vm2112_vm4, %v2086_v48, -1e+30  ;;  %v2143_v28 = vsel %vm2113_vm5, %v2103_v9, -1e+30  ;;  %v7148_v9 = vmax.f32 %v4048_v34, 0.0  ;;  %v7151_v34 = vmax.f32 %v4069_v44, 0.0 }
 0x193   : > { %v4642_v48 = vmax.f32 %v7145_v20, %v2140_v39 }
 0x194   : > { %v1477_v41 = vpop.permute.xlu0 %1476  ;;  %v1479_v29 = vpop.permute.xlu1 %1478  ;;  %1639 = vrot.lane.b32.xlu0 %v4602_v24, %s3435_s29  ;;  %1641 = vrot.lane.b32.xlu1 %v4606_v59, %s3435_s29  ;;  %v2142_v59 = vsel %vm2112_vm4, %v2087_v38, -1e+30  ;;  %v2102_v24 = vsel %vm7037_vm2, %v2064_v49, %v2032_v23  ;;  %v7146_v38 = vmax.f32 %v4011_v13, 0.0  ;;  %v7147_v13 = vmax.f32 %v4045_v35, 0.0 }
 0x195   : > { %v1507_v4 = vsel %vm1504_vm3, %v1445_v12, %v1477_v41  ;;  %v1508_v60 = vsel %vm1504_vm3, %v1447_v3, %v1479_v29  ;;  %v2141_v23 = vsel %vm2113_vm5, %v2102_v24, -1e+30  ;;  %v1523_v49 = vsel %vm1504_vm3, %v1477_v41, %v1445_v12 }
 0x196   : > { %v4622_v43 = vmax.f32 %v7143_v45, %v1507_v4  ;;  %v4626_v1 = vmax.f32 %v7144_v16, %v1508_v60  ;;  %v4646_v4 = vmax.f32 %v7146_v38, %v2142_v59  ;;  %v1524_v58 = vsel %vm1504_vm3, %v1479_v29, %v1447_v3 }
 0x197   : > { %v4662_v24 = vmax.f32 %v7147_v13, %v2141_v23  ;;  %v4666_v59 = vmax.f32 %v7148_v9, %v2143_v28  ;;  %v1548_v12 = vsel %vm7039_vm6, %v1523_v49, -1e+30  ;;  %v1550_v3 = vsel %vm7039_vm6, %v1524_v58, -1e+30 }
 0x198   : > { %v2036_v15 = vpop.permute.xlu0 %2035  ;;  %v2038_v25 = vpop.permute.xlu1 %2037  ;;  %1611 = vrot.lane.b32.xlu0 %v4622_v43, %s3435_s29  ;;  %1613 = vrot.lane.b32.xlu1 %v4626_v1, %s3435_s29  ;;  %v7149_v35 = vmax.f32 %v4072_v22, 0.0  ;;  %v4682_v16 = vmax.f32 %v7151_v34, %v1550_v3  ;;  %v7153_v28 = vmax.f32 %v4104_v14, 0.0  ;;  %v7154_v58 = vmax.f32 %v4108_v55, 0.0 }
 0x199   : > { %v7155_v55 = vmax.f32 %v4085_v50, 0.0 }
 0x19a   : > { %v4678_v45 = vmax.f32 %v7149_v35, %v1548_v12  ;;  %7152 = vst [vmem:[#allocation30_spill] sm:$0xff] %v4682_v16 }
 0x19c   : > { %v1449_v60 = vpop.permute.xlu0 %1448  ;;  %v1451_v57 = vpop.permute.xlu1 %1450  ;;  %2204 = vrot.lane.b32.xlu0 %v4642_v48, %s3436_s30  ;;  %2206 = vrot.lane.b32.xlu1 %v4646_v4, %s3436_s30  ;;  %7150 = vst [vmem:[#allocation4_spill] sm:$0xff] %v4678_v45 }
 0x1a0   : > { %v2068_v41 = vpop.permute.xlu0 %2067  ;;  %v2070_v29 = vpop.permute.xlu1 %2069  ;;  %2236 = vrot.lane.b32.xlu0 %v4662_v24, %s3436_s30  ;;  %2238 = vrot.lane.b32.xlu1 %v4666_v59, %s3436_s30 }
 0x1a1   : > { %v2088_v39 = vsel %vm7037_vm2, %v2036_v15, %v2068_v41  ;;  %v2089_v20 = vsel %vm7037_vm2, %v2038_v25, %v2070_v29  ;;  %v2104_v3 = vsel %vm7037_vm2, %v2068_v41, %v2036_v15  ;;  %v2105_v35 = vsel %vm7037_vm2, %v2070_v29, %v2038_v25 }
 0x1a2   : > { %v2144_v9 = vsel %vm2112_vm4, %v2088_v39, -1e+30  ;;  %v2146_v12 = vsel %vm2112_vm4, %v2089_v20, -1e+30  ;;  %v7156_v20 = vmax.f32 %v4090_v6, 0.0  ;;  %v7157_v6 = vmax.f32 %v4123_v62, 0.0 }
 0x1a3   : > { %v4718_v39 = vmax.f32 %v7155_v55, %v2144_v9  ;;  %v2145_v15 = vsel %vm2113_vm5, %v2104_v3, -1e+30  ;;  %v2147_v25 = vsel %vm2113_vm5, %v2105_v35, -1e+30  ;;  %v7159_v62 = vmax.f32 %v4142_v42, 0.0 }
 0x1a4   : > { %v1481_v38 = vpop.permute.xlu0 %1480  ;;  %v1483_v23 = vpop.permute.xlu1 %1482  ;;  %1643 = vrot.lane.b32.xlu0 %v4678_v45, %s3435_s29  ;;  %1645 = vrot.lane.b32.xlu1 %v4682_v16, %s3435_s29 }
 0x1a5   : > { %v1509_v22 = vsel %vm1504_vm3, %v1449_v60, %v1481_v38  ;;  %v1510_v44 = vsel %vm1504_vm3, %v1451_v57, %v1483_v23  ;;  %v1525_v41 = vsel %vm1504_vm3, %v1481_v38, %v1449_v60  ;;  %v1526_v29 = vsel %vm1504_vm3, %v1483_v23, %v1451_v57 }
 0x1a6   : > { %v4698_v49 = vmax.f32 %v7153_v28, %v1509_v22  ;;  %v4702_v13 = vmax.f32 %v7154_v58, %v1510_v44  ;;  %v4722_v22 = vmax.f32 %v7156_v20, %v2146_v12  ;;  %v4738_v28 = vmax.f32 %v7157_v6, %v2145_v15 }
 0x1a7   : > { %v7158_v58 = vmax.f32 %v4129_v10, 0.0  ;;  %v1552_v60 = vsel %vm7039_vm6, %v1525_v41, -1e+30  ;;  %v1554_v57 = vsel %vm7039_vm6, %v1526_v29, -1e+30  ;;  %v7160_v10 = vmax.f32 %v4145_v32, 0.0 }
 0x1a8   : > { %v2040_v34 = vpop.permute.xlu0 %2039  ;;  %v2042_v14 = vpop.permute.xlu1 %2041  ;;  %1615 = vrot.lane.b32.xlu0 %v4698_v49, %s3435_s29  ;;  %1617 = vrot.lane.b32.xlu1 %v4702_v13, %s3435_s29  ;;  %v4754_v12 = vmax.f32 %v7159_v62, %v1552_v60  ;;  %v7162_v29 = vmax.f32 %v4184_v19, 0.0  ;;  %v7163_v19 = vmax.f32 %v4163_v36, 0.0 }
 0x1a9   : > { %v4742_v9 = vmax.f32 %v7158_v58, %v2147_v25  ;;  %v4758_v3 = vmax.f32 %v7160_v10, %v1554_v57  ;;  %v7161_v25 = vmax.f32 %v4179_v47, 0.0 }
 0x1ac   : > { %v1453_v44 = vpop.permute.xlu0 %1452  ;;  %v1455_v50 = vpop.permute.xlu1 %1454  ;;  %2208 = vrot.lane.b32.xlu0 %v4718_v39, %s3436_s30  ;;  %2210 = vrot.lane.b32.xlu1 %v4722_v22, %s3436_s30 }
 0x1b0   : > { %v2072_v38 = vpop.permute.xlu0 %2071  ;;  %v2074_v23 = vpop.permute.xlu1 %2073  ;;  %2240 = vrot.lane.b32.xlu0 %v4738_v28, %s3436_s30  ;;  %2242 = vrot.lane.b32.xlu1 %v4742_v9, %s3436_s30 }
 0x1b1   : > { %v2090_v35 = vsel %vm7037_vm2, %v2040_v34, %v2072_v38  ;;  %v2091_v55 = vsel %vm7037_vm2, %v2042_v14, %v2074_v23  ;;  %v2106_v57 = vsel %vm7037_vm2, %v2072_v38, %v2040_v34  ;;  %v2107_v62 = vsel %vm7037_vm2, %v2074_v23, %v2042_v14 }
 0x1b2   : > { %v2148_v58 = vsel %vm2112_vm4, %v2090_v35, -1e+30  ;;  %v2150_v60 = vsel %vm2112_vm4, %v2091_v55, -1e+30  ;;  %v7164_v55 = vmax.f32 %v4168_v31, 0.0  ;;  %v7165_v31 = vmax.f32 %v4199_v0, 0.0 }
 0x1b3   : > { %v4794_v35 = vmax.f32 %v7163_v19, %v2148_v58  ;;  %v2149_v34 = vsel %vm2113_vm5, %v2106_v57, -1e+30  ;;  %v2151_v14 = vsel %vm2113_vm5, %v2107_v62, -1e+30  ;;  %v7167_v0 = vmax.f32 %v4217_v26, 0.0 }
 0x1b4   : > { %v1485_v20 = vpop.permute.xlu0 %1484  ;;  %v1487_v15 = vpop.permute.xlu1 %1486  ;;  %1647 = vrot.lane.b32.xlu0 %v4754_v12, %s3435_s29  ;;  %1649 = vrot.lane.b32.xlu1 %v4758_v3, %s3435_s29 }
 0x1b5   : > { %v1511_v42 = vsel %vm1504_vm3, %v1453_v44, %v1485_v20  ;;  %v1512_v32 = vsel %vm1504_vm3, %v1455_v50, %v1487_v15  ;;  %v1527_v38 = vsel %vm1504_vm3, %v1485_v20, %v1453_v44  ;;  %v1528_v23 = vsel %vm1504_vm3, %v1487_v15, %v1455_v50 }
 0x1b6   : > { %v4774_v41 = vmax.f32 %v7161_v25, %v1511_v42  ;;  %v4778_v6 = vmax.f32 %v7162_v29, %v1512_v32  ;;  %v4798_v42 = vmax.f32 %v7164_v55, %v2150_v60  ;;  %v4814_v25 = vmax.f32 %v7165_v31, %v2149_v34 }
 0x1b7   : > { %v7166_v29 = vmax.f32 %v4206_v30, 0.0  ;;  %v1556_v44 = vsel %vm7039_vm6, %v1527_v38, -1e+30  ;;  %v1558_v50 = vsel %vm7039_vm6, %v1528_v23, -1e+30  ;;  %v7168_v30 = vmax.f32 %v4221_v54, 0.0 }
 0x1b8   : > { %v1457_v10 = vpop.permute.xlu0 %1456  ;;  %v1459_v47 = vpop.permute.xlu1 %1458  ;;  %1619 = vrot.lane.b32.xlu0 %v4774_v41, %s3435_s29  ;;  %1621 = vrot.lane.b32.xlu1 %v4778_v6, %s3435_s29  ;;  %v4830_v60 = vmax.f32 %v7167_v0, %v1556_v44  ;;  %v7169_v54 = vmax.f32 %v4241_v27, 0.0  ;;  %v7170_v23 = vmax.f32 %v4244_v37, 0.0  ;;  %v7171_v27 = vmax.f32 %v4255_v63, 0.0 }
 0x1b9   : > { %v4818_v58 = vmax.f32 %v7166_v29, %v2151_v14  ;;  %v4834_v57 = vmax.f32 %v7168_v30, %v1558_v50  ;;  %v7172_v37 = vmax.f32 %v4262_v7, 0.0  ;;  %v7173_v7 = vmax.f32 %v4274_v46, 0.0 }
 0x1ba   : > { %v7175_v46 = vmax.f32 %v4294_v2, 0.0 }
 0x1bc   : > { %v1489_v32 = vpop.permute.xlu0 %1488  ;;  %v1491_v36 = vpop.permute.xlu1 %1490  ;;  %2212 = vrot.lane.b32.xlu0 %v4794_v35, %s3436_s30  ;;  %2214 = vrot.lane.b32.xlu1 %v4798_v42, %s3436_s30 }
 0x1bd   : > { %v1513_v62 = vsel %vm1504_vm3, %v1457_v10, %v1489_v32  ;;  %v1514_v19 = vsel %vm1504_vm3, %v1459_v47, %v1491_v36  ;;  %v1529_v55 = vsel %vm1504_vm3, %v1489_v32, %v1457_v10  ;;  %v1530_v34 = vsel %vm1504_vm3, %v1491_v36, %v1459_v47 }
 0x1be   : > { %v4850_v38 = vmax.f32 %v7169_v54, %v1513_v62  ;;  %v4854_v31 = vmax.f32 %v7170_v23, %v1514_v19  ;;  %v1560_v10 = vsel %vm7039_vm6, %v1529_v55, -1e+30  ;;  %v1562_v47 = vsel %vm7039_vm6, %v1530_v34, -1e+30 }
 0x1bf   : > { %v4866_v29 = vmax.f32 %v7171_v27, %v1560_v10  ;;  %v4870_v44 = vmax.f32 %v7172_v37, %v1562_v47  ;;  %v7174_v34 = vmax.f32 %v4280_v61, 0.0  ;;  %v7176_v61 = vmax.f32 %v4298_v5, 0.0  ;;  %v7177_v5 = vld [vmem:[#allocation32_spill] sm:$0xff] }
 0x1c0   : > { %v1461_v20 = vpop.permute.xlu0 %1460  ;;  %v1463_v15 = vpop.permute.xlu1 %1462  ;;  %2244 = vrot.lane.b32.xlu0 %v4814_v25, %s3436_s30  ;;  %2246 = vrot.lane.b32.xlu1 %v4818_v58, %s3436_s30 }
 0x1c4   : > { %v1493_v14 = vpop.permute.xlu0 %1492  ;;  %v1495_v26 = vpop.permute.xlu1 %1494  ;;  %1651 = vrot.lane.b32.xlu0 %v4830_v60, %s3435_s29  ;;  %1653 = vrot.lane.b32.xlu1 %v4834_v57, %s3435_s29 }
 0x1c5   : > { %v1515_v50 = vsel %vm1504_vm3, %v1461_v20, %v1493_v14  ;;  %v1516_v0 = vsel %vm1504_vm3, %v1463_v15, %v1495_v26  ;;  %v1531_v30 = vsel %vm1504_vm3, %v1493_v14, %v1461_v20  ;;  %v1532_v62 = vsel %vm1504_vm3, %v1495_v26, %v1463_v15 }
 0x1c6   : > { %v4886_v55 = vmax.f32 %v7173_v7, %v1515_v50  ;;  %v4890_v54 = vmax.f32 %v7174_v34, %v1516_v0  ;;  %v1564_v20 = vsel %vm7039_vm6, %v1531_v30, -1e+30  ;;  %v1566_v15 = vsel %vm7039_vm6, %v1532_v62, -1e+30 }
 0x1c7   : > { %v4902_v23 = vmax.f32 %v7175_v46, %v1564_v20  ;;  %v4906_v10 = vmax.f32 %v7176_v61, %v1566_v15  ;;  %v7178_v30 = vmax.f32 %v7177_v5, 0.0  ;;  %v7179_v7 = vmax.f32 %v4316_v53, 0.0  ;;  %v7180_v20 = vld [vmem:[#allocation31_spill] sm:$0xff] }
 0x1c8   : > { %v1465_v32 = vpop.permute.xlu0 %1464  ;;  %v1467_v36 = vpop.permute.xlu1 %1466  ;;  %1623 = vrot.lane.b32.xlu0 %v4850_v38, %s3435_s29  ;;  %1625 = vrot.lane.b32.xlu1 %v4854_v31, %s3435_s29  ;;  %v7181_v15 = vmax.f32 %v7180_v20, 0.0  ;;  %v7182_v53 = vmax.f32 %v4332_v21, 0.0  ;;  %v7183_v21 = vld [vmem:[#allocation27_spill] sm:$0xff] }
 0x1cc   : > { %v1497_v19 = vpop.permute.xlu0 %1496  ;;  %v1499_v63 = vpop.permute.xlu1 %1498  ;;  %1655 = vrot.lane.b32.xlu0 %v4866_v29, %s3435_s29  ;;  %1657 = vrot.lane.b32.xlu1 %v4870_v44, %s3435_s29 }
 0x1cd   : > { %v1517_v47 = vsel %vm1504_vm3, %v1465_v32, %v1497_v19  ;;  %v1518_v27 = vsel %vm1504_vm3, %v1467_v36, %v1499_v63  ;;  %v1533_v37 = vsel %vm1504_vm3, %v1497_v19, %v1465_v32  ;;  %v1534_v50 = vsel %vm1504_vm3, %v1499_v63, %v1467_v36 }
 0x1ce   : > { %v4922_v62 = vmax.f32 %v7178_v30, %v1517_v47  ;;  %v4926_v34 = vmax.f32 %v7179_v7, %v1518_v27  ;;  %v1568_v32 = vsel %vm7039_vm6, %v1533_v37, -1e+30  ;;  %v1570_v36 = vsel %vm7039_vm6, %v1534_v50, -1e+30 }
 0x1cf   : > { %v4938_v46 = vmax.f32 %v7181_v15, %v1568_v32  ;;  %v4942_v61 = vmax.f32 %v7182_v53, %v1570_v36  ;;  %v7184_v7 = vmax.f32 %v7183_v21, 0.0  ;;  %v7185_v36 = vld [vmem:[#allocation26_spill] sm:$0xff] }
 0x1d0   : > { %v1469_v14 = vpop.permute.xlu0 %1468  ;;  %v1471_v26 = vpop.permute.xlu1 %1470  ;;  %1627 = vrot.lane.b32.xlu0 %v4886_v55, %s3435_s29  ;;  %1629 = vrot.lane.b32.xlu1 %v4890_v54, %s3435_s29  ;;  %v7186_v20 = vmax.f32 %v7185_v36, 0.0 }
 0x1d4   : > { %v1501_v0 = vpop.permute.xlu0 %1500  ;;  %v1503_v2 = vpop.permute.xlu1 %1502  ;;  %1659 = vrot.lane.b32.xlu0 %v4902_v23, %s3435_s29  ;;  %1661 = vrot.lane.b32.xlu1 %v4906_v10, %s3435_s29 }
 0x1d5   : > { %v1519_v47 = vsel %vm1504_vm3, %v1469_v14, %v1501_v0  ;;  %v1520_v27 = vsel %vm1504_vm3, %v1471_v26, %v1503_v2  ;;  %v1535_v37 = vsel %vm1504_vm3, %v1501_v0, %v1469_v14  ;;  %v1536_v50 = vsel %vm1504_vm3, %v1503_v2, %v1471_v26 }
 0x1d6   : > { %v4958_v32 = vmax.f32 %v7184_v7, %v1519_v47  ;;  %v4962_v15 = vmax.f32 %v7186_v20, %v1520_v27  ;;  %v1572_v14 = vsel %vm7039_vm6, %v1535_v37, -1e+30  ;;  %v1574_v26 = vsel %vm7039_vm6, %v1536_v50, -1e+30  ;;  %v7188_v47 = vld [vmem:[#allocation29_spill] sm:$0xff] }
 0x1d7   : > { %v7189_v27 = vmax.f32 %v7188_v47, 0.0  ;;  %v7191_v50 = vmax.f32 %v4370_v17, 0.0  ;;  %v7193_v17 = vld [vmem:[#allocation28_spill] sm:$0xff] }
 0x1d8   : > { %v2012_v19 = vpop.permute.xlu0 %2011  ;;  %v2014_v63 = vpop.permute.xlu1 %2013  ;;  %1631 = vrot.lane.b32.xlu0 %v4922_v62, %s3435_s29  ;;  %1633 = vrot.lane.b32.xlu1 %v4926_v34, %s3435_s29  ;;  %7187 = vst [vmem:[#allocation33_spill] sm:$0xff] %v4962_v15 }
 0x1d9   : > { %v4978_v37 = vmax.f32 %v7189_v27, %v1572_v14  ;;  %v4982_v7 = vmax.f32 %v7191_v50, %v1574_v26  ;;  %v7194_v14 = vmax.f32 %v7193_v17, 0.0 }
 0x1db   : > { %7190 = vst [vmem:[#allocation34_spill] sm:$0xff] %v4978_v37  ;;  %7192 = vst [vmem:[#allocation32_spill] sm:$0xff] %v4982_v7 }
 0x1dc   : > { %v2044_v5 = vpop.permute.xlu0 %2043  ;;  %v2046_v30 = vpop.permute.xlu1 %2045  ;;  %1663 = vrot.lane.b32.xlu0 %v4938_v46, %s3435_s29  ;;  %1665 = vrot.lane.b32.xlu1 %v4942_v61, %s3435_s29 }
 0x1dd   : > { %v2076_v0 = vsel %vm7037_vm2, %v2012_v19, %v2044_v5  ;;  %v2077_v2 = vsel %vm7037_vm2, %v2014_v63, %v2046_v30  ;;  %v2092_v16 = vsel %vm7037_vm2, %v2044_v5, %v2012_v19  ;;  %v2093_v45 = vsel %vm7037_vm2, %v2046_v30, %v2014_v63 }
 0x1de   : > { %v2120_v36 = vsel %vm2112_vm4, %v2076_v0, -1e+30  ;;  %v2122_v20 = vsel %vm2112_vm4, %v2077_v2, -1e+30  ;;  %v7196_v0 = vld [vmem:[#allocation23_spill] sm:$0xff] }
 0x1df   : > { %v4998_v26 = vmax.f32 %v7194_v14, %v2120_v36  ;;  %v7197_v2 = vmax.f32 %v7196_v0, 0.0  ;;  %v2121_v19 = vsel %vm2113_vm5, %v2092_v16, -1e+30  ;;  %v2123_v63 = vsel %vm2113_vm5, %v2093_v45, -1e+30  ;;  %v7199_v36 = vld [vmem:[#allocation22_spill] sm:$0xff] }
 0x1e0   : > { %v2016_v53 = vpop.permute.xlu0 %2015  ;;  %v2018_v21 = vpop.permute.xlu1 %2017  ;;  %1635 = vrot.lane.b32.xlu0 %v4958_v32, %s3435_s29  ;;  %1637 = vrot.lane.b32.xlu1 %v4962_v15, %s3435_s29  ;;  %v7201_v14 = vld [vmem:[#allocation25_spill] sm:$0xff] }
 0x1e1   : > { %7195 = vst [vmem:[#allocation31_spill] sm:$0xff] %v4998_v26  ;;  %v5002_v27 = vmax.f32 %v7197_v2, %v2122_v20  ;;  %v7200_v20 = vmax.f32 %v7199_v36, 0.0  ;;  %v7202_v45 = vmax.f32 %v7201_v14, 0.0 }
 0x1e3   : > { %7198 = vst [vmem:[#allocation27_spill] sm:$0xff] %v5002_v27  ;;  %v5018_v16 = vmax.f32 %v7200_v20, %v2121_v19  ;;  %v5022_v0 = vmax.f32 %v7202_v45, %v2123_v63  ;;  %v7204_v19 = vld [vmem:[#allocation24_spill] sm:$0xff]  ;;  %v7207_v20 = vld [vmem:[#allocation19_spill] sm:$0xff] }
 0x1e4   : > { %v2048_v15 = vpop.permute.xlu0 %2047  ;;  %v2050_v47 = vpop.permute.xlu1 %2049  ;;  %1667 = vrot.lane.b32.xlu0 %v4978_v37, %s3435_s29  ;;  %1669 = vrot.lane.b32.xlu1 %v4982_v7, %s3435_s29  ;;  %v7205_v63 = vmax.f32 %v7204_v19, 0.0 }
 0x1e5   : > { %v2078_v5 = vsel %vm7037_vm2, %v2016_v53, %v2048_v15  ;;  %v2079_v30 = vsel %vm7037_vm2, %v2018_v21, %v2050_v47  ;;  %7203 = vst [vmem:[#allocation26_spill] sm:$0xff] %v5022_v0 }
 0x1e6   : > { %v2124_v2 = vsel %vm2112_vm4, %v2078_v5, -1e+30  ;;  %v2126_v7 = vsel %vm2112_vm4, %v2079_v30, -1e+30  ;;  %v7208_v30 = vmax.f32 %v7207_v20, 0.0 }
 0x1e7   : > { %v5038_v5 = vmax.f32 %v7205_v63, %v2124_v2  ;;  %v7212_v63 = vld [vmem:[#allocation21_spill] sm:$0xff] }
 0x1e8   : > { %v2020_v50 = vpop.permute.xlu0 %2019  ;;  %v2022_v17 = vpop.permute.xlu1 %2021  ;;  %2184 = vrot.lane.b32.xlu0 %v4998_v26, %s3436_s30  ;;  %2186 = vrot.lane.b32.xlu1 %v5002_v27, %s3436_s30  ;;  %v2094_v26 = vsel %vm7037_vm2, %v2048_v15, %v2016_v53  ;;  %v2095_v27 = vsel %vm7037_vm2, %v2050_v47, %v2018_v21  ;;  %v5042_v14 = vmax.f32 %v7208_v30, %v2126_v7  ;;  %v7210_v7 = vld [vmem:[#allocation18_spill] sm:$0xff] }
 0x1e9   : > { %7206 = vst [vmem:[#allocation29_spill] sm:$0xff] %v5038_v5  ;;  %v2125_v15 = vsel %vm2113_vm5, %v2094_v26, -1e+30  ;;  %v2127_v53 = vsel %vm2113_vm5, %v2095_v27, -1e+30  ;;  %v7211_v19 = vmax.f32 %v7210_v7, 0.0 }
 0x1ea   : > { %7209 = vst [vmem:[#allocation28_spill] sm:$0xff] %v5042_v14  ;;  %v7213_v27 = vmax.f32 %v7212_v63, 0.0  ;;  %v7215_v7 = vld [vmem:[#allocation20_spill] sm:$0xff]  ;;  %v7218_v63 = vld [vmem:[#allocation15_spill] sm:$0xff] }
 0x1eb   : > { %v5058_v26 = vmax.f32 %v7211_v19, %v2125_v15  ;;  %v7216_v19 = vmax.f32 %v7215_v7, 0.0 }
 0x1ec   : > { %v2052_v37 = vpop.permute.xlu0 %2051  ;;  %v2054_v36 = vpop.permute.xlu1 %2053  ;;  %2216 = vrot.lane.b32.xlu0 %v5018_v16, %s3436_s30  ;;  %2218 = vrot.lane.b32.xlu1 %v5022_v0, %s3436_s30  ;;  %v5062_v20 = vmax.f32 %v7213_v27, %v2127_v53 }
 0x1ed   : > { %v2080_v21 = vsel %vm7037_vm2, %v2020_v50, %v2052_v37  ;;  %v2081_v47 = vsel %vm7037_vm2, %v2022_v17, %v2054_v36 }
 0x1ee   : > { %7214 = vst [vmem:[#allocation23_spill] sm:$0xff] %v5062_v20  ;;  %v2128_v30 = vsel %vm2112_vm4, %v2080_v21, -1e+30  ;;  %v2130_v0 = vsel %vm2112_vm4, %v2081_v47, -1e+30  ;;  %v7219_v47 = vmax.f32 %v7218_v63, 0.0 }
 0x1ef   : > { %v5078_v21 = vmax.f32 %v7216_v19, %v2128_v30 }
 0x1f0   : > { %v2024_v45 = vpop.permute.xlu0 %2023  ;;  %2188 = vrot.lane.b32.xlu0 %v5038_v5, %s3436_s30  ;;  %v2026_v2 = vpop.permute.xlu1 %2025  ;;  %2190 = vrot.lane.b32.xlu1 %v5042_v14, %s3436_s30  ;;  %v2096_v5 = vsel %vm7037_vm2, %v2052_v37, %v2020_v50  ;;  %v2097_v14 = vsel %vm7037_vm2, %v2054_v36, %v2022_v17  ;;  %v5082_v27 = vmax.f32 %v7219_v47, %v2130_v0  ;;  %v7221_v0 = vld [vmem:[#allocation14_spill] sm:$0xff] }
 0x1f1   : > { %7217 = vst [vmem:[#allocation22_spill] sm:$0xff] %v5078_v21  ;;  %v2129_v37 = vsel %vm2113_vm5, %v2096_v5, -1e+30  ;;  %v2131_v50 = vsel %vm2113_vm5, %v2097_v14, -1e+30  ;;  %v7222_v30 = vmax.f32 %v7221_v0, 0.0 }
 0x1f2   : > { %7220 = vst [vmem:[#allocation25_spill] sm:$0xff] %v5082_v27  ;;  %v7223_v5 = vld [vmem:[#allocation17_spill] sm:$0xff] }
 0x1f3   : > { %v5098_v7 = vmax.f32 %v7222_v30, %v2129_v37  ;;  %v7224_v19 = vmax.f32 %v7223_v5, 0.0  ;;  %v7228_v30 = vld [vmem:[#allocation16_spill] sm:$0xff] }
 0x1f4   : > { %2220 = vrot.lane.b32.xlu0 %v5058_v26, %s3436_s30  ;;  %2222 = vrot.lane.b32.xlu1 %v5062_v20, %s3436_s30  ;;  %v2056_v15 = vpop.permute.xlu0 %2055  ;;  %v2058_v53 = vpop.permute.xlu1 %2057 }
 0x1f5   : > { %v2082_v17 = vsel %vm7037_vm2, %v2024_v45, %v2056_v15  ;;  %v2083_v36 = vsel %vm7037_vm2, %v2026_v2, %v2058_v53  ;;  %v5102_v63 = vmax.f32 %v7224_v19, %v2131_v50  ;;  %v2099_v37 = vsel %vm7037_vm2, %v2058_v53, %v2026_v2  ;;  %v7227_v50 = vld [vmem:[#allocation10_spill] sm:$0xff] }
 0x1f6   : > { %v2132_v20 = vsel %vm2112_vm4, %v2082_v17, -1e+30  ;;  %v5121_v0 = vadd.s32 2, %v7227_v50  ;;  %v7229_v17 = vmax.f32 %v7228_v30, 0.0  ;;  %v2135_v53 = vsel %vm2113_vm5, %v2099_v37, -1e+30 }
 0x1f8   : > { %2192 = vrot.lane.b32.xlu0 %v5078_v21, %s3436_s30  ;;  %2194 = vrot.lane.b32.xlu1 %v5082_v27, %s3436_s30  ;;  %v2134_v21 = vsel %vm2112_vm4, %v2083_v36, -1e+30  ;;  %v2098_v27 = vsel %vm7037_vm2, %v2056_v15, %v2024_v45  ;;  %v5125_v5 = vmax.f32 %v7229_v17, %v2132_v20  ;;  %v7230_v36 = vld [vmem:[#allocation11_spill] sm:$0xff]  ;;  %vm2285_vm8 = vcmp.lt.s32.totalorder %v5121_v0, 16  ;;  %v7233_v20 = vld [vmem:[#allocation13_spill] sm:$0xff] }
 0x1f9   : > { %v7231_v19 = vmax.f32 %v7230_v36, 0.0  ;;  %v2133_v2 = vsel %vm2113_vm5, %v2098_v27, -1e+30  ;;  %v7235_v27 = vld [vmem:[#allocation12_spill] sm:$0xff] }
 0x1fa   : > { %v5104_v14 = vpop.permute.xlu0 %1607  ;;  %v5106_v47 = vpop.permute.xlu1 %1609  ;;  %v7236_v17 = vmax.f32 %v7235_v27, 0.0 }
 0x1fb   : > { %7225 = vst [vmem:[#allocation24_spill] sm:$0xff] %v5104_v14  ;;  %7226 = vst [vmem:[#allocation19_spill] sm:$0xff] %v5106_v47  ;;  %v5129_v51 = vmax.f32 %v7231_v19, %v2134_v21  ;;  %v7232_v47 = vld [vmem:[#allocation7_spill] sm:$0xff]  ;;  %v7234_v21 = vmax.f32 %v7233_v20, 0.0 }
 0x1fc   : > { %2224 = vrot.lane.b32.xlu0 %v5098_v7, %s3436_s30  ;;  %2226 = vrot.lane.b32.xlu1 %v5102_v63, %s3436_s30  ;;  %v5136_v14 = vadd.s32 2, %v7232_v47  ;;  %v5150_v37 = vmax.f32 %v7236_v17, %v2135_v53 }
 0x1fd   : > { %v5146_v30 = vmax.f32 %v7234_v21, %v2133_v2 }
 0x1fe   : > { %v2201_v45 = vpop.permute.xlu0 %2200  ;;  %v2203_v15 = vpop.permute.xlu1 %2202  ;;  %7237 = vst [vmem:[#allocation18_spill] sm:$0xff] %v5150_v37  ;;  %vm2286_vm9 = vcmp.lt.s32.totalorder %v5136_v14, 16 }
 0x200   : > { %2196 = vrot.lane.b32.xlu0 %v5125_v5, %s3436_s30  ;;  %2198 = vrot.lane.b32.xlu1 %v5129_v51, %s3436_s30 }
 0x202   : > { %v2233_v36 = vpop.permute.xlu0 %2232  ;;  %v2235_v19 = vpop.permute.xlu1 %2234 }
 0x203   : > { %v2257_v56 = vsel %vm2248_vm7, %v2201_v45, %v2233_v36  ;;  %v2258_v47 = vsel %vm2248_vm7, %v2203_v15, %v2235_v19  ;;  %v2273_v50 = vsel %vm2248_vm7, %v2233_v36, %v2201_v45  ;;  %v2274_v53 = vsel %vm2248_vm7, %v2235_v19, %v2203_v15 }
 0x204   : > { %v2309_v2 = vsel %vm2285_vm8, %v2257_v56, -1e+30  ;;  %v2311_v20 = vsel %vm2285_vm8, %v2258_v47, -1e+30  ;;  %2228 = vrot.lane.b32.xlu0 %v5146_v30, %s3436_s30  ;;  %2230 = vrot.lane.b32.xlu1 %v5150_v37, %s3436_s30  ;;  %v2310_v15 = vsel %vm2286_vm9, %v2273_v50, -1e+30 }
 0x205   : > { %v5170_v21 = vmax.f32 %v4565_v8, %v2309_v2  ;;  %v5173_v45 = vmax.f32 %v4569_v33, %v2311_v20  ;;  %v2312_v47 = vsel %vm2286_vm9, %v2274_v53, -1e+30  ;;  %v5188_v33 = vmax.f32 %v4586_v11, %v2310_v15  ;;  %v7276_v14 = vld [vmem:[#allocation18_spill] sm:$0xff] }
 0x206   : > { %v5175_v27 = vpop.permute.xlu0 %1639  ;;  %v5177_v56 = vpop.permute.xlu1 %1641  ;;  %v5191_v8 = vmax.f32 %v4590_v52, %v2312_v47 }
 0x207   : > { %7238 = vst [vmem:[#allocation21_spill] sm:$0xff] %v5170_v21  ;;  %7239 = vst [vmem:[#allocation20_spill] sm:$0xff] %v5173_v45 }
 0x208   : > { %7240 = vst [vmem:[#allocation15_spill] sm:$0xff] %v5175_v27  ;;  %7241 = vst [vmem:[#allocation14_spill] sm:$0xff] %v5177_v56  ;;  %2373 = vrot.lane.b32.xlu0 %v5170_v21, %s3437_s13  ;;  %2375 = vrot.lane.b32.xlu1 %v5173_v45, %s3437_s13 }
 0x209   : > { %7242 = vst [vmem:[#allocation17_spill] sm:$0xff] %v5188_v33  ;;  %7243 = vst [vmem:[#allocation16_spill] sm:$0xff] %v5191_v8 }
 0x20a   : > { %v5193_v17 = vpop.permute.xlu0 %1611  ;;  %v5195_v36 = vpop.permute.xlu1 %1613 }
 0x20c   : > { %2405 = vrot.lane.b32.xlu0 %v5188_v33, %s3437_s13  ;;  %2407 = vrot.lane.b32.xlu1 %v5191_v8, %s3437_s13 }
 0x20e   : > { %v2205_v50 = vpop.permute.xlu0 %2204  ;;  %v2207_v19 = vpop.permute.xlu1 %2206 }
 0x212   : > { %v2237_v2 = vpop.permute.xlu0 %2236  ;;  %v2239_v53 = vpop.permute.xlu1 %2238 }
 0x213   : > { %v2259_v11 = vsel %vm2248_vm7, %v2205_v50, %v2237_v2  ;;  %v2260_v52 = vsel %vm2248_vm7, %v2207_v19, %v2239_v53  ;;  %v2275_v27 = vsel %vm2248_vm7, %v2237_v2, %v2205_v50  ;;  %v2276_v37 = vsel %vm2248_vm7, %v2239_v53, %v2207_v19 }
 0x214   : > { %v2313_v21 = vsel %vm2285_vm8, %v2259_v11, -1e+30  ;;  %v2315_v56 = vsel %vm2285_vm8, %v2260_v52, -1e+30  ;;  %v2314_v50 = vsel %vm2286_vm9, %v2275_v27, -1e+30 }
 0x215   : > { %v5240_v11 = vmax.f32 %v4646_v4, %v2315_v56  ;;  %v2316_v19 = vsel %vm2286_vm9, %v2276_v37, -1e+30 }
 0x216   : > { %v5206_v20 = vpop.permute.xlu0 %1643  ;;  %v5208_v15 = vpop.permute.xlu1 %1645  ;;  %v5254_v4 = vmax.f32 %v4666_v59, %v2316_v19 }
 0x217   : > { %v1674_v47 = vsel %vm1671_vm10, %v5193_v17, %v5206_v20  ;;  %v1675_v8 = vsel %vm1671_vm10, %v5195_v36, %v5208_v15 }
 0x218   : > { %v5219_v33 = vmax.f32 %v4622_v43, %v1674_v47  ;;  %v5222_v45 = vmax.f32 %v4626_v1, %v1675_v8  ;;  %v5237_v8 = vmax.f32 %v4642_v48, %v2313_v21  ;;  %v5251_v48 = vmax.f32 %v4662_v24, %v2314_v50  ;;  %7247 = vst [vmem:[#allocation35_spill] sm:$0xff] %v5254_v4 }
 0x21a   : > { %7244 = vst [vmem:[#allocation11_spill] sm:$0xff] %v5219_v33  ;;  %7245 = vst [vmem:[#allocation13_spill] sm:$0xff] %v5222_v45  ;;  %1778 = vrot.lane.b32.xlu0 %v5219_v33, %s3438_s14  ;;  %v1616_v43 = vpop.permute.xlu0 %1615  ;;  %1780 = vrot.lane.b32.xlu1 %v5222_v45, %s3438_s14  ;;  %v1618_v1 = vpop.permute.xlu1 %1617 }
 0x21b   : > { %7246 = vst [vmem:[#allocation12_spill] sm:$0xff] %v5251_v48 }
 0x21e   : > { %2377 = vrot.lane.b32.xlu0 %v5237_v8, %s3437_s13  ;;  %v2209_v2 = vpop.permute.xlu0 %2208  ;;  %2379 = vrot.lane.b32.xlu1 %v5240_v11, %s3437_s13  ;;  %v2211_v53 = vpop.permute.xlu1 %2210 }
 0x222   : > { %2409 = vrot.lane.b32.xlu0 %v5251_v48, %s3437_s13  ;;  %v2241_v21 = vpop.permute.xlu0 %2240  ;;  %2411 = vrot.lane.b32.xlu1 %v5254_v4, %s3437_s13  ;;  %v2243_v37 = vpop.permute.xlu1 %2242 }
 0x223   : > { %v2261_v27 = vsel %vm2248_vm7, %v2209_v2, %v2241_v21  ;;  %v2262_v56 = vsel %vm2248_vm7, %v2211_v53, %v2243_v37  ;;  %v2277_v4 = vsel %vm2248_vm7, %v2241_v21, %v2209_v2  ;;  %v2278_v48 = vsel %vm2248_vm7, %v2243_v37, %v2211_v53 }
 0x224   : > { %v2317_v45 = vsel %vm2285_vm8, %v2261_v27, -1e+30  ;;  %v2319_v33 = vsel %vm2285_vm8, %v2262_v56, -1e+30  ;;  %v2318_v2 = vsel %vm2286_vm9, %v2277_v4, -1e+30 }
 0x225   : > { %v5290_v27 = vmax.f32 %v4722_v22, %v2319_v33  ;;  %v2320_v53 = vsel %vm2286_vm9, %v2278_v48, -1e+30 }
 0x226   : > { %v1648_v52 = vpop.permute.xlu0 %1647  ;;  %v1650_v24 = vpop.permute.xlu1 %1649  ;;  %v5309_v33 = vmax.f32 %v4742_v9, %v2320_v53 }
 0x227   : > { %v1676_v59 = vsel %vm1671_vm10, %v1616_v43, %v1648_v52  ;;  %v1677_v47 = vsel %vm1671_vm10, %v1618_v1, %v1650_v24  ;;  %v1692_v21 = vsel %vm1671_vm10, %v1648_v52, %v1616_v43  ;;  %v1693_v37 = vsel %vm1671_vm10, %v1650_v24, %v1618_v1 }
 0x228   : > { %v5269_v50 = vmax.f32 %v4698_v49, %v1676_v59  ;;  %v5272_v19 = vmax.f32 %v4702_v13, %v1677_v47  ;;  %v5287_v59 = vmax.f32 %v4718_v39, %v2317_v45  ;;  %v5306_v45 = vmax.f32 %v4738_v28, %v2318_v2 }
 0x229   : > { %v1719_v43 = vsel %vm1705_vm11, %v1692_v21, -1e+30  ;;  %v1721_v1 = vsel %vm1705_vm11, %v1693_v37, -1e+30 }
 0x22a   : > { %7248 = vst [vmem:[#allocation36_spill] sm:$0xff] %v5269_v50  ;;  %7249 = vst [vmem:[#allocation37_spill] sm:$0xff] %v5272_v19  ;;  %1782 = vrot.lane.b32.xlu0 %v5269_v50, %s3438_s14  ;;  %v1620_v49 = vpop.permute.xlu0 %1619  ;;  %1784 = vrot.lane.b32.xlu1 %v5272_v19, %s3438_s14  ;;  %v1622_v13 = vpop.permute.xlu1 %1621  ;;  %v5320_v28 = vmax.f32 %v4754_v12, %v1719_v43  ;;  %v5323_v9 = vmax.f32 %v4758_v3, %v1721_v1 }
 0x22c   : > { %7250 = vst [vmem:[#allocation38_spill] sm:$0xff] %v5320_v28  ;;  %7251 = vst [vmem:[#allocation39_spill] sm:$0xff] %v5323_v9 }
 0x22e   : > { %2381 = vrot.lane.b32.xlu0 %v5287_v59, %s3437_s13  ;;  %v2213_v39 = vpop.permute.xlu0 %2212  ;;  %2383 = vrot.lane.b32.xlu1 %v5290_v27, %s3437_s13  ;;  %v2215_v22 = vpop.permute.xlu1 %2214 }
 0x232   : > { %2413 = vrot.lane.b32.xlu0 %v5306_v45, %s3437_s13  ;;  %v2245_v48 = vpop.permute.xlu0 %2244  ;;  %2415 = vrot.lane.b32.xlu1 %v5309_v33, %s3437_s13  ;;  %v2247_v4 = vpop.permute.xlu1 %2246 }
 0x233   : > { %v2263_v56 = vsel %vm2248_vm7, %v2213_v39, %v2245_v48  ;;  %v2264_v52 = vsel %vm2248_vm7, %v2215_v22, %v2247_v4  ;;  %v2279_v43 = vsel %vm2248_vm7, %v2245_v48, %v2213_v39  ;;  %v2280_v1 = vsel %vm2248_vm7, %v2247_v4, %v2215_v22 }
 0x234   : > { %v2321_v21 = vsel %vm2285_vm8, %v2263_v56, -1e+30  ;;  %v2323_v37 = vsel %vm2285_vm8, %v2264_v52, -1e+30  ;;  %v2322_v39 = vsel %vm2286_vm9, %v2279_v43, -1e+30 }
 0x235   : > { %v5359_v56 = vmax.f32 %v4798_v42, %v2323_v37  ;;  %v2324_v22 = vsel %vm2286_vm9, %v2280_v1, -1e+30  ;;  %v5374_v52 = vmax.f32 %v4814_v25, %v2322_v39 }
 0x236   : > { %1814 = vrot.lane.b32.xlu0 %v5320_v28, %s3438_s14  ;;  %v1652_v24 = vpop.permute.xlu0 %1651  ;;  %1816 = vrot.lane.b32.xlu1 %v5323_v9, %s3438_s14  ;;  %v1654_v47 = vpop.permute.xlu1 %1653 }
 0x237   : > { %v1678_v12 = vsel %vm1671_vm10, %v1620_v49, %v1652_v24  ;;  %v1679_v3 = vsel %vm1671_vm10, %v1622_v13, %v1654_v47  ;;  %v1694_v48 = vsel %vm1671_vm10, %v1652_v24, %v1620_v49  ;;  %v1695_v4 = vsel %vm1671_vm10, %v1654_v47, %v1622_v13 }
 0x238   : > { %v5338_v2 = vmax.f32 %v4774_v41, %v1678_v12  ;;  %v5341_v53 = vmax.f32 %v4778_v6, %v1679_v3  ;;  %v5356_v12 = vmax.f32 %v4794_v35, %v2321_v21  ;;  %v5377_v3 = vmax.f32 %v4818_v58, %v2324_v22 }
 0x239   : > { %v1723_v49 = vsel %vm1705_vm11, %v1694_v48, -1e+30  ;;  %v1725_v13 = vsel %vm1705_vm11, %v1695_v4, -1e+30 }
 0x23a   : > { %7252 = vst [vmem:[#allocation40_spill] sm:$0xff] %v5338_v2  ;;  %7253 = vst [vmem:[#allocation41_spill] sm:$0xff] %v5341_v53  ;;  %1786 = vrot.lane.b32.xlu0 %v5338_v2, %s3438_s14  ;;  %v1624_v41 = vpop.permute.xlu0 %1623  ;;  %1788 = vrot.lane.b32.xlu1 %v5341_v53, %s3438_s14  ;;  %v1626_v6 = vpop.permute.xlu1 %1625  ;;  %v5388_v25 = vmax.f32 %v4830_v60, %v1723_v49  ;;  %v5391_v58 = vmax.f32 %v4834_v57, %v1725_v13  ;;  %v3417_v49 = vld [vmem:[%s6816_s1 + $0x80] ss:$0 sps:$4 sm:$0x33]  }
 0x23b   : > { %3348 = vmatmul.mubr.msk.bf16.gmra.mxu1 %vm588_vm1, %v3417_v49  ;;  %vm1872_vm1 = vcmp.lt.s32.totalorder %v4495_v40, 192 }
 0x23c   : > { %7254 = vst [vmem:[#allocation42_spill] sm:$0xff] %v5388_v25  ;;  %7255 = vst [vmem:[#allocation43_spill] sm:$0xff] %v5391_v58 }
 0x23e   : > { %2385 = vrot.lane.b32.xlu0 %v5356_v12, %s3437_s13  ;;  %v1656_v35 = vpop.permute.xlu0 %1655  ;;  %2387 = vrot.lane.b32.xlu1 %v5359_v56, %s3437_s13  ;;  %v1658_v42 = vpop.permute.xlu1 %1657 }
 0x23f   : > { %v1680_v21 = vsel %vm1671_vm10, %v1624_v41, %v1656_v35  ;;  %v1681_v37 = vsel %vm1671_vm10, %v1626_v6, %v1658_v42  ;;  %v1696_v43 = vsel %vm1671_vm10, %v1656_v35, %v1624_v41  ;;  %v1697_v1 = vsel %vm1671_vm10, %v1658_v42, %v1626_v6 }
 0x240   : > { %v5406_v39 = vmax.f32 %v4850_v38, %v1680_v21  ;;  %v5409_v22 = vmax.f32 %v4854_v31, %v1681_v37  ;;  %v1727_v41 = vsel %vm1705_vm11, %v1696_v43, -1e+30  ;;  %v1729_v6 = vsel %vm1705_vm11, %v1697_v1, -1e+30 }
 0x241   : > { %v5420_v38 = vmax.f32 %v4866_v29, %v1727_v41  ;;  %v5423_v31 = vmax.f32 %v4870_v44, %v1729_v6 }
 0x242   : > { %2417 = vrot.lane.b32.xlu0 %v5374_v52, %s3437_s13  ;;  %v1628_v24 = vpop.permute.xlu0 %1627  ;;  %2419 = vrot.lane.b32.xlu1 %v5377_v3, %s3437_s13  ;;  %v1630_v47 = vpop.permute.xlu1 %1629  ;;  %7256 = vst [vmem:[#allocation44_spill] sm:$0xff] %v5406_v39  ;;  %7257 = vst [vmem:[#allocation45_spill] sm:$0xff] %v5409_v22 }
 0x243   : > { %7258 = vst [vmem:[#allocation46_spill] sm:$0xff] %v5420_v38  ;;  %7259 = vst [vmem:[#allocation47_spill] sm:$0xff] %v5423_v31 }
 0x246   : > { %1818 = vrot.lane.b32.xlu0 %v5388_v25, %s3438_s14  ;;  %v1660_v60 = vpop.permute.xlu0 %1659  ;;  %1820 = vrot.lane.b32.xlu1 %v5391_v58, %s3438_s14  ;;  %v1662_v57 = vpop.permute.xlu1 %1661 }
 0x247   : > { %v1682_v35 = vsel %vm1671_vm10, %v1628_v24, %v1660_v60  ;;  %v1683_v42 = vsel %vm1671_vm10, %v1630_v47, %v1662_v57  ;;  %v1698_v13 = vsel %vm1671_vm10, %v1660_v60, %v1628_v24  ;;  %v1699_v29 = vsel %vm1671_vm10, %v1662_v57, %v1630_v47 }
 0x248   : > { %v5442_v37 = vmax.f32 %v4886_v55, %v1682_v35  ;;  %v5445_v43 = vmax.f32 %v4890_v54, %v1683_v42  ;;  %v7262_v24 = vmov 0   ;;  %v1731_v47 = vsel %vm1705_vm11, %v1698_v13, -1e+30 }
 0x249   : > { %2804 = vmatprep.mubr.bf16.mxu1 %v7262_v24  ;;  %v1733_v1 = vsel %vm1705_vm11, %v1699_v29, -1e+30  ;;  %v5457_v57 = vmax.f32 %v4902_v23, %v1731_v47 }
 0x24a   : > { %1790 = vrot.lane.b32.xlu0 %v5406_v39, %s3438_s14  ;;  %v1632_v48 = vpop.permute.xlu0 %1631  ;;  %1792 = vrot.lane.b32.xlu1 %v5409_v22, %s3438_s14  ;;  %v1634_v4 = vpop.permute.xlu1 %1633  ;;  %7260 = vst [vmem:[#allocation48_spill] sm:$0xff] %v5442_v37  ;;  %7261 = vst [vmem:[#allocation49_spill] sm:$0xff] %v5445_v43  ;;  %v5460_v54 = vmax.f32 %v4906_v10, %v1733_v1  ;;  %v7289_v22 = vld [vmem:[#allocation3_spill] sm:$0xff] }
 0x24b   : > { %7263 = vst [vmem:[#allocation50_spill] sm:$0xff] %v5457_v57 }
 0x24c   : > { %7264 = vst [vmem:[#allocation51_spill] sm:$0xff] %v5460_v54 }
 0x24e   : > { %1822 = vrot.lane.b32.xlu0 %v5420_v38, %s3438_s14  ;;  %v1664_v44 = vpop.permute.xlu0 %1663  ;;  %1824 = vrot.lane.b32.xlu1 %v5423_v31, %s3438_s14  ;;  %v1666_v21 = vpop.permute.xlu1 %1665 }
 0x24f   : > { %v1684_v41 = vsel %vm1671_vm10, %v1632_v48, %v1664_v44  ;;  %v1685_v6 = vsel %vm1671_vm10, %v1634_v4, %v1666_v21  ;;  %v1700_v35 = vsel %vm1671_vm10, %v1664_v44, %v1632_v48  ;;  %v1701_v42 = vsel %vm1671_vm10, %v1666_v21, %v1634_v4 }
 0x250   : > { %v5475_v49 = vmax.f32 %v4922_v62, %v1684_v41  ;;  %v5478_v13 = vmax.f32 %v4926_v34, %v1685_v6  ;;  %v1735_v48 = vsel %vm1705_vm11, %v1700_v35, -1e+30  ;;  %v1737_v4 = vsel %vm1705_vm11, %v1701_v42, -1e+30  ;;  %v7265_v35 = vld [vmem:[#allocation33_spill] sm:$0xff] }
 0x251   : > { %v5489_v62 = vmax.f32 %v4938_v46, %v1735_v48  ;;  %v5492_v34 = vmax.f32 %v4942_v61, %v1737_v4  ;;  %v7266_v4 = vld [vmem:[#allocation34_spill] sm:$0xff] }
 0x252   : > { %1794 = vrot.lane.b32.xlu0 %v5442_v37, %s3438_s14  ;;  %v1636_v60 = vpop.permute.xlu0 %1635  ;;  %1796 = vrot.lane.b32.xlu1 %v5445_v43, %s3438_s14  ;;  %v1638_v55 = vpop.permute.xlu1 %1637 }
 0x256   : > { %1826 = vrot.lane.b32.xlu0 %v5457_v57, %s3438_s14  ;;  %v1668_v23 = vpop.permute.xlu0 %1667  ;;  %1828 = vrot.lane.b32.xlu1 %v5460_v54, %s3438_s14  ;;  %v1670_v10 = vpop.permute.xlu1 %1669 }
 0x257   : > { %v1686_v21 = vsel %vm1671_vm10, %v1636_v60, %v1668_v23  ;;  %v1687_v47 = vsel %vm1671_vm10, %v1638_v55, %v1670_v10  ;;  %v1702_v1 = vsel %vm1671_vm10, %v1668_v23, %v1636_v60  ;;  %v1703_v41 = vsel %vm1671_vm10, %v1670_v10, %v1638_v55 }
 0x258   : > { %v5507_v6 = vmax.f32 %v4958_v32, %v1686_v21  ;;  %v5510_v42 = vmax.f32 %v7265_v35, %v1687_v47  ;;  %v1739_v60 = vsel %vm1705_vm11, %v1702_v1, -1e+30  ;;  %v1741_v55 = vsel %vm1705_vm11, %v1703_v41, -1e+30  ;;  %v7267_v47 = vld [vmem:[#allocation32_spill] sm:$0xff] }
 0x259   : > { %v5525_v21 = vmax.f32 %v7266_v4, %v1739_v60  ;;  %v5528_v1 = vmax.f32 %v7267_v47, %v1741_v55  ;;  %v7268_v4 = vld [vmem:[#allocation31_spill] sm:$0xff] }
 0x25a   : > { %1798 = vrot.lane.b32.xlu0 %v5475_v49, %s3438_s14  ;;  %v2185_v29 = vpop.permute.xlu0 %2184  ;;  %1800 = vrot.lane.b32.xlu1 %v5478_v13, %s3438_s14  ;;  %v2187_v44 = vpop.permute.xlu1 %2186 }
 0x25e   : > { %1830 = vrot.lane.b32.xlu0 %v5489_v62, %s3438_s14  ;;  %v2217_v46 = vpop.permute.xlu0 %2216  ;;  %1832 = vrot.lane.b32.xlu1 %v5492_v34, %s3438_s14  ;;  %v2219_v61 = vpop.permute.xlu1 %2218 }
 0x25f   : > { %v2249_v23 = vsel %vm2248_vm7, %v2185_v29, %v2217_v46  ;;  %v2250_v10 = vsel %vm2248_vm7, %v2187_v44, %v2219_v61  ;;  %v2265_v24 = vsel %vm2248_vm7, %v2217_v46, %v2185_v29  ;;  %v2266_v58 = vsel %vm2248_vm7, %v2219_v61, %v2187_v44 }
 0x260   : > { %v2293_v41 = vsel %vm2285_vm8, %v2249_v23, -1e+30  ;;  %v2295_v35 = vsel %vm2285_vm8, %v2250_v10, -1e+30  ;;  %v7269_v23 = vld [vmem:[#allocation27_spill] sm:$0xff] }
 0x261   : > { %v5543_v47 = vmax.f32 %v7268_v4, %v2293_v41  ;;  %v5546_v53 = vmax.f32 %v7269_v23, %v2295_v35  ;;  %v2294_v29 = vsel %vm2286_vm9, %v2265_v24, -1e+30  ;;  %v2296_v44 = vsel %vm2286_vm9, %v2266_v58, -1e+30  ;;  %v7270_v24 = vld [vmem:[#allocation26_spill] sm:$0xff] }
 0x262   : > { %1802 = vrot.lane.b32.xlu0 %v5507_v6, %s3438_s14  ;;  %v2189_v32 = vpop.permute.xlu0 %2188  ;;  %1804 = vrot.lane.b32.xlu1 %v5510_v42, %s3438_s14  ;;  %v2191_v48 = vpop.permute.xlu1 %2190  ;;  %v5561_v35 = vmax.f32 %v5018_v16, %v2294_v29  ;;  %v5564_v4 = vmax.f32 %v7270_v24, %v2296_v44  ;;  %v7271_v44 = vld [vmem:[#allocation29_spill] sm:$0xff] }
 0x266   : > { %1834 = vrot.lane.b32.xlu0 %v5525_v21, %s3438_s14  ;;  %v2221_v60 = vpop.permute.xlu0 %2220  ;;  %1836 = vrot.lane.b32.xlu1 %v5528_v1, %s3438_s14  ;;  %v2223_v55 = vpop.permute.xlu1 %2222 }
 0x267   : > { %v2251_v46 = vsel %vm2248_vm7, %v2189_v32, %v2221_v60  ;;  %v2252_v61 = vsel %vm2248_vm7, %v2191_v48, %v2223_v55  ;;  %v2267_v25 = vsel %vm2248_vm7, %v2221_v60, %v2189_v32  ;;  %v2268_v2 = vsel %vm2248_vm7, %v2223_v55, %v2191_v48 }
 0x268   : > { %v2297_v58 = vsel %vm2285_vm8, %v2251_v46, -1e+30  ;;  %v2299_v23 = vsel %vm2285_vm8, %v2252_v61, -1e+30  ;;  %v7272_v46 = vld [vmem:[#allocation28_spill] sm:$0xff] }
 0x269   : > { %v5579_v24 = vmax.f32 %v7271_v44, %v2297_v58  ;;  %v5582_v9 = vmax.f32 %v7272_v46, %v2299_v23  ;;  %v2298_v32 = vsel %vm2286_vm9, %v2267_v25, -1e+30  ;;  %v2300_v48 = vsel %vm2286_vm9, %v2268_v2, -1e+30  ;;  %v7273_v25 = vld [vmem:[#allocation23_spill] sm:$0xff] }
 0x26a   : > { %2357 = vrot.lane.b32.xlu0 %v5543_v47, %s3437_s13  ;;  %v2193_v10 = vpop.permute.xlu0 %2192  ;;  %2359 = vrot.lane.b32.xlu1 %v5546_v53, %s3437_s13  ;;  %v2195_v41 = vpop.permute.xlu1 %2194  ;;  %v5597_v23 = vmax.f32 %v5058_v26, %v2298_v32  ;;  %v5600_v44 = vmax.f32 %v7273_v25, %v2300_v48  ;;  %v7274_v48 = vld [vmem:[#allocation22_spill] sm:$0xff] }
 0x26e   : > { %2389 = vrot.lane.b32.xlu0 %v5561_v35, %s3437_s13  ;;  %v2225_v16 = vpop.permute.xlu0 %2224  ;;  %2391 = vrot.lane.b32.xlu1 %v5564_v4, %s3437_s13  ;;  %v2227_v29 = vpop.permute.xlu1 %2226 }
 0x26f   : > { %v2253_v60 = vsel %vm2248_vm7, %v2193_v10, %v2225_v16  ;;  %v2254_v55 = vsel %vm2248_vm7, %v2195_v41, %v2227_v29  ;;  %v2269_v19 = vsel %vm2248_vm7, %v2225_v16, %v2193_v10  ;;  %v2270_v28 = vsel %vm2248_vm7, %v2227_v29, %v2195_v41 }
 0x270   : > { %v2301_v2 = vsel %vm2285_vm8, %v2253_v60, -1e+30  ;;  %v2303_v46 = vsel %vm2285_vm8, %v2254_v55, -1e+30  ;;  %v7275_v60 = vld [vmem:[#allocation25_spill] sm:$0xff] }
 0x271   : > { %v5615_v25 = vmax.f32 %v7274_v48, %v2301_v2  ;;  %v5618_v50 = vmax.f32 %v7275_v60, %v2303_v46  ;;  %v2302_v10 = vsel %vm2286_vm9, %v2269_v19, -1e+30  ;;  %v2304_v41 = vsel %vm2286_vm9, %v2270_v28, -1e+30 }
 0x272   : > { %2361 = vrot.lane.b32.xlu0 %v5579_v24, %s3437_s13  ;;  %v2197_v61 = vpop.permute.xlu0 %2196  ;;  %2363 = vrot.lane.b32.xlu1 %v5582_v9, %s3437_s13  ;;  %v2199_v58 = vpop.permute.xlu1 %2198  ;;  %v5633_v55 = vmax.f32 %v5098_v7, %v2302_v10  ;;  %v5636_v19 = vmax.f32 %v5102_v63, %v2304_v41  ;;  %v7277_v10 = vld [vmem:[#allocation10_spill] sm:$0xff]  ;;  %v7278_v41 = vld [vmem:[#allocation4_spill] sm:$0xff] }
 0x276   : > { %2393 = vrot.lane.b32.xlu0 %v5597_v23, %s3437_s13  ;;  %2395 = vrot.lane.b32.xlu1 %v5600_v44, %s3437_s13  ;;  %v2229_v26 = vpop.permute.xlu0 %2228  ;;  %v2231_v32 = vpop.permute.xlu1 %2230 }
 0x277   : > { %v2255_v16 = vsel %vm2248_vm7, %v2197_v61, %v2229_v26  ;;  %v2256_v29 = vsel %vm2248_vm7, %v2199_v58, %v2231_v32  ;;  %v2271_v46 = vsel %vm2248_vm7, %v2229_v26, %v2197_v61  ;;  %v2272_v48 = vsel %vm2248_vm7, %v2231_v32, %v2199_v58 }
 0x278   : > { %v2305_v28 = vsel %vm2285_vm8, %v2255_v16, -1e+30  ;;  %v2307_v2 = vsel %vm2285_vm8, %v2256_v29, -1e+30  ;;  %v2306_v0 = vsel %vm2286_vm9, %v2271_v46, -1e+30  ;;  %v1690_v32 = vsel %vm1671_vm10, %v5206_v20, %v5193_v17 }
 0x279   : > { %v5651_v7 = vmax.f32 %v5125_v5, %v2305_v28  ;;  %v5654_v63 = vmax.f32 %v5129_v51, %v2307_v2  ;;  %v2308_v61 = vsel %vm2286_vm9, %v2272_v48, -1e+30  ;;  %v1691_v5 = vsel %vm1671_vm10, %v5208_v15, %v5195_v36  ;;  %v7280_v29 = vld [vmem:[#allocation30_spill] sm:$0xff]  ;;  %v7282_v2 = vld [vmem:[#allocation15_spill] sm:$0xff]  ;;  %v7283_v46 = vld [vmem:[#allocation24_spill] sm:$0xff] }
 0x27a   : > { %2365 = vrot.lane.b32.xlu0 %v5615_v25, %s3437_s13  ;;  %2367 = vrot.lane.b32.xlu1 %v5618_v50, %s3437_s13  ;;  %v2374_v26 = vpop.permute.xlu0 %2373  ;;  %v2376_v58 = vpop.permute.xlu1 %2375  ;;  %v5673_v51 = vmax.f32 %v5146_v30, %v2306_v0  ;;  %v5676_v60 = vmax.f32 %v7276_v14, %v2308_v61  ;;  %v1715_v17 = vsel %vm1705_vm11, %v1690_v32, -1e+30  ;;  %v1717_v20 = vsel %vm1705_vm11, %v1691_v5, -1e+30  ;;  %v7284_v0 = vld [vmem:[#allocation14_spill] sm:$0xff]  ;;  %v7285_v61 = vld [vmem:[#allocation19_spill] sm:$0xff] }
 0x27b   : > { %v5683_v36 = vadd.s32 4, %v7277_v10  ;;  %v5691_v16 = vmax.f32 %v7278_v41, %v1715_v17  ;;  %v5694_v28 = vmax.f32 %v7280_v29, %v1717_v20  ;;  %v1672_v48 = vsel %vm1671_vm10, %v7283_v46, %v7282_v2  ;;  %v7286_v5 = vld [vmem:[#allocation7_spill] sm:$0xff]  ;;  %v7287_v41 = vld [vmem:[#allocation8_spill] sm:$0xff] }
 0x27c   : > { %v1673_v32 = vsel %vm1671_vm10, %v7285_v61, %v7284_v0  ;;  %v5705_v14 = vadd.s32 4, %v7286_v5  ;;  %v5717_v29 = vmax.f32 %v7287_v41, %v1672_v48  ;;  %vm2594_vm7 = vcmp.lt.s32.totalorder %v4478_v18, 120 }
 0x27d   : > { %7279 = vst [vmem:[#allocation33_spill] sm:$0xff] %v5691_v16  ;;  %7281 = vst [vmem:[#allocation34_spill] sm:$0xff] %v5694_v28  ;;  %vm2458_vm13 = vcmp.lt.s32.totalorder %v5683_v36, 16  ;;  %v5720_v39 = vmax.f32 %v7289_v22, %v1673_v32  ;;  %v7293_v22 = vld [vmem:[#allocation21_spill] sm:$0xff] }
 0x27e   : > { %2397 = vrot.lane.b32.xlu0 %v5633_v55, %s3437_s13  ;;  %2399 = vrot.lane.b32.xlu1 %v5636_v19, %s3437_s13  ;;  %v2406_v30 = vpop.permute.xlu0 %2405  ;;  %v2408_v15 = vpop.permute.xlu1 %2407  ;;  %7288 = vst [vmem:[#allocation32_spill] sm:$0xff] %v5717_v29  ;;  %vm2459_vm14 = vcmp.lt.s32.totalorder %v5705_v14, 16 }
 0x27f   : > { %v2430_v17 = vsel %vm2421_vm12, %v2374_v26, %v2406_v30  ;;  %v2431_v20 = vsel %vm2421_vm12, %v2376_v58, %v2408_v15  ;;  %7290 = vst [vmem:[#allocation31_spill] sm:$0xff] %v5720_v39  ;;  %v2447_v48 = vsel %vm2421_vm12, %v2408_v15, %v2376_v58 }
 0x280   : > { %v2482_v54 = vsel %vm2458_vm13, %v2430_v17, -1e+30  ;;  %v2484_v57 = vsel %vm2458_vm13, %v2431_v20, -1e+30  ;;  %v7295_v17 = vld [vmem:[#allocation20_spill] sm:$0xff] }
 0x281   : > { %v5740_v32 = vmax.f32 %v7293_v22, %v2482_v54  ;;  %v5743_v41 = vmax.f32 %v7295_v17, %v2484_v57  ;;  %v2485_v58 = vsel %vm2459_vm14, %v2447_v48, -1e+30  ;;  %v7297_v54 = vld [vmem:[#allocation17_spill] sm:$0xff]  ;;  %v7299_v57 = vld [vmem:[#allocation16_spill] sm:$0xff] }
 0x282   : > { %2369 = vrot.lane.b32.xlu0 %v5651_v7, %s3437_s13  ;;  %2371 = vrot.lane.b32.xlu1 %v5654_v63, %s3437_s13  ;;  %v5757_v15 = vmax.f32 %v7299_v57, %v2485_v58 }
 0x283   : > { %7294 = vst [vmem:[#allocation29_spill] sm:$0xff] %v5740_v32  ;;  %7296 = vst [vmem:[#allocation28_spill] sm:$0xff] %v5743_v41 }
 0x284   : > { %7300 = vst [vmem:[#allocation22_spill] sm:$0xff] %v5757_v15 }
 0x286   : > { %2401 = vrot.lane.b32.xlu0 %v5673_v51, %s3437_s13  ;;  %2403 = vrot.lane.b32.xlu1 %v5676_v60, %s3437_s13 }
 0x28a   : > { %1810 = vrot.lane.b32.xlu0 %v5691_v16, %s3438_s14  ;;  %1812 = vrot.lane.b32.xlu1 %v5694_v28, %s3438_s14  ;;  %v2446_v28 = vsel %vm2421_vm12, %v2406_v30, %v2374_v26 }
 0x28b   : > { %v2483_v26 = vsel %vm2459_vm14, %v2446_v28, -1e+30 }
 0x28c   : > { %v5722_v43 = vpop.permute.xlu0 %1778  ;;  %v5724_v37 = vpop.permute.xlu1 %1780  ;;  %v5754_v30 = vmax.f32 %v7297_v54, %v2483_v26 }
 0x28d   : > { %7291 = vst [vmem:[#allocation27_spill] sm:$0xff] %v5722_v43  ;;  %7292 = vst [vmem:[#allocation26_spill] sm:$0xff] %v5724_v37 }
 0x28e   : > { %1774 = vrot.lane.b32.xlu0 %v5717_v29, %s3438_s14  ;;  %1776 = vrot.lane.b32.xlu1 %v5720_v39, %s3438_s14  ;;  %7298 = vst [vmem:[#allocation23_spill] sm:$0xff] %v5754_v30 }
 0x290   : > { %v2378_v20 = vpop.permute.xlu0 %2377  ;;  %v2380_v16 = vpop.permute.xlu1 %2379 }
 0x292   : > { %2546 = vrot.lane.b32.xlu0 %v5740_v32, %s3439_s17  ;;  %2548 = vrot.lane.b32.xlu1 %v5743_v41, %s3439_s17 }
 0x294   : > { %v2410_v22 = vpop.permute.xlu0 %2409  ;;  %v2412_v17 = vpop.permute.xlu1 %2411 }
 0x295   : > { %v2432_v28 = vsel %vm2421_vm12, %v2378_v20, %v2410_v22  ;;  %v2433_v48 = vsel %vm2421_vm12, %v2380_v16, %v2412_v17  ;;  %v2448_v39 = vsel %vm2421_vm12, %v2410_v22, %v2378_v20  ;;  %v2449_v26 = vsel %vm2421_vm12, %v2412_v17, %v2380_v16  ;;  %v7303_v22 = vld [vmem:[#allocation12_spill] sm:$0xff] }
 0x296   : > { %v2486_v29 = vsel %vm2458_vm13, %v2432_v28, -1e+30  ;;  %v2488_v58 = vsel %vm2458_vm13, %v2433_v48, -1e+30  ;;  %2578 = vrot.lane.b32.xlu0 %v5754_v30, %s3439_s17  ;;  %2580 = vrot.lane.b32.xlu1 %v5757_v15, %s3439_s17  ;;  %v2487_v57 = vsel %vm2459_vm14, %v2448_v39, -1e+30 }
 0x297   : > { %v5776_v54 = vmax.f32 %v5237_v8, %v2486_v29  ;;  %v5779_v20 = vmax.f32 %v5240_v11, %v2488_v58  ;;  %v2489_v16 = vsel %vm2459_vm14, %v2449_v26, -1e+30  ;;  %v5790_v17 = vmax.f32 %v7303_v22, %v2487_v57  ;;  %v7305_v8 = vld [vmem:[#allocation35_spill] sm:$0xff] }
 0x298   : > { %v5793_v29 = vmax.f32 %v7305_v8, %v2489_v16 }
 0x299   : > { %7301 = vst [vmem:[#allocation25_spill] sm:$0xff] %v5776_v54  ;;  %7302 = vst [vmem:[#allocation18_spill] sm:$0xff] %v5779_v20 }
 0x29a   : > { %2550 = vrot.lane.b32.xlu0 %v5776_v54, %s3439_s17  ;;  %2552 = vrot.lane.b32.xlu1 %v5779_v20, %s3439_s17  ;;  %7304 = vst [vmem:[#allocation4_spill] sm:$0xff] %v5790_v17  ;;  %7306 = vst [vmem:[#allocation30_spill] sm:$0xff] %v5793_v29 }
 0x29c   : > { %v5795_v11 = vpop.permute.xlu0 %1782  ;;  %v5797_v28 = vpop.permute.xlu1 %1784 }
 0x29d   : > { %7307 = vst [vmem:[#allocation15_spill] sm:$0xff] %v5795_v11  ;;  %7308 = vst [vmem:[#allocation24_spill] sm:$0xff] %v5797_v28 }
 0x29e   : > { %2582 = vrot.lane.b32.xlu0 %v5790_v17, %s3439_s17  ;;  %2584 = vrot.lane.b32.xlu1 %v5793_v29, %s3439_s17 }
 0x2a0   : > { %v2382_v39 = vpop.permute.xlu0 %2381  ;;  %v2384_v48 = vpop.permute.xlu1 %2383 }
 0x2a4   : > { %v2414_v26 = vpop.permute.xlu0 %2413  ;;  %v2416_v58 = vpop.permute.xlu1 %2415 }
 0x2a5   : > { %v2434_v57 = vsel %vm2421_vm12, %v2382_v39, %v2414_v26  ;;  %v2450_v16 = vsel %vm2421_vm12, %v2414_v26, %v2382_v39  ;;  %v2435_v22 = vsel %vm2421_vm12, %v2384_v48, %v2416_v58  ;;  %v2451_v28 = vsel %vm2421_vm12, %v2416_v58, %v2384_v48 }
 0x2a6   : > { %v2490_v8 = vsel %vm2458_vm13, %v2434_v57, -1e+30  ;;  %v2492_v11 = vsel %vm2458_vm13, %v2435_v22, -1e+30  ;;  %v2491_v39 = vsel %vm2459_vm14, %v2450_v16, -1e+30 }
 0x2a7   : > { %v5816_v37 = vmax.f32 %v5287_v59, %v2490_v8  ;;  %v5819_v43 = vmax.f32 %v5290_v27, %v2492_v11  ;;  %v2493_v57 = vsel %vm2459_vm14, %v2451_v28, -1e+30  ;;  %v5834_v59 = vmax.f32 %v5306_v45, %v2491_v39 }
 0x2a8   : > { %v5823_v26 = vpop.permute.xlu0 %1814  ;;  %v5825_v41 = vpop.permute.xlu1 %1816  ;;  %v5837_v27 = vmax.f32 %v5309_v33, %v2493_v57 }
 0x2a9   : > { %7309 = vst [vmem:[#allocation14_spill] sm:$0xff] %v5823_v26  ;;  %7310 = vst [vmem:[#allocation19_spill] sm:$0xff] %v5825_v41  ;;  %2554 = vrot.lane.b32.xlu0 %v5816_v37, %s3439_s17  ;;  %2556 = vrot.lane.b32.xlu1 %v5819_v43, %s3439_s17 }
 0x2ac   : > { %v5839_v11 = vpop.permute.xlu0 %1786  ;;  %v5841_v48 = vpop.permute.xlu1 %1788 }
 0x2ad   : > { %7311 = vst [vmem:[#allocation8_spill] sm:$0xff] %v5839_v11  ;;  %7312 = vst [vmem:[#allocation3_spill] sm:$0xff] %v5841_v48  ;;  %2586 = vrot.lane.b32.xlu0 %v5834_v59, %s3439_s17  ;;  %2588 = vrot.lane.b32.xlu1 %v5837_v27, %s3439_s17 }
 0x2b0   : > { %v2386_v28 = vpop.permute.xlu0 %2385  ;;  %v2388_v58 = vpop.permute.xlu1 %2387 }
 0x2b4   : > { %v2418_v16 = vpop.permute.xlu0 %2417  ;;  %v2420_v22 = vpop.permute.xlu1 %2419 }
 0x2b5   : > { %v2436_v45 = vsel %vm2421_vm12, %v2386_v28, %v2418_v16  ;;  %v2452_v33 = vsel %vm2421_vm12, %v2418_v16, %v2386_v28  ;;  %v2437_v8 = vsel %vm2421_vm12, %v2388_v58, %v2420_v22  ;;  %v2453_v57 = vsel %vm2421_vm12, %v2420_v22, %v2388_v58 }
 0x2b6   : > { %v2494_v39 = vsel %vm2458_vm13, %v2436_v45, -1e+30  ;;  %v2496_v48 = vsel %vm2458_vm13, %v2437_v8, -1e+30  ;;  %v2495_v28 = vsel %vm2459_vm14, %v2452_v33, -1e+30 }
 0x2b7   : > { %v5860_v11 = vmax.f32 %v5356_v12, %v2494_v39  ;;  %v5863_v41 = vmax.f32 %v5359_v56, %v2496_v48  ;;  %v2497_v45 = vsel %vm2459_vm14, %v2453_v57, -1e+30  ;;  %v5878_v12 = vmax.f32 %v5374_v52, %v2495_v28 }
 0x2b8   : > { %v5867_v16 = vpop.permute.xlu0 %1818  ;;  %v5869_v26 = vpop.permute.xlu1 %1820  ;;  %v5881_v56 = vmax.f32 %v5377_v3, %v2497_v45 }
 0x2b9   : > { %7313 = vst [vmem:[#allocation21_spill] sm:$0xff] %v5860_v11  ;;  %7314 = vst [vmem:[#allocation20_spill] sm:$0xff] %v5863_v41  ;;  %2558 = vrot.lane.b32.xlu0 %v5860_v11, %s3439_s17  ;;  %2560 = vrot.lane.b32.xlu1 %v5863_v41, %s3439_s17 }
 0x2ba   : > { %7315 = vst [vmem:[#allocation17_spill] sm:$0xff] %v5867_v16  ;;  %7316 = vst [vmem:[#allocation16_spill] sm:$0xff] %v5869_v26 }
 0x2bb   : > { %7317 = vst [vmem:[#allocation12_spill] sm:$0xff] %v5878_v12  ;;  %7318 = vst [vmem:[#allocation35_spill] sm:$0xff] %v5881_v56 }
 0x2bc   : > { %v5883_v48 = vpop.permute.xlu0 %1790  ;;  %v5885_v58 = vpop.permute.xlu1 %1792 }
 0x2bd   : > { %2590 = vrot.lane.b32.xlu0 %v5878_v12, %s3439_s17  ;;  %2592 = vrot.lane.b32.xlu1 %v5881_v56, %s3439_s17 }
 0x2c0   : > { %v5891_v22 = vpop.permute.xlu0 %1822  ;;  %v5893_v33 = vpop.permute.xlu1 %1824 }
 0x2c4   : > { %v5895_v8 = vpop.permute.xlu0 %1794  ;;  %v5897_v52 = vpop.permute.xlu1 %1796 }
 0x2c8   : > { %v5899_v3 = vpop.permute.xlu0 %1826  ;;  %v5901_v39 = vpop.permute.xlu1 %1828 }
 0x2cc   : > { %v5903_v57 = vpop.permute.xlu0 %1798  ;;  %v5905_v28 = vpop.permute.xlu1 %1800 }
 0x2d0   : > { %v5907_v45 = vpop.permute.xlu0 %1830  ;;  %v5909_v26 = vpop.permute.xlu1 %1832 }
 0x2d4   : > { %v1803_v16 = vpop.permute.xlu0 %1802  ;;  %v1805_v32 = vpop.permute.xlu1 %1804 }
 0x2d8   : > { %v1835_v15 = vpop.permute.xlu0 %1834  ;;  %v1837_v30 = vpop.permute.xlu1 %1836 }
 0x2d9   : > { %v1853_v20 = vsel %vm1838_vm15, %v1803_v16, %v1835_v15  ;;  %v1869_v54 = vsel %vm1838_vm15, %v1835_v15, %v1803_v16  ;;  %v1854_v29 = vsel %vm1838_vm15, %v1805_v32, %v1837_v30  ;;  %v1870_v17 = vsel %vm1838_vm15, %v1837_v30, %v1805_v32 }
 0x2da   : > { %v1906_v56 = vsel %vm1872_vm1, %v1869_v54, -1e+30  ;;  %v1937_v41 = vmax.f32 %v5507_v6, %v1853_v20  ;;  %v1908_v12 = vsel %vm1872_vm1, %v1870_v17, -1e+30  ;;  %v1939_v11 = vmax.f32 %v5510_v42, %v1854_v29 }
 0x2db   : > { %v5928_v31 = vmax.f32 %v5525_v21, %v1906_v56  ;;  %v5931_v15 = vmax.f32 %v5528_v1, %v1908_v12 }
 0x2dc   : > { %v5933_v16 = vpop.permute.xlu0 %2357  ;;  %v5935_v38 = vpop.permute.xlu1 %2359 }
 0x2dd   : > { %7319 = vst [vmem:[#allocation52_spill] sm:$0xff] %v5931_v15  ;;  %v5938_v32 = vmax.f32 %v1937_v41, %v5928_v31  ;;  %v5941_v6 = vmax.f32 %v1939_v11, %v5931_v15 }
 0x2df   : > { %7320 = vst [vmem:[#allocation53_spill] sm:$0xff] %v5938_v32  ;;  %7321 = vst [vmem:[#allocation54_spill] sm:$0xff] %v5941_v6 }
 0x2e0   : > { %v5943_v30 = vpop.permute.xlu0 %2389  ;;  %v5945_v54 = vpop.permute.xlu1 %2391 }
 0x2e4   : > { %v2362_v42 = vpop.permute.xlu0 %2361  ;;  %v2364_v21 = vpop.permute.xlu1 %2363 }
 0x2e8   : > { %v2394_v20 = vpop.permute.xlu0 %2393  ;;  %v2396_v17 = vpop.permute.xlu1 %2395 }
 0x2e9   : > { %v2424_v1 = vsel %vm2421_vm12, %v2362_v42, %v2394_v20  ;;  %v2440_v29 = vsel %vm2421_vm12, %v2394_v20, %v2362_v42  ;;  %v2425_v41 = vsel %vm2421_vm12, %v2364_v21, %v2396_v17  ;;  %v2441_v12 = vsel %vm2421_vm12, %v2396_v17, %v2364_v21 }
 0x2ea   : > { %v2470_v11 = vsel %vm2458_vm13, %v2424_v1, -1e+30  ;;  %v2472_v56 = vsel %vm2458_vm13, %v2425_v41, -1e+30  ;;  %v2471_v42 = vsel %vm2459_vm14, %v2440_v29, -1e+30 }
 0x2eb   : > { %v5960_v6 = vmax.f32 %v5579_v24, %v2470_v11  ;;  %v5963_v32 = vmax.f32 %v5582_v9, %v2472_v56  ;;  %v2473_v1 = vsel %vm2459_vm14, %v2441_v12, -1e+30  ;;  %v5974_v24 = vmax.f32 %v5597_v23, %v2471_v42 }
 0x2ec   : > { %v2366_v20 = vpop.permute.xlu0 %2365  ;;  %v2368_v15 = vpop.permute.xlu1 %2367  ;;  %v5977_v9 = vmax.f32 %v5600_v44, %v2473_v1 }
 0x2ed   : > { %2534 = vrot.lane.b32.xlu0 %v5960_v6, %s3439_s17  ;;  %2536 = vrot.lane.b32.xlu1 %v5963_v32, %s3439_s17 }
 0x2f0   : > { %v2398_v21 = vpop.permute.xlu0 %2397  ;;  %v2400_v17 = vpop.permute.xlu1 %2399 }
 0x2f1   : > { %v2426_v29 = vsel %vm2421_vm12, %v2366_v20, %v2398_v21  ;;  %v2442_v41 = vsel %vm2421_vm12, %v2398_v21, %v2366_v20  ;;  %v2427_v11 = vsel %vm2421_vm12, %v2368_v15, %v2400_v17  ;;  %2566 = vrot.lane.b32.xlu0 %v5974_v24, %s3439_s17  ;;  %v2443_v44 = vsel %vm2421_vm12, %v2400_v17, %v2368_v15 }
 0x2f2   : > { %v2474_v23 = vsel %vm2458_vm13, %v2426_v29, -1e+30  ;;  %v2476_v12 = vsel %vm2458_vm13, %v2427_v11, -1e+30  ;;  %2568 = vrot.lane.b32.xlu1 %v5977_v9, %s3439_s17  ;;  %v2475_v20 = vsel %vm2459_vm14, %v2442_v41, -1e+30 }
 0x2f3   : > { %v5996_v56 = vmax.f32 %v5615_v25, %v2474_v23  ;;  %v5999_v42 = vmax.f32 %v5618_v50, %v2476_v12  ;;  %v2477_v15 = vsel %vm2459_vm14, %v2443_v44, -1e+30  ;;  %v6010_v25 = vmax.f32 %v5633_v55, %v2475_v20 }
 0x2f4   : > { %v2370_v1 = vpop.permute.xlu0 %2369  ;;  %v2372_v21 = vpop.permute.xlu1 %2371  ;;  %v6013_v50 = vmax.f32 %v5636_v19, %v2477_v15 }
 0x2f5   : > { %2538 = vrot.lane.b32.xlu0 %v5996_v56, %s3439_s17 }
 0x2f6   : > { %2540 = vrot.lane.b32.xlu1 %v5999_v42, %s3439_s17 }
 0x2f8   : > { %v2402_v17 = vpop.permute.xlu0 %2401  ;;  %v2404_v29 = vpop.permute.xlu1 %2403 }
 0x2f9   : > { %v2428_v41 = vsel %vm2421_vm12, %v2370_v1, %v2402_v17  ;;  %v2444_v11 = vsel %vm2421_vm12, %v2402_v17, %v2370_v1  ;;  %v2429_v23 = vsel %vm2421_vm12, %v2372_v21, %v2404_v29  ;;  %2570 = vrot.lane.b32.xlu0 %v6010_v25, %s3439_s17  ;;  %v2445_v19 = vsel %vm2421_vm12, %v2404_v29, %v2372_v21 }
 0x2fa   : > { %v2478_v55 = vsel %vm2458_vm13, %v2428_v41, -1e+30  ;;  %v2480_v44 = vsel %vm2458_vm13, %v2429_v23, -1e+30  ;;  %2572 = vrot.lane.b32.xlu1 %v6013_v50, %s3439_s17  ;;  %v2479_v1 = vsel %vm2459_vm14, %v2444_v11, -1e+30  ;;  %v1688_v21 = vsel %vm1671_vm10, %v7282_v2, %v7283_v46 }
 0x2fb   : > { %v6032_v12 = vmax.f32 %v5651_v7, %v2478_v55  ;;  %v6035_v20 = vmax.f32 %v5654_v63, %v2480_v44  ;;  %v2481_v29 = vsel %vm2459_vm14, %v2445_v19, -1e+30  ;;  %v1689_v7 = vsel %vm1671_vm10, %v7284_v0, %v7285_v61  ;;  %v7323_v55 = vld [vmem:[#allocation5_spill] sm:$0xff]  ;;  %v6143_v14 = vpop.f32.mrf.mxu1 }
 0x2fc   : > { %v6039_v15 = vpop.permute.xlu0 %1810  ;;  %v6041_v17 = vpop.permute.xlu1 %1812  ;;  %v6058_v63 = vmax.f32 %v5673_v51, %v2479_v1  ;;  %v1711_v2 = vsel %vm1705_vm11, %v1688_v21, -1e+30  ;;  %v6063_v46 = vmax.f32 %v5676_v60, %v2481_v29  ;;  %v1713_v23 = vsel %vm1705_vm11, %v1689_v7, -1e+30  ;;  %v7322_v60 = vld [vmem:[#allocation2_spill] sm:$0xff]  ;;  %7329 = vst [vmem:[#allocation58_spill] sm:$0xff] %v6143_v14 }
 0x2fd   : > { %2542 = vrot.lane.b32.xlu0 %v6032_v12, %s3439_s17  ;;  %v2422_v0 = vsel %vm2421_vm12, %v5933_v16, %v5943_v30  ;;  %v2423_v51 = vsel %vm2421_vm12, %v5935_v38, %v5945_v54  ;;  %v6084_v61 = vmax.f32 %v7322_v60, %v1711_v2  ;;  %v6087_v19 = vmax.f32 %v7323_v55, %v1713_v23 }
 0x2fe   : > { %2544 = vrot.lane.b32.xlu1 %v6035_v20, %s3439_s17  ;;  %v2466_v44 = vsel %vm2458_vm13, %v2422_v0, -1e+30  ;;  %v2438_v1 = vsel %vm2421_vm12, %v5943_v30, %v5933_v16  ;;  %v2468_v21 = vsel %vm2458_vm13, %v2423_v51, -1e+30  ;;  %v2439_v7 = vsel %vm2421_vm12, %v5945_v54, %v5935_v38  ;;  %v6147_v51 = vpop.f32.mrf.mxu1 }
 0x2ff   : > { %7324 = vst [vmem:[#allocation2_spill] sm:$0xff] %v6087_v19  ;;  %v6110_v16 = vmax.f32 %v5543_v47, %v2466_v44  ;;  %v2467_v36 = vsel %vm2459_vm14, %v2438_v1, -1e+30  ;;  %v6115_v30 = vmax.f32 %v5546_v53, %v2468_v21  ;;  %v2469_v23 = vsel %vm2459_vm14, %v2439_v7, -1e+30  ;;  %7330 = vst [vmem:[#allocation59_spill] sm:$0xff] %v6147_v51 }
 0x300   : > { %v6065_v41 = vpop.permute.xlu0 %1774  ;;  %v6067_v11 = vpop.permute.xlu1 %1776  ;;  %v6124_v38 = vmax.f32 %v5561_v35, %v2467_v36  ;;  %v6129_v54 = vmax.f32 %v5564_v4, %v2469_v23  ;;  %v1424_v53 = vld [vmem:[%s6819_s4] sm:$0xf]  ;;  %v1867_v1 = vsel %vm1838_vm15, %v5907_v45, %v5903_v57  ;;  %v1851_v36 = vsel %vm1838_vm15, %v5903_v57, %v5907_v45 }
 0x301   : > { %2574 = vrot.lane.b32.xlu0 %v6058_v63, %s3439_s17  ;;  %7325 = vst [vmem:[#allocation5_spill] sm:$0xff] %v6110_v16  ;;  %7326 = vst [vmem:[#allocation55_spill] sm:$0xff] %v6115_v30  ;;  %v2993_v35 = vld [vmem:[%s6822_s7] sm:$0xf]  ;;  %v845_v55 = vpop.f32.mrf.mxu1  ;;  %v1902_v23 = vsel %vm1872_vm1, %v1867_v1, -1e+30  ;;  %v1933_v51 = vmax.f32 %v5475_v49, %v1851_v36  ;;  %v1852_v57 = vsel %vm1838_vm15, %v5905_v28, %v5909_v26 }
 0x302   : > { %2576 = vrot.lane.b32.xlu1 %v6063_v46, %s3439_s17  ;;  %7327 = vst [vmem:[#allocation56_spill] sm:$0xff] %v6124_v38  ;;  %7328 = vst [vmem:[#allocation57_spill] sm:$0xff] %v6129_v54  ;;  %v6173_v55 = vadd.s32 8, %v7286_v5  ;;  %v1934_v14 = vmax.f32 %v5489_v62, %v1902_v23  ;;  %vm2837_vm10 = vcmp.lt.s32.totalorder %v4478_v18, 17  ;;  %vm2872_vm11 = vcmp.lt.s32.totalorder %v4478_v18, 16 }
 0x303   : > { %v846_v44 = vpop.f32.mrf.mxu1  ;;  %vm2889_vm12 = vcmp.lt.s32.totalorder %v4478_v18, 15  ;;  %vm2840_vm13 = vcmp.ge.s32.totalorder %v4478_v18, 17  ;;  %vm2892_vm14 = vcmp.ge.s32.totalorder %v4478_v18, 15 }
 0x304   : > { %v6097_v29 = vpop.permute.xlu0 %2546  ;;  %v6105_v2 = vpop.permute.xlu1 %2548  ;;  %vm2632_vm9 = vcmp.lt.s32.totalorder %v6173_v55, 16  ;;  %v2003_v62 = vmax.f32 %v1933_v51, %v1934_v14  ;;  %v2004_v36 = vmax.f32 %v1934_v14, -1e+30 }
 0x305   : > { %1806 = vrot.lane.b32.xlu0 %v6084_v61, %s3438_s14 }
 0x306   : > { %1808 = vrot.lane.b32.xlu1 %v6087_v19, %s3438_s14  ;;  %s3440_s14 = smov 17  }
 0x308   : > { %v6126_v47 = vpop.permute.xlu0 %2578  ;;  %v6131_v0 = vpop.permute.xlu1 %2580 }
 0x309   : > { %2530 = vrot.lane.b32.xlu0 %v6110_v16, %s3439_s17  ;;  %v7343_v16 = vld [vmem:[#allocation54_spill] sm:$0xff] }
 0x30a   : > { %2532 = vrot.lane.b32.xlu1 %v6115_v30, %s3439_s17 }
 0x30c   : > { %v6145_v4 = vpop.permute.xlu0 %2550  ;;  %v6149_v60 = vpop.permute.xlu1 %2552 }
 0x30d   : > { %2562 = vrot.lane.b32.xlu0 %v6124_v38, %s3439_s17 }
 0x30e   : > { %2564 = vrot.lane.b32.xlu1 %v6129_v54, %s3439_s17  ;;  %s3443_s17 = smov 1  }
 0x310   : > { %v6155_v21 = vpop.permute.xlu0 %2582  ;;  %v6157_v7 = vpop.permute.xlu1 %2584 }
 0x311   : > { %1427 = vperm.xlu0 %3391, %v1424_v53   ;;  %v1868_v53 = vsel %vm1838_vm15, %v5909_v26, %v5905_v28 }
 0x312   : > { %2996 = vperm.xlu1 %3392, %v2993_v35   ;;  %v6170_v35 = vadd.s32 8, %v7277_v10  ;;  %v1904_v45 = vsel %vm1872_vm1, %v1868_v53, -1e+30  ;;  %v1935_v10 = vmax.f32 %v5478_v13, %v1852_v57 }
 0x313   : > { %v1936_v5 = vmax.f32 %v5492_v34, %v1904_v45 }
 0x314   : > { %vm2631_vm8 = vcmp.lt.s32.totalorder %v6170_v35, 16 }
 0x31b   : > { %v2555_v44 = vpop.permute.xlu0 %2554  ;;  %v2557_v1 = vpop.permute.xlu1 %2556 }
 0x31f   : > { %v2587_v49 = vpop.permute.xlu0 %2586  ;;  %v2589_v23 = vpop.permute.xlu1 %2588 }
 0x320   : > { %v2607_v26 = vsel %vm2594_vm7, %v2555_v44, %v2587_v49  ;;  %v2623_v28 = vsel %vm2594_vm7, %v2587_v49, %v2555_v44  ;;  %v2608_v34 = vsel %vm2594_vm7, %v2557_v1, %v2589_v23  ;;  %v2624_v51 = vsel %vm2594_vm7, %v2589_v23, %v2557_v1 }
 0x321   : > { %v2663_v53 = vsel %vm2631_vm8, %v2607_v26, -1e+30  ;;  %v2664_v13 = vsel %vm2632_vm9, %v2623_v28, -1e+30  ;;  %v2665_v44 = vsel %vm2631_vm8, %v2608_v34, -1e+30  ;;  %v2005_v49 = vmax.f32 %v1935_v10, %v1936_v5 }
 0x322   : > { %v2695_v14 = vmax.f32 %v5816_v37, %v2663_v53  ;;  %v2696_v57 = vmax.f32 %v5834_v59, %v2664_v13  ;;  %v2666_v45 = vsel %vm2632_vm9, %v2624_v51, -1e+30  ;;  %v2006_v26 = vmax.f32 %v1936_v5, -1e+30  ;;  %v7331_v51 = vld [vmem:[#allocation46_spill] sm:$0xff] }
 0x323   : > { %v2697_v28 = vmax.f32 %v5819_v43, %v2665_v44  ;;  %v2698_v54 = vmax.f32 %v5837_v27, %v2666_v45  ;;  %v1863_v59 = vsel %vm1838_vm15, %v5891_v22, %v5883_v48  ;;  %v1864_v43 = vsel %vm1838_vm15, %v5893_v33, %v5885_v58  ;;  %v7332_v44 = vld [vmem:[#allocation47_spill] sm:$0xff]  ;;  %v7342_v5 = vld [vmem:[#allocation30_spill] sm:$0xff] }
 0x324   : > { %v6208_v30 = vadd.f32 %v2695_v14, %v2003_v62  ;;  %v6210_v38 = vadd.f32 %v2696_v57, %v2004_v36  ;;  %v1865_v27 = vsel %vm1838_vm15, %v5899_v3, %v5895_v8  ;;  %v1894_v62 = vsel %vm1872_vm1, %v1863_v59, -1e+30  ;;  %v7334_v59 = vld [vmem:[#allocation51_spill] sm:$0xff] }
 0x325   : > { %v6212_v1 = vadd.f32 %v2697_v28, %v2005_v49  ;;  %v6214_v37 = vadd.f32 %v2698_v54, %v2006_v26  ;;  %v1866_v54 = vsel %vm1838_vm15, %v5901_v39, %v5897_v52  ;;  %v1896_v36 = vsel %vm1872_vm1, %v1864_v43, -1e+30 }
 0x326   : > { %v1898_v23 = vsel %vm1872_vm1, %v1865_v27, -1e+30  ;;  %v1900_v53 = vsel %vm1872_vm1, %v1866_v54, -1e+30  ;;  %v6248_v34 = vsel %vm1838_vm15, %v5883_v48, %v5891_v22  ;;  %v6251_v14 = vmax.f32 %v7331_v51, %v1894_v62  ;;  %v7336_v51 = vld [vmem:[#allocation21_spill] sm:$0xff] }
 0x327   : > { %v6257_v57 = vsel %vm1838_vm15, %v5885_v58, %v5893_v33  ;;  %v6260_v45 = vmax.f32 %v7332_v44, %v1896_v36  ;;  %v1849_v26 = vsel %vm1838_vm15, %v5895_v8, %v5899_v3  ;;  %v1850_v48 = vsel %vm1838_vm15, %v5897_v52, %v5901_v39  ;;  %v7333_v33 = vld [vmem:[#allocation50_spill] sm:$0xff]  ;;  %v7335_v3 = vld [vmem:[#allocation52_spill] sm:$0xff] }
 0x328   : > { %v2621_v58 = vsel %vm2594_vm7, %v6155_v21, %v6145_v4  ;;  %v2622_v22 = vsel %vm2594_vm7, %v6157_v7, %v6149_v60  ;;  %v1930_v28 = vmax.f32 %v7333_v33, %v1898_v23  ;;  %v1932_v43 = vmax.f32 %v7334_v59, %v1900_v53 }
 0x329   : > { %v2008_v8 = vmax.f32 %v5928_v31, -1e+30  ;;  %v2010_v27 = vmax.f32 %v7335_v3, -1e+30  ;;  %v2603_v52 = vsel %vm2594_vm7, %v6097_v29, %v6126_v47  ;;  %v2619_v39 = vsel %vm2594_vm7, %v6126_v47, %v6097_v29  ;;  %v7338_v3 = vld [vmem:[#allocation20_spill] sm:$0xff] }
 0x32a   : > { %v2605_v54 = vsel %vm2594_vm7, %v6145_v4, %v6155_v21  ;;  %v2606_v31 = vsel %vm2594_vm7, %v6149_v60, %v6157_v7  ;;  %v2660_v36 = vsel %vm2632_vm9, %v2621_v58, -1e+30  ;;  %v2662_v23 = vsel %vm2632_vm9, %v2622_v22, -1e+30  ;;  %v7337_v58 = vld [vmem:[#allocation12_spill] sm:$0xff] }
 0x32b   : > { %v2559_v13 = vpop.permute.xlu0 %2558  ;;  %v2561_v49 = vpop.permute.xlu1 %2560  ;;  %v2604_v59 = vsel %vm2594_vm7, %v6105_v2, %v6131_v0  ;;  %v2694_v10 = vmax.f32 %v7342_v5, %v2662_v23  ;;  %v2655_v5 = vsel %vm2631_vm8, %v2603_v52, -1e+30  ;;  %v7348_v23 = vld [vmem:[#allocation23_spill] sm:$0xff] }
 0x32f   : > { %v2591_v62 = vpop.permute.xlu0 %2590  ;;  %v2593_v53 = vpop.permute.xlu1 %2592 }
 0x330   : > { %v2609_v29 = vsel %vm2594_vm7, %v2559_v13, %v2591_v62  ;;  %v2625_v47 = vsel %vm2594_vm7, %v2591_v62, %v2559_v13  ;;  %v2610_v21 = vsel %vm2594_vm7, %v2561_v49, %v2593_v53  ;;  %v2626_v7 = vsel %vm2594_vm7, %v2593_v53, %v2561_v49 }
 0x331   : > { %v2667_v4 = vsel %vm2631_vm8, %v2609_v29, -1e+30  ;;  %v2668_v60 = vsel %vm2632_vm9, %v2625_v47, -1e+30  ;;  %v2669_v13 = vsel %vm2631_vm8, %v2610_v21, -1e+30  ;;  %v2620_v49 = vsel %vm2594_vm7, %v6131_v0, %v6105_v2 }
 0x332   : > { %v2699_v44 = vmax.f32 %v7336_v51, %v2667_v4  ;;  %v2700_v22 = vmax.f32 %v7337_v58, %v2668_v60  ;;  %v2670_v33 = vsel %vm2632_vm9, %v2626_v7, -1e+30  ;;  %v2701_v62 = vmax.f32 %v7338_v3, %v2669_v13  ;;  %v7339_v29 = vld [vmem:[#allocation35_spill] sm:$0xff]  ;;  %v7340_v60 = vld [vmem:[#allocation53_spill] sm:$0xff]  ;;  %v7341_v51 = vld [vmem:[#allocation4_spill] sm:$0xff] }
 0x333   : > { %v2702_v47 = vmax.f32 %v7339_v29, %v2670_v33  ;;  %v2659_v53 = vsel %vm2631_vm8, %v2605_v54, -1e+30  ;;  %v2661_v4 = vsel %vm2631_vm8, %v2606_v31, -1e+30  ;;  %v2692_v58 = vmax.f32 %v7341_v51, %v2660_v36  ;;  %v7344_v0 = vld [vmem:[#allocation48_spill] sm:$0xff]  ;;  %v7345_v3 = vld [vmem:[#allocation49_spill] sm:$0xff] }
 0x334   : > { %v2731_v21 = vadd.f32 %v2699_v44, %v7340_v60  ;;  %v2732_v7 = vadd.f32 %v2700_v22, %v2008_v8  ;;  %v2733_v19 = vadd.f32 %v2701_v62, %v7343_v16  ;;  %v1929_v13 = vmax.f32 %v7344_v0, %v1849_v26  ;;  %v7347_v36 = vld [vmem:[#allocation18_spill] sm:$0xff]  ;;  %v7354_v0 = vld [vmem:[#allocation28_spill] sm:$0xff] }
 0x335   : > { %v2734_v2 = vadd.f32 %v2702_v47, %v2010_v27  ;;  %v1931_v33 = vmax.f32 %v7345_v3, %v1850_v48  ;;  %v2656_v54 = vsel %vm2632_vm9, %v2619_v39, -1e+30  ;;  %v2658_v31 = vsel %vm2632_vm9, %v2620_v49, -1e+30  ;;  %v7346_v27 = vld [vmem:[#allocation25_spill] sm:$0xff]  ;;  %v7349_v39 = vld [vmem:[#allocation22_spill] sm:$0xff] }
 0x336   : > { %v2000_v29 = vmax.f32 %v1930_v28, -1e+30  ;;  %v2002_v44 = vmax.f32 %v1932_v43, -1e+30  ;;  %v2749_v22 = vpack.c.bf16 %v2733_v19, %v2731_v21  ;;  %v2657_v16 = vsel %vm2631_vm8, %v2604_v59, -1e+30 }
 0x337   : > { %v2750_v8 = vpack.c.bf16 %v2734_v2, %v2732_v7  ;;  %v2691_v26 = vmax.f32 %v7346_v27, %v2659_v53  ;;  %v2693_v48 = vmax.f32 %v7347_v36, %v2661_v4  ;;  %v2688_v62 = vmax.f32 %v7348_v23, %v2656_v54  ;;  %v7350_v7 = vld [vmem:[#allocation44_spill] sm:$0xff]  ;;  %v7351_v21 = vld [vmem:[#allocation45_spill] sm:$0xff] }
 0x338   : > { %v2690_v47 = vmax.f32 %v7349_v39, %v2658_v31  ;;  %v2724_v60 = vadd.f32 %v2692_v58, %v2000_v29  ;;  %v2726_v49 = vadd.f32 %v2694_v10, %v2002_v44  ;;  %v1925_v19 = vmax.f32 %v7350_v7, %v6248_v34  ;;  %v7353_v58 = vld [vmem:[#allocation29_spill] sm:$0xff]  ;;  %v7360_v39 = vld [vmem:[#allocation15_spill] sm:$0xff] }
 0x339   : > { %2772 = vmatprep.subr.bf16.mxu1 %v2750_v8  ;;  %v1927_v52 = vmax.f32 %v7351_v21, %v6257_v57  ;;  %v1999_v51 = vmax.f32 %v1929_v13, %v1930_v28  ;;  %v2001_v2 = vmax.f32 %v1931_v33, %v1932_v43  ;;  %v1996_v59 = vmax.f32 %v6251_v14, -1e+30  ;;  %v7363_v7 = vld [vmem:[#allocation19_spill] sm:$0xff]  ;;  %v7364_v21 = vld [vmem:[#allocation13_spill] sm:$0xff] }
 0x33a   : > { %2773 = vmatpush1.bf16.msra.mxu1 %v2749_v22  ;;  %v1998_v53 = vmax.f32 %v6260_v45, -1e+30  ;;  %v7352_v4 = vpack.c.bf16 %v6214_v37, %v6210_v38  ;;  %v2687_v10 = vmax.f32 %v7353_v58, %v2655_v5  ;;  %v2689_v3 = vmax.f32 %v7354_v0, %v2657_v16  ;;  %v7356_v22 = vld [vmem:[#allocation27_spill] sm:$0xff] }
 0x33b   : > { %v2723_v54 = vadd.f32 %v2691_v26, %v1999_v51  ;;  %v2725_v34 = vadd.f32 %v2693_v48, %v2001_v2  ;;  %v2720_v31 = vadd.f32 %v2688_v62, %v1996_v59  ;;  %v2746_v57 = vpack.c.bf16 %v2726_v49, %v2724_v60  ;;  %v7358_v26 = vld [vmem:[#allocation11_spill] sm:$0xff]  ;;  %v7359_v48 = vld [vmem:[#allocation33_spill] sm:$0xff]  ;;  %v7362_v49 = vld [vmem:[#allocation24_spill] sm:$0xff] }
 0x33c   : > { %2774 = vmatprep.subr.bf16.mxu1 %v7352_v4  ;;  %v2722_v29 = vadd.f32 %v2690_v47, %v1998_v53  ;;  %v1995_v28 = vmax.f32 %v1925_v19, %v6251_v14  ;;  %v1997_v43 = vmax.f32 %v1927_v52, %v6260_v45  ;;  %v7355_v13 = vpack.c.bf16 %v6212_v1, %v6208_v30  ;;  %v7357_v45 = vld [vmem:[#allocation26_spill] sm:$0xff] }
 0x33d   : > { %v2745_v33 = vpack.c.bf16 %v2725_v34, %v2723_v54  ;;  %v1857_v14 = vsel %vm1838_vm15, %v6039_v15, %v7356_v22  ;;  %v1841_v30 = vsel %vm1838_vm15, %v7356_v22, %v6039_v15  ;;  %v1858_v5 = vsel %vm1838_vm15, %v6041_v17, %v7357_v45  ;;  %v7361_v47 = vld [vmem:[#allocation14_spill] sm:$0xff] }
 0x33e   : > { %2775 = vmatpush1.bf16.msra.mxu1 %v7355_v13  ;;  %v2719_v38 = vadd.f32 %v2687_v10, %v1995_v28  ;;  %v2721_v37 = vadd.f32 %v2689_v3, %v1997_v43  ;;  %v2744_v44 = vpack.c.bf16 %v2722_v29, %v2720_v31  ;;  %v1882_v1 = vsel %vm1872_vm1, %v1857_v14, -1e+30  ;;  %v7365_v51 = vld [vmem:[#allocation34_spill] sm:$0xff] }
 0x33f   : > { %2776 = vmatprep.subr.bf16.mxu1 %v2746_v57  ;;  %v1913_v36 = vmax.f32 %v7358_v26, %v1841_v30  ;;  %v1914_v23 = vmax.f32 %v7359_v48, %v1882_v1  ;;  %v1842_v62 = vsel %vm1838_vm15, %v7357_v45, %v6041_v17  ;;  %v1884_v15 = vsel %vm1872_vm1, %v1858_v5, -1e+30  ;;  %v7368_v1 = vld [vmem:[#allocation3_spill] sm:$0xff] }
 0x340   : > { %v2743_v8 = vpack.c.bf16 %v2721_v37, %v2719_v38  ;;  %v1859_v60 = vsel %vm1838_vm15, %v7361_v47, %v7360_v39  ;;  %v1860_v19 = vsel %vm1838_vm15, %v7363_v7, %v7362_v49  ;;  %v1915_v52 = vmax.f32 %v7364_v21, %v1842_v62 }
 0x341   : > { %v1916_v2 = vmax.f32 %v7365_v51, %v1884_v15  ;;  %v1983_v53 = vmax.f32 %v1913_v36, %v1914_v23  ;;  %v1984_v17 = vmax.f32 %v1914_v23, -1e+30  ;;  %v1843_v30 = vsel %vm1838_vm15, %v7360_v39, %v7361_v47  ;;  %v7370_v39 = vld [vmem:[#allocation36_spill] sm:$0xff] }
 0x342   : > { %2777 = vmatpush1.bf16.msra.mxu1 %v2745_v33  ;;  %v1888_v26 = vsel %vm1872_vm1, %v1860_v19, -1e+30  ;;  %v1917_v47 = vmax.f32 %v7370_v39, %v1843_v30  ;;  %v7371_v19 = vld [vmem:[#allocation38_spill] sm:$0xff] }
 0x343   : > { %2778 = vmatprep.subr.bf16.mxu1 %v2744_v44  ;;  %v1985_v43 = vmax.f32 %v1915_v52, %v1916_v2  ;;  %v1986_v13 = vmax.f32 %v1916_v2, -1e+30  ;;  %v7366_v44 = vld [vmem:[#allocation8_spill] sm:$0xff]  ;;  %v7372_v52 = vld [vmem:[#allocation37_spill] sm:$0xff] }
 0x346   : > { %2779 = vmatpush1.bf16.msra.mxu1 %v2743_v8  ;;  %v7367_v8 = vld [vmem:[#allocation17_spill] sm:$0xff] }
 0x347   : > { %v1845_v36 = vsel %vm1838_vm15, %v7366_v44, %v7367_v8 }
 0x35f   : > { %v2535_v16 = vpop.permute.xlu0 %2534  ;;  %v2537_v27 = vpop.permute.xlu1 %2536 }
 0x363   : > { %v2567_v59 = vpop.permute.xlu0 %2566 }
 0x364   : > { %v2597_v4 = vsel %vm2594_vm7, %v2535_v16, %v2567_v59  ;;  %v2613_v58 = vsel %vm2594_vm7, %v2567_v59, %v2535_v16  ;;  %v2569_v10 = vpop.permute.xlu1 %2568  ;;  %v1886_v16 = vsel %vm1872_vm1, %v1859_v60, -1e+30 }
 0x365   : > { %v2643_v0 = vsel %vm2631_vm8, %v2597_v4, -1e+30  ;;  %v2644_v3 = vsel %vm2632_vm9, %v2613_v58, -1e+30  ;;  %v2598_v54 = vsel %vm2594_vm7, %v2537_v27, %v2569_v10  ;;  %v2614_v34 = vsel %vm2594_vm7, %v2569_v10, %v2537_v27  ;;  %v7374_v4 = vld [vmem:[#allocation40_spill] sm:$0xff]  ;;  %v7375_v10 = vld [vmem:[#allocation42_spill] sm:$0xff] }
 0x366   : > { %v2675_v31 = vmax.f32 %v5960_v6, %v2643_v0  ;;  %v2676_v29 = vmax.f32 %v5974_v24, %v2644_v3  ;;  %v2645_v57 = vsel %vm2631_vm8, %v2598_v54, -1e+30  ;;  %v2646_v28 = vsel %vm2632_vm9, %v2614_v34, -1e+30  ;;  %v7376_v54 = vld [vmem:[#allocation41_spill] sm:$0xff] }
 0x367   : > { %v2677_v38 = vmax.f32 %v5963_v32, %v2645_v57  ;;  %v2678_v37 = vmax.f32 %v5977_v9, %v2646_v28  ;;  %v2539_v33 = vpop.permute.xlu0 %2538  ;;  %v1861_v6 = vsel %vm1838_vm15, %v7367_v8, %v7366_v44  ;;  %v7369_v32 = vld [vmem:[#allocation16_spill] sm:$0xff]  ;;  %v1844_v27 = vsel %vm1838_vm15, %v7362_v49, %v7363_v7 }
 0x368   : > { %v6424_v22 = vadd.f32 %v2675_v31, %v1983_v53  ;;  %v6426_v24 = vadd.f32 %v2676_v29, %v1984_v17  ;;  %v2541_v14 = vpop.permute.xlu1 %2540  ;;  %v1862_v9 = vsel %vm1838_vm15, %v7369_v32, %v7368_v1  ;;  %v1890_v48 = vsel %vm1872_vm1, %v1861_v6, -1e+30  ;;  %v7373_v53 = vld [vmem:[#allocation39_spill] sm:$0xff] }
 0x369   : > { %v6436_v45 = vadd.f32 %v2677_v38, %v1985_v43  ;;  %v6438_v5 = vadd.f32 %v2678_v37, %v1986_v13  ;;  %v1846_v60 = vsel %vm1838_vm15, %v7368_v1, %v7369_v32  ;;  %v1892_v49 = vsel %vm1872_vm1, %v1862_v9, -1e+30  ;;  %v7377_v31 = vld [vmem:[#allocation43_spill] sm:$0xff] }
 0x36a   : > { %v1918_v21 = vmax.f32 %v7371_v19, %v1886_v16  ;;  %v1919_v51 = vmax.f32 %v7372_v52, %v1844_v27  ;;  %v1920_v17 = vmax.f32 %v7373_v53, %v1888_v26  ;;  %v1921_v58 = vmax.f32 %v7374_v4, %v1845_v36 }
 0x36b   : > { %v2571_v23 = vpop.permute.xlu0 %2570  ;;  %v2738_v62 = vpack.c.bf16 %v6438_v5, %v6426_v24  ;;  %v2737_v15 = vpack.c.bf16 %v6436_v45, %v6424_v22  ;;  %v1922_v0 = vmax.f32 %v7375_v10, %v1890_v48  ;;  %v1923_v34 = vmax.f32 %v7376_v54, %v1846_v60  ;;  %v3419_v24 = vld [vmem:[%s6821_s6 + $0x8] sm:$0xff]   ;;  %v3420_v22 = vld [vmem:[%s6821_s6 + $0x10] ss:$0 sps:$4 sm:$0x33]  }
 0x36c   : > { %v2573_v7 = vpop.permute.xlu1 %2572  ;;  %v2599_v2 = vsel %vm2594_vm7, %v2539_v33, %v2571_v23  ;;  %v2615_v59 = vsel %vm2594_vm7, %v2571_v23, %v2539_v33  ;;  %v1924_v29 = vmax.f32 %v7377_v31, %v1892_v49  ;;  %v1987_v38 = vmax.f32 %v1917_v47, %v1918_v21 }
 0x36d   : > { %v2616_v3 = vsel %vm2594_vm7, %v2573_v7, %v2541_v14  ;;  %v2647_v28 = vsel %vm2631_vm8, %v2599_v2, -1e+30  ;;  %v2648_v43 = vsel %vm2632_vm9, %v2615_v59, -1e+30  ;;  %v1988_v37 = vmax.f32 %v1918_v21, -1e+30 }
 0x36e   : > { %v2600_v33 = vsel %vm2594_vm7, %v2541_v14, %v2573_v7  ;;  %v2650_v44 = vsel %vm2632_vm9, %v2616_v3, -1e+30  ;;  %v1989_v8 = vmax.f32 %v1919_v51, %v1920_v17  ;;  %v1990_v6 = vmax.f32 %v1920_v17, -1e+30 }
 0x36f   : > { %v2543_v57 = vpop.permute.xlu0 %2542  ;;  %v1991_v30 = vmax.f32 %v1921_v58, %v1922_v0  ;;  %v1992_v1 = vmax.f32 %v1922_v0, -1e+30  ;;  %v1993_v32 = vmax.f32 %v1923_v34, %v1924_v29  ;;  %v1994_v9 = vmax.f32 %v1924_v29, -1e+30  ;;  %v7378_v29 = vld [vmem:[#allocation32_spill] sm:$0xff] }
 0x370   : > { %v2545_v13 = vpop.permute.xlu1 %2544  ;;  %v2679_v16 = vmax.f32 %v5996_v56, %v2647_v28  ;;  %v2680_v27 = vmax.f32 %v6010_v25, %v2648_v43  ;;  %v2649_v36 = vsel %vm2631_vm8, %v2600_v33, -1e+30  ;;  %v2682_v48 = vmax.f32 %v6013_v50, %v2650_v44  ;;  %v7380_v44 = vld [vmem:[#allocation2_spill] sm:$0xff] }
 0x371   : > { %v2681_v52 = vmax.f32 %v5999_v42, %v2649_v36 }
 0x372   : > { %v2712_v21 = vadd.f32 %v2680_v27, %v1988_v37  ;;  %v2714_v53 = vadd.f32 %v2682_v48, %v1990_v6  ;;  %v7381_v48 = vld [vmem:[#allocation5_spill] sm:$0xff] }
 0x373   : > { %v2575_v26 = vpop.permute.xlu0 %2574  ;;  %v2713_v3 = vadd.f32 %v2681_v52, %v1989_v8 }
 0x374   : > { %v2601_v14 = vsel %vm2594_vm7, %v2543_v57, %v2575_v26  ;;  %v2617_v23 = vsel %vm2594_vm7, %v2575_v26, %v2543_v57  ;;  %v2577_v39 = vpop.permute.xlu1 %2576  ;;  %v2740_v37 = vpack.c.bf16 %v2714_v53, %v2712_v21  ;;  %v7385_v53 = vmov 0  }
 0x375   : > { %v2651_v47 = vsel %vm2631_vm8, %v2601_v14, -1e+30  ;;  %v2652_v56 = vsel %vm2632_vm9, %v2617_v23, -1e+30  ;;  %v2602_v25 = vsel %vm2594_vm7, %v2545_v13, %v2577_v39  ;;  %v2618_v60 = vsel %vm2594_vm7, %v2577_v39, %v2545_v13  ;;  %v7382_v23 = vld [vmem:[#allocation56_spill] sm:$0xff] }
 0x376   : > { %v2683_v50 = vmax.f32 %v6032_v12, %v2651_v47  ;;  %v2684_v49 = vmax.f32 %v6058_v63, %v2652_v56  ;;  %v2653_v7 = vsel %vm2631_vm8, %v2602_v25, -1e+30  ;;  %v2654_v19 = vsel %vm2632_vm9, %v2618_v60, -1e+30 }
 0x377   : > { %v2685_v51 = vmax.f32 %v6035_v20, %v2653_v7  ;;  %v2686_v2 = vmax.f32 %v6063_v46, %v2654_v19  ;;  %v1807_v59 = vpop.permute.xlu0 %1806  ;;  %v2711_v46 = vadd.f32 %v2679_v16, %v1987_v38  ;;  %v7379_v38 = vld [vmem:[#allocation31_spill] sm:$0xff]  ;;  %v7384_v7 = vld [vmem:[#allocation57_spill] sm:$0xff] }
 0x378   : > { %v2715_v17 = vadd.f32 %v2683_v50, %v1991_v30  ;;  %v2716_v4 = vadd.f32 %v2684_v49, %v1992_v1  ;;  %v1855_v12 = vsel %vm1838_vm15, %v1807_v59, %v6065_v41  ;;  %v1809_v63 = vpop.permute.xlu1 %1808  ;;  %v1839_v0 = vsel %vm1838_vm15, %v6065_v41, %v1807_v59  ;;  %v7383_v50 = vld [vmem:[#allocation55_spill] sm:$0xff]  ;;  %v3418_v59 = vld [vmem:[%s6821_s6] sm:$0xff]  }
 0x379   : > { %v2717_v58 = vadd.f32 %v2685_v51, %v1993_v32  ;;  %v2718_v10 = vadd.f32 %v2686_v2, %v1994_v9  ;;  %v1878_v42 = vsel %vm1872_vm1, %v1855_v12, -1e+30  ;;  %v1856_v20 = vsel %vm1838_vm15, %v1809_v63, %v6067_v11 }
 0x37a   : > { %v1909_v57 = vmax.f32 %v7378_v29, %v1839_v0  ;;  %v1910_v28 = vmax.f32 %v6084_v61, %v1878_v42  ;;  %v1840_v41 = vsel %vm1838_vm15, %v6067_v11, %v1809_v63  ;;  %v1880_v43 = vsel %vm1872_vm1, %v1856_v20, -1e+30 }
 0x37b   : > { %v2531_v54 = vpop.permute.xlu0 %2530  ;;  %v2742_v34 = vpack.c.bf16 %v2718_v10, %v2716_v4  ;;  %v2741_v31 = vpack.c.bf16 %v2717_v58, %v2715_v17  ;;  %v1911_v33 = vmax.f32 %v7379_v38, %v1840_v41  ;;  %v1912_v8 = vmax.f32 %v7380_v44, %v1880_v43  ;;  %v3001_v41 = vld [vmem:[%s6823_s8] sm:$0xf] }
 0x37c   : > { %v2533_v13 = vpop.permute.xlu1 %2532  ;;  %v2739_v30 = vpack.c.bf16 %v2713_v3, %v2711_v46  ;;  %v1979_v1 = vmax.f32 %v1909_v57, %v1910_v28  ;;  %v1980_v61 = vmax.f32 %v1910_v28, -1e+30  ;;  %v1432_v28 = vld [vmem:[%s6820_s5] sm:$0xf]  ;;  %vm2875_vm15 = vcmp.ge.s32.totalorder %v4478_v18, 16 }
 0x37d   : > { %2780 = vmatprep.subr.bf16.mxu1 %v2742_v34  ;;  %v1981_v25 = vmax.f32 %v1911_v33, %v1912_v8  ;;  %v1982_v60 = vmax.f32 %v1912_v8, -1e+30  ;;  %v7386_v8 = vld [vmem:[#allocation10_spill] sm:$0xff] }
 0x37e   : > { %2781 = vmatpush1.bf16.msra.mxu1 %v2741_v31 }
 0x37f   : > { %2782 = vmatprep.subr.bf16.mxu1 %v2740_v37  ;;  %v2563_v6 = vpop.permute.xlu0 %2562 }
 0x380   : > { %v2595_v32 = vsel %vm2594_vm7, %v2531_v54, %v2563_v6  ;;  %v2611_v11 = vsel %vm2594_vm7, %v2563_v6, %v2531_v54  ;;  %v2565_v9 = vpop.permute.xlu1 %2564  ;;  %v6605_v6 = vadd.s32 4294967295, %v7386_v8 }
 0x381   : > { %v2639_v16 = vsel %vm2631_vm8, %v2595_v32, -1e+30  ;;  %v2640_v27 = vsel %vm2632_vm9, %v2611_v11, -1e+30  ;;  %v2596_v26 = vsel %vm2594_vm7, %v2533_v13, %v2565_v9  ;;  %v2612_v36 = vsel %vm2594_vm7, %v2565_v9, %v2533_v13 }
 0x382   : > { %v2671_v14 = vmax.f32 %v7381_v48, %v2639_v16  ;;  %v2672_v39 = vmax.f32 %v7382_v23, %v2640_v27  ;;  %v2641_v47 = vsel %vm2631_vm8, %v2596_v26, -1e+30  ;;  %v2642_v56 = vsel %vm2632_vm9, %v2612_v36, -1e+30  ;;  %2783 = vmatpush1.bf16.msra.mxu1 %v2739_v30 }
 0x383   : > { %v2673_v49 = vmax.f32 %v7383_v50, %v2641_v47  ;;  %v2674_v19 = vmax.f32 %v7384_v7, %v2642_v56  ;;  %2784 = vmatprep.subr.bf16.mxu1 %v2738_v62  ;;  %vm2850_vm1 = vcmp.ge.s32.totalorder %v6605_v6, 0  ;;  %vm7036_vm7 = vcmp.lt.s32.totalorder %v4478_v18, 1 }
 0x384   : > { %v2703_v21 = vadd.f32 %v2671_v14, %v1979_v1  ;;  %v2704_v52 = vadd.f32 %v2672_v39, %v1980_v61  ;;  %v7387_v61 = vld [vmem:[#allocation7_spill] sm:$0xff]  ;;  %vm7038_vm9 = vcmp.lt.s32.totalorder %v4478_v18, 113 }
 0x385   : > { %v2705_v51 = vadd.f32 %v2673_v49, %v1981_v25  ;;  %v2706_v2 = vadd.f32 %v2674_v19, %v1982_v60  ;;  %v6613_v32 = vadd.s32 4294967295, %v7387_v61 }
 0x386   : > { %2785 = vmatpush1.bf16.msra.mxu1 %v2737_v15 }
 0x387   : > { %v2736_v35 = vpack.c.bf16 %v2706_v2, %v2704_v52  ;;  %v2735_v55 = vpack.c.bf16 %v2705_v51, %v2703_v21  ;;  %vm2851_vm8 = vcmp.ge.s32.totalorder %v6613_v32, 0 }
 0x389   : > { %2786 = vmatprep.subr.bf16.mxu1 %v2736_v35 }
 0x38a   : > { %2787 = vmatpush1.bf16.msra.mxu1 %v2735_v55 }
 0x38c   : > { %v6598_v43 = vpop.permute.xlu0 %1427 }
 0x38d   : > { %2805 = vmatmul.mubr.bf16.vlgmr.msra.gmra.mxu1 %v3418_v59  ;;  %v6600_v13 = vpop.permute.xlu1 %2996 }
 0x38e   : > { %2814 = vmatprep.mubr.bf16.mxu1 %v7385_v53 }
 0x395   : > { %2815 = vmatmul.mubr.bf16.gmra.mxu1 %v3419_v24 }
 0x396   : > { %2824 = vmatprep.mubr.bf16.mxu1 %v7385_v53 }
 0x39d   : > { %2825 = vmatmul.mubr.bf16.gmra.mxu1 %v3420_v22 }
 0x39e   : > { %3081 = vmatprep.mubr.bf16.mxu1 %v7385_v53 }
 0x44d   : > { %v2806_v45 = vpop.f32.mrf.mxu1 }
 0x44e   : > { %2833 = vrot.lane.b32.xlu0 %v2806_v45, %s3440_s14  ;;  %v2864_v62 = vrot.slane %v2806_v45, 4 }
 0x44f   : > { %v2808_v5 = vpop.f32.mrf.mxu1 }
 0x450   : > { %2835 = vrot.lane.b32.xlu1 %v2808_v5, %s3440_s14  ;;  %v2865_v17 = vrot.slane %v2808_v5, 4 }
 0x451   : > { %v2810_v15 = vpop.f32.mrf.mxu1 }
 0x452   : > { %2868 = vrot.lane.b32.xlu0 %v2864_v62, %s3441_s15  ;;  %v2906_v58 = vrot.slane %v2810_v15, 4 }
 0x453   : > { %v2812_v4 = vpop.f32.mrf.mxu1 }
 0x454   : > { %2870 = vrot.lane.b32.xlu1 %v2865_v17, %s3441_s15  ;;  %v2907_v0 = vrot.slane %v2812_v4, 4 }
 0x455   : > { %v6574_v12 = vpop.f32.mrf.mxu1 }
 0x456   : > { %2885 = vrot.lane.b32.xlu0 %v2810_v15, %s3442_s16  ;;  %v2925_v42 = vrot.slane %v6574_v12, 4 }
 0x457   : > { %v6577_v63 = vpop.f32.mrf.mxu1 }
 0x458   : > { %2887 = vrot.lane.b32.xlu1 %v2812_v4, %s3442_s16  ;;  %v2926_v3 = vrot.slane %v6577_v63, 4 }
 0x459   : > { %v2820_v10 = vpop.f32.mrf.mxu1 }
 0x45a   : > { %2910 = vrot.lane.b32.xlu0 %v2906_v58, %s3443_s17  ;;  %v2960_v29 = vrot.slane %v2820_v10, 4 }
 0x45b   : > { %v2822_v20 = vpop.f32.mrf.mxu1 }
 0x45c   : > { %2912 = vrot.lane.b32.xlu1 %v2907_v0, %s3443_s17  ;;  %v2961_v57 = vrot.slane %v2822_v20, 4 }
 0x45d   : > { %v2826_v46 = vpop.f32.mrf.mxu1 }
 0x45e   : > { %2929 = vrot.lane.b32.xlu0 %v2925_v42, %s3433_s27 }
 0x45f   : > { %v2828_v54 = vpop.f32.mrf.mxu1 }
 0x460   : > { %2931 = vrot.lane.b32.xlu1 %v2926_v3, %s3433_s27 }
 0x461   : > { %v2830_v34 = vpop.f32.mrf.mxu1 }
 0x462   : > { %2939 = vrot.lane.b32.xlu0 %v2820_v10, %s3444_s18 }
 0x463   : > { %v2831_v31 = vpop.f32.mrf.mxu1 }
 0x464   : > { %2941 = vrot.lane.b32.xlu1 %v2822_v20, %s3444_s18 }
 0x466   : > { %2964 = vrot.lane.b32.xlu0 %v2960_v29, %s3434_s28 }
 0x468   : > { %2966 = vrot.lane.b32.xlu1 %v2961_v57, %s3434_s28 }
 0x46a   : > { %2976 = vrot.lane.b32.xlu0 %v2828_v54, %s3445_s19 }
 0x46c   : > { %2974 = vrot.lane.b32.xlu1 %v2826_v46, %s3445_s19 }
 0x46e   : > { %1435 = vperm.xlu0 %3391, %v1432_v28  }
 0x470   : > { %3004 = vperm.xlu1 %3392, %v3001_v41  }
 0x4c0   : > { %v2834_v37 = vpop.permute.xlu0 %2833 }
 0x4c2   : > { %v2836_v38 = vpop.permute.xlu1 %2835 }
 0x4c3   : > { %v2839_v1 = vsel %vm2837_vm10, %v2836_v38, %v2834_v37  ;;  %v2838_v14 = vsel %vm2837_vm10, %v2834_v37, %v2836_v38 }
 0x4c4   : > { %v2869_v33 = vpop.permute.xlu0 %2868  ;;  %v2846_v27 = vsel %vm2840_vm13, %v2839_v1, 0.0  ;;  %v2861_v21 = vsel %vm2851_vm8, %v2838_v14, 0.0 }
 0x4c5   : > { %v2860_v47 = vsel %vm2850_vm1, %v2846_v27, 0.0 }
 0x4c6   : > { %v2871_v44 = vpop.permute.xlu1 %2870 }
 0x4c7   : > { %v2874_v11 = vsel %vm2872_vm11, %v2871_v44, %v2869_v33  ;;  %v2873_v56 = vsel %vm2872_vm11, %v2869_v33, %v2871_v44 }
 0x4c8   : > { %v2886_v30 = vpop.permute.xlu0 %2885  ;;  %v2881_v48 = vsel %vm2875_vm15, %v2874_v11, 0.0  ;;  %v2884_v2 = vadd.f32 %v2873_v56, %v2861_v21 }
 0x4c9   : > { %v2883_v50 = vadd.f32 %v2881_v48, %v2860_v47  ;;  %v7390_v48 = vld [vmem:[#allocation58_spill] sm:$0xff] }
 0x4ca   : > { %v2888_v9 = vpop.permute.xlu1 %2887  ;;  %v1430_v14 = vmul.f32 %v6598_v43, %v7390_v48 }
 0x4cb   : > { %v2891_v16 = vsel %vm2889_vm12, %v2888_v9, %v2886_v30  ;;  %v2890_v23 = vsel %vm2889_vm12, %v2886_v30, %v2888_v9 }
 0x4cc   : > { %v2898_v26 = vsel %vm2892_vm14, %v2891_v16, 0.0  ;;  %v2911_v36 = vpop.permute.xlu0 %2910  ;;  %v2901_v51 = vsel %vm2113_vm5, %v2890_v23, 0.0  ;;  %v7391_v23 = vld [vmem:[#allocation59_spill] sm:$0xff] }
 0x4cd   : > { %v2900_v60 = vsel %vm2112_vm4, %v2898_v26, 0.0  ;;  %v2903_v22 = vadd.f32 %v2901_v51, %v2884_v2 }
 0x4ce   : > { %v2913_v39 = vpop.permute.xlu1 %2912  ;;  %v2902_v35 = vadd.f32 %v2900_v60, %v2883_v50 }
 0x4cf   : > { %v2915_v49 = vsel %vm7036_vm7, %v2911_v36, %v2913_v39  ;;  %v2916_v7 = vsel %vm7036_vm7, %v2913_v39, %v2911_v36  ;;  %vm2947_vm7 = vcmp.lt.s32.totalorder %v4495_v40, 241  ;;  %v1431_v39 = vmul.f32 %v6598_v43, %v7391_v23  ;;  %v3421_v43 = vld [vmem:[%s6824_s9] sm:$0xff]  }
 0x4d0   : > { %v2930_v19 = vpop.permute.xlu0 %2929  ;;  %v2917_v59 = vsel %vm2850_vm1, %v2916_v7, 0.0  ;;  %v2918_v24 = vsel %vm2851_vm8, %v2915_v49, 0.0 }
 0x4d1   : > { %v2919_v5 = vadd.f32 %v2917_v59, %v2902_v35  ;;  %v2920_v62 = vadd.f32 %v2918_v24, %v2903_v22  ;;  %v3423_v22 = vld [vmem:[%s6824_s9 + $0x10] ss:$0 sps:$4 sm:$0x33]  }
 0x4d2   : > { %v2932_v55 = vpop.permute.xlu1 %2931 }
 0x4d3   : > { %v2933_v4 = vsel %vm7037_vm2, %v2930_v19, %v2932_v55  ;;  %v2934_v58 = vsel %vm7037_vm2, %v2932_v55, %v2930_v19  ;;  %v2921_v0 = vadd.f32 %v2919_v5, %v6574_v12  ;;  %v2922_v42 = vadd.f32 %v2920_v62, %v6577_v63 }
 0x4d4   : > { %v2940_v45 = vpop.permute.xlu0 %2939  ;;  %v2935_v54 = vsel %vm2112_vm4, %v2933_v4, 0.0  ;;  %v2936_v34 = vsel %vm2113_vm5, %v2934_v58, 0.0  ;;  %vm2978_vm2 = vcmp.lt.s32.totalorder %v4478_v18, 111 }
 0x4d5   : > { %v2937_v31 = vadd.f32 %v2935_v54, %v2921_v0  ;;  %v2938_v29 = vadd.f32 %v2936_v34, %v2922_v42 }
 0x4d6   : > { %v2942_v15 = vpop.permute.xlu1 %2941 }
 0x4d7   : > { %v2945_v17 = vsel %vm7038_vm9, %v2942_v15, %v2940_v45  ;;  %v2944_v20 = vsel %vm7038_vm9, %v2940_v45, %v2942_v15  ;;  %vm2982_vm9 = vcmp.lt.s32.totalorder %v4495_v40, 239 }
 0x4d8   : > { %v2965_v10 = vpop.permute.xlu0 %2964  ;;  %v2953_v46 = vsel %vm2947_vm7, %v2945_v17, 0.0  ;;  %v2954_v12 = vsel %vm2850_vm1, %v2944_v20, 0.0 }
 0x4d9   : > { %v2955_v63 = vsel %vm2851_vm8, %v2953_v46, 0.0  ;;  %v2956_v38 = vadd.f32 %v2954_v12, %v2937_v31 }
 0x4da   : > { %v2967_v3 = vpop.permute.xlu1 %2966  ;;  %v2957_v33 = vadd.f32 %v2955_v63, %v2938_v29 }
 0x4db   : > { %v2969_v57 = vsel %vm1504_vm3, %v2967_v3, %v2965_v10  ;;  %v2968_v30 = vsel %vm1504_vm3, %v2965_v10, %v2967_v3 }
 0x4dc   : > { %v2977_v28 = vpop.permute.xlu0 %2976  ;;  %v2971_v1 = vsel %vm7039_vm6, %v2969_v57, 0.0  ;;  %v2972_v9 = vadd.f32 %v2968_v30, %v2956_v38  ;;  %vm3033_vm6 = vcmask 31744   ;;  %v3222_v57 = vld [vmem:[%s6825_s10] sm:$0xf] }
 0x4dd   : > { %v2973_v16 = vadd.f32 %v2971_v1, %v2957_v33 }
 0x4de   : > { %v2975_v41 = vpop.permute.xlu1 %2974 }
 0x4df   : > { %v2980_v37 = vsel %vm2978_vm2, %v2977_v28, %v2975_v41  ;;  %v2979_v44 = vsel %vm2978_vm2, %v2975_v41, %v2977_v28  ;;  %v3230_v28 = vld [vmem:[%s6826_s11] sm:$0xf] }
 0x4e0   : > { %v2988_v8 = vsel %vm2982_vm9, %v2980_v37, 0.0  ;;  %v2989_v61 = vsel %vm2112_vm4, %v2979_v44, 0.0 }
 0x4e1   : > { %v2990_v11 = vsel %vm2113_vm5, %v2988_v8, 0.0  ;;  %v2991_v27 = vadd.f32 %v2989_v61, %v2972_v9 }
 0x4e2   : > { %v2992_v26 = vadd.f32 %v2990_v11, %v2973_v16 }
 0x4e3   : > { %v2999_v47 = vmul.f32 %v6600_v13, %v2991_v27 }
 0x4e4   : > { %v3000_v56 = vmul.f32 %v6600_v13, %v2992_v26  ;;  %v3422_v13 = vld [vmem:[%s6824_s9 + $0x8] sm:$0xff]  }
 0x4e9   : > { %v1436_v36 = vpop.permute.xlu0 %1435 }
 0x4ea   : > { %v1438_v50 = vadd.f32 %v1436_v36, %v1430_v14  ;;  %v1439_v49 = vadd.f32 %v1436_v36, %v1431_v39 }
 0x4eb   : > { %v3005_v60 = vpop.permute.xlu1 %3004 }
 0x4ec   : > { %v3007_v7 = vadd.f32 %v3005_v60, %v2999_v47  ;;  %v3008_v19 = vadd.f32 %v3005_v60, %v3000_v56 }
 0x4ee   : > { %v3009_v21 = vadd.f32 %v3007_v7, %v1438_v50  ;;  %v3010_v51 = vadd.f32 %v3008_v19, %v1439_v49 }
 0x4f0   : > { %v3011_v2 = vmax.f32 %v3009_v21, 0.0  ;;  %v3012_v35 = vmax.f32 %v3010_v51, 0.0 }
 0x4f2   : > { %v3013_v55 = vpack.c.bf16 %v3011_v2, %v3011_v2  ;;  %v3014_v59 = vpack.c.bf16 %v3012_v35, %v3012_v35 }
 0x4f4   : > { %3355 = vmatprep.subr.msk.bf16.mxu1 %vm640_vm0, %v3014_v59  ;;  %v3044_v24 = vsel %vm640_vm0, %v3013_v55, 0  ;;  %vm7392_vm0 = vcmp.lt.s32.totalorder %v4478_v18, 1 }
 0x4f5   : > { %3064 = vmatpush1.bf16.msra.mxu1 %v3044_v24 }
 0x4f8   : > { %3356 = vmatmul.mubr.msk.bf16.vlgmr.msra.gmra.mxu1 %vm3033_vm6, %v3421_v43 }
 0x4f9   : > { %3091 = vmatprep.mubr.bf16.mxu1 %v7385_v53 }
 0x500   : > { %3357 = vmatmul.mubr.msk.bf16.gmra.mxu1 %vm3033_vm6, %v3422_v13 }
 0x501   : > { %3101 = vmatprep.mubr.bf16.mxu1 %v7385_v53 }
 0x508   : > { %3358 = vmatmul.mubr.msk.bf16.gmra.mxu1 %vm3033_vm6, %v3423_v22  ;;  %vm7393_vm6 = vmmov %vm7392_vm0 }
 0x5b8   : > { %v3083_v45 = vpop.f32.mrf.mxu1 }
 0x5b9   : > { %3110 = vrot.lane.b32.xlu0 %v3083_v45, %s3440_s14  ;;  %v3122_v62 = vrot.slane %v3083_v45, 4 }
 0x5ba   : > { %v3085_v5 = vpop.f32.mrf.mxu1 }
 0x5bb   : > { %3112 = vrot.lane.b32.xlu1 %v3085_v5, %s3440_s14  ;;  %v3123_v17 = vrot.slane %v3085_v5, 4 }
 0x5bc   : > { %v3087_v15 = vpop.f32.mrf.mxu1 }
 0x5bd   : > { %3126 = vrot.lane.b32.xlu0 %v3122_v62, %s3441_s15  ;;  %v3150_v10 = vrot.slane %v3087_v15, 4 }
 0x5be   : > { %v3089_v4 = vpop.f32.mrf.mxu1 }
 0x5bf   : > { %3128 = vrot.lane.b32.xlu1 %v3123_v17, %s3441_s15  ;;  %v3151_v42 = vrot.slane %v3089_v4, 4 }
 0x5c0   : > { %v6714_v53 = vpop.f32.mrf.mxu1 }
 0x5c1   : > { %3136 = vrot.lane.b32.xlu0 %v3087_v15, %s3442_s16  ;;  %v3168_v20 = vrot.slane %v6714_v53, 4 }
 0x5c2   : > { %v6717_v58 = vpop.f32.mrf.mxu1 }
 0x5c3   : > { %3138 = vrot.lane.b32.xlu1 %v3089_v4, %s3442_s16  ;;  %v3169_v54 = vrot.slane %v6717_v58, 4 }
 0x5c4   : > { %v3097_v0 = vpop.f32.mrf.mxu1 }
 0x5c5   : > { %3154 = vrot.lane.b32.xlu0 %v3150_v10, %s3443_s17  ;;  %v3196_v31 = vrot.slane %v3097_v0, 4 }
 0x5c6   : > { %v3099_v46 = vpop.f32.mrf.mxu1 }
 0x5c7   : > { %3156 = vrot.lane.b32.xlu1 %v3151_v42, %s3443_s17  ;;  %v3197_v29 = vrot.slane %v3099_v46, 4 }
 0x5c8   : > { %v3103_v3 = vpop.f32.mrf.mxu1 }
 0x5c9   : > { %3172 = vrot.lane.b32.xlu0 %v3168_v20, %s3433_s27 }
 0x5ca   : > { %v3105_v34 = vpop.f32.mrf.mxu1 }
 0x5cb   : > { %3174 = vrot.lane.b32.xlu1 %v3169_v54, %s3433_s27 }
 0x5cc   : > { %v3107_v12 = vpop.f32.mrf.mxu1 }
 0x5cd   : > { %3182 = vrot.lane.b32.xlu0 %v3097_v0, %s3444_s18 }
 0x5ce   : > { %v3108_v63 = vpop.f32.mrf.mxu1 }
 0x5cf   : > { %3184 = vrot.lane.b32.xlu1 %v3099_v46, %s3444_s18 }
 0x5d1   : > { %3200 = vrot.lane.b32.xlu0 %v3196_v31, %s3434_s28 }
 0x5d3   : > { %3202 = vrot.lane.b32.xlu1 %v3197_v29, %s3434_s28  ;;  %s3361_s28 = sshll.u32 %s7400_s22, 3 }
 0x5d5   : > { %3210 = vrot.lane.b32.xlu0 %v3103_v3, %s3445_s19 }
 0x5d7   : > { %3212 = vrot.lane.b32.xlu1 %v3105_v34, %s3445_s19  ;;  %s413_s19 = scalar_lea.vmem %s6827_s12, %s3361_s28 }
 0x5d9   : > { %3225 = vperm.xlu0 %3391, %v3222_v57  }
 0x5db   : > { %3233 = vperm.xlu1 %3392, %v3230_v28  }
 0x62b   : > { %v3111_v41 = vpop.permute.xlu0 %3110 }
 0x62d   : > { %v3113_v37 = vpop.permute.xlu1 %3112 }
 0x62e   : > { %v3115_v30 = vsel %vm2837_vm10, %v3113_v37, %v3111_v41  ;;  %v3114_v36 = vsel %vm2837_vm10, %v3111_v41, %v3113_v37  ;;  %vm7394_vm10 = vcmp.lt.s32.totalorder %v4478_v18, 113 }
 0x62f   : > { %v3127_v38 = vpop.permute.xlu0 %3126  ;;  %v3116_v9 = vsel %vm2840_vm13, %v3115_v30, 0.0  ;;  %v3119_v7 = vsel %vm2851_vm8, %v3114_v36, 0.0  ;;  %vm7397_vm13 = vmmov %vm7394_vm10 }
 0x630   : > { %v3118_v23 = vsel %vm2850_vm1, %v3116_v9, 0.0 }
 0x631   : > { %v3129_v33 = vpop.permute.xlu1 %3128 }
 0x632   : > { %v3131_v61 = vsel %vm2872_vm11, %v3129_v33, %v3127_v38  ;;  %v3130_v39 = vsel %vm2872_vm11, %v3127_v38, %v3129_v33  ;;  %vm7395_vm11 = vcmp.lt.s32.totalorder %v4478_v18, 127 }
 0x633   : > { %v3137_v44 = vpop.permute.xlu0 %3136  ;;  %v3132_v26 = vsel %vm2875_vm15, %v3131_v61, 0.0  ;;  %v3135_v21 = vadd.f32 %v3130_v39, %v3119_v7 }
 0x634   : > { %v3134_v56 = vadd.f32 %v3132_v26, %v3118_v23 }
 0x635   : > { %v3139_v8 = vpop.permute.xlu1 %3138 }
 0x636   : > { %v3141_v1 = vsel %vm2889_vm12, %v3139_v8, %v3137_v44  ;;  %v3140_v48 = vsel %vm2889_vm12, %v3137_v44, %v3139_v8  ;;  %vm7396_vm12 = vmmov %vm7395_vm11 }
 0x637   : > { %v3155_v11 = vpop.permute.xlu0 %3154  ;;  %v3142_v16 = vsel %vm2892_vm14, %v3141_v1, 0.0  ;;  %v3145_v19 = vsel %vm2113_vm5, %v3140_v48, 0.0  ;;  %vm7398_vm14 = vcmp.lt.s32.totalorder %v4495_v40, 240 }
 0x638   : > { %v3144_v47 = vsel %vm2112_vm4, %v3142_v16, 0.0  ;;  %v3147_v59 = vadd.f32 %v3145_v19, %v3135_v21 }
 0x639   : > { %v3157_v27 = vpop.permute.xlu1 %3156  ;;  %v3146_v51 = vadd.f32 %v3144_v47, %v3134_v56 }
 0x63a   : > { %v3158_v60 = vsel %vm7392_vm0, %v3155_v11, %v3157_v27  ;;  %v3159_v50 = vsel %vm7393_vm6, %v3157_v27, %v3155_v11 }
 0x63b   : > { %v3173_v14 = vpop.permute.xlu0 %3172  ;;  %v3160_v35 = vsel %vm2850_vm1, %v3159_v50, 0.0  ;;  %v3161_v55 = vsel %vm2851_vm8, %v3158_v60, 0.0 }
 0x63c   : > { %v3162_v43 = vadd.f32 %v3160_v35, %v3146_v51  ;;  %v3163_v13 = vadd.f32 %v3161_v55, %v3147_v59 }
 0x63d   : > { %v3175_v49 = vpop.permute.xlu1 %3174 }
 0x63e   : > { %v3176_v5 = vsel %vm7395_vm11, %v3173_v14, %v3175_v49  ;;  %v3177_v62 = vsel %vm7396_vm12, %v3175_v49, %v3173_v14  ;;  %v3164_v17 = vadd.f32 %v3162_v43, %v6714_v53  ;;  %v3165_v4 = vadd.f32 %v3163_v13, %v6717_v58 }
 0x63f   : > { %v3183_v2 = vpop.permute.xlu0 %3182  ;;  %v3178_v42 = vsel %vm2112_vm4, %v3176_v5, 0.0  ;;  %v3179_v20 = vsel %vm2113_vm5, %v3177_v62, 0.0 }
 0x640   : > { %v3180_v34 = vadd.f32 %v3178_v42, %v3164_v17  ;;  %v3181_v12 = vadd.f32 %v3179_v20, %v3165_v4 }
 0x641   : > { %v3185_v24 = vpop.permute.xlu1 %3184 }
 0x642   : > { %v3187_v45 = vsel %vm7394_vm10, %v3185_v24, %v3183_v2  ;;  %v3186_v10 = vsel %vm7397_vm13, %v3183_v2, %v3185_v24 }
 0x643   : > { %v3201_v22 = vpop.permute.xlu0 %3200  ;;  %v3189_v0 = vsel %vm2947_vm7, %v3187_v45, 0.0  ;;  %v3190_v54 = vsel %vm2850_vm1, %v3186_v10, 0.0 }
 0x644   : > { %v3191_v53 = vsel %vm2851_vm8, %v3189_v0, 0.0  ;;  %v3192_v31 = vadd.f32 %v3190_v54, %v3180_v34 }
 0x645   : > { %v3203_v15 = vpop.permute.xlu1 %3202  ;;  %v3193_v29 = vadd.f32 %v3191_v53, %v3181_v12 }
 0x646   : > { %v3205_v63 = vsel %vm1504_vm3, %v3203_v15, %v3201_v22  ;;  %v3204_v32 = vsel %vm1504_vm3, %v3201_v22, %v3203_v15 }
 0x647   : > { %v3211_v46 = vpop.permute.xlu0 %3210  ;;  %v3207_v28 = vsel %vm7398_vm14, %v3205_v63, 0.0  ;;  %v3208_v38 = vadd.f32 %v3204_v32, %v3192_v31 }
 0x648   : > { %v3209_v33 = vadd.f32 %v3207_v28, %v3193_v29 }
 0x649   : > { %v3213_v3 = vpop.permute.xlu1 %3212 }
 0x64a   : > { %v3215_v58 = vsel %vm2978_vm2, %v3213_v3, %v3211_v46  ;;  %v3214_v57 = vsel %vm2978_vm2, %v3211_v46, %v3213_v3 }
 0x64b   : > { %v3217_v6 = vsel %vm2982_vm9, %v3215_v58, 0.0  ;;  %v3218_v41 = vsel %vm2112_vm4, %v3214_v57, 0.0 }
 0x64c   : > { %v3219_v37 = vsel %vm2113_vm5, %v3217_v6, 0.0  ;;  %v3220_v44 = vadd.f32 %v3218_v41, %v3208_v38 }
 0x64d   : > { %v3221_v8 = vadd.f32 %v3219_v37, %v3209_v33 }
 0x654   : > { %v3226_v30 = vpop.permute.xlu0 %3225 }
 0x655   : > { %v3228_v1 = vmul.f32 %v3226_v30, %v3220_v44  ;;  %v3229_v61 = vmul.f32 %v3226_v30, %v3221_v8 }
 0x656   : > { %v3234_v11 = vpop.permute.xlu1 %3233 }
 0x657   : > { %v3236_v18 = vadd.f32 %v3234_v11, %v3228_v1  ;;  %v3237_v9 = vadd.f32 %v3234_v11, %v3229_v61 }
 0x659   : > { %v3238_v16 = vmax.f32 %v3236_v18, 0.0  ;;  %v3239_v40 = vmax.f32 %v3237_v9, 0.0 }
 0x65b   : > { %v3242_v25 = vcombine.low %v3238_v16, %v3239_v40 }
 0x65d   : > { %3244 = vst [vmem:[%s413_s19] sm:$0xff] %v3242_v25 }
 0x65e PF: > { %s22_s21 = sadd.s32 1, %s3430_s21  }
 0x65f   : > { %p19_p4 = scmp.ge.s32.totalorder %s22_s21, 4  }
 0x661   :  { %21 = sbr.rel (!%p19_p4) target bundleno = 1 (0x1), region = 98 }

</bundles_post_ra>
